<compile_context>
chip_gen: v5e
topology: v5e:2x2
jax: 0.10.0
libtpu: 0.0.40
codegen_flags: <defaults>
</compile_context>

<pallas_src>
import functools
import math

import jax
import jax.numpy as jnp
from jax import lax
from jax.experimental import pallas as pl
from jax.experimental.pallas import tpu as pltpu

_EPS = 1e-12  # F.normalize default eps


def _class_tiling(out_neurons: int, class_tile: int):
    """Return (tile, padded_out): tile is a multiple of 128 (lane-dense)."""
    out_p128 = ((out_neurons + 127) // 128) * 128
    tile = max(128, (min(class_tile, out_p128) // 128) * 128)
    out_padded = pl.cdiv(out_neurons, tile) * tile
    return tile, out_padded


def _classifier_kernel(x_ref, w_ref, o_ref):
    # x_ref: (Bp, D)  embeddings, resident across all class tiles (f32)
    # w_ref: (TO, D)  class-weight tile for this grid step (bf16 or f32 stream)
    # o_ref: (Bp, TO) output tile (f32), lane-dense (TO multiple of 128)
    eps2 = jnp.float32(_EPS * _EPS)

    # 1/max(||row||, eps) == rsqrt(max(sum(row^2), eps^2)); rsqrt -> EUP slot.
    x = x_ref[...].astype(jnp.float32)
    inv_x = lax.rsqrt(jnp.maximum(jnp.sum(x * x, axis=-1, keepdims=True), eps2))
    xn = (x * inv_x).astype(jnp.bfloat16)

    w = w_ref[...].astype(jnp.float32)
    inv_w = lax.rsqrt(jnp.maximum(jnp.sum(w * w, axis=-1, keepdims=True), eps2))
    # Fold the scale into the weight tile (lane-broadcast, no cross-lane relayout);
    # the VPU multiply is hidden behind the weight DMA.
    wn = (w * inv_w).astype(jnp.bfloat16)

    # Contract over D for BOTH operands -> MXU-direct, no weight transpose.
    # bf16 operands, f32 accumulation.
    o_ref[...] = lax.dot_general(
        xn,
        wn,
        dimension_numbers=(((1,), (1,)), ((), ())),
        preferred_element_type=jnp.float32,
    ).astype(o_ref.dtype)


def prepare_classifier_weight(weight, *, class_tile=640, dtype=jnp.bfloat16):
    """Pad the class dim to the tile grid and cast for streaming.

    Call ONCE at parameter-setup time (outside the per-call forward path) so the
    kernel never re-pads / re-casts the weight in HBM on every invocation.
    """
    out_neurons, _ = weight.shape
    _, out_padded = _class_tiling(out_neurons, class_tile)
    if out_padded != out_neurons:
        weight = jnp.pad(weight, ((0, out_padded - out_neurons), (0, 0)))
    return weight.astype(dtype)


@functools.partial(jax.jit, static_argnames=("out_neurons", "class_tile"))
def classifier_forward(x, weight_prepared, *, out_neurons, class_tile=640):
    """x: (B, 1, D) f32; weight_prepared: (OUTp, D) from prepare_classifier_weight.

    Returns (B, 1, out_neurons) cosine similarities, matching
    F.linear(F.normalize(x.squeeze(1)), F.normalize(W)).unsqueeze(1).
    """
    B, one, D = x.shape
    assert one == 1, "expected (B, 1, D) input"
    TO, OUTp = _class_tiling(out_neurons, class_tile)
    OUTw, Dw = weight_prepared.shape
    assert Dw == D and OUTw == OUTp, "run prepare_classifier_weight first"

    x2d = x.reshape(B, D)                      # squeeze(1) — glue in plain JAX
    Bp = ((B + 7) // 8) * 8                    # full f32 sublane tile
    if Bp != B:
        x2d = jnp.pad(x2d, ((0, Bp - B), (0, 0)))

    grid = (OUTp // TO,)                       # 2 tiles of 640 for OUT=1211

    cost = pl.CostEstimate(
        flops=2 * Bp * D * OUTp,
        transcendentals=Bp * grid[0] + OUTp,   # rsqrt per x-row per step + per w-row
        bytes_accessed=(
            Bp * D * x2d.dtype.itemsize
            + OUTp * D * weight_prepared.dtype.itemsize
            + Bp * OUTp * 4
        ),
    )

    out2d = pl.pallas_call(
        _classifier_kernel,
        out_shape=jax.ShapeDtypeStruct((Bp, OUTp), jnp.float32),
        grid_spec=pltpu.PrefetchScalarGridSpec(
            num_scalar_prefetch=0,
            grid=grid,
            in_specs=[
                # embeddings stay resident across all class tiles
                pl.BlockSpec((Bp, D), lambda j: (0, 0)),
                # weight streams one (TO, D) tile per step (double-buffered DMA)
                pl.BlockSpec((TO, D), lambda j: (j, 0)),
            ],
            out_specs=pl.BlockSpec((Bp, TO), lambda j: (0, j)),
        ),
        compiler_params=pltpu.CompilerParams(
            # Class tiles are independent -> megacore-shardable. On v7x, if the
            # grid is not being split across the 2 TCs, switch this axis to
            # pltpu.CORE_PARALLEL.
            dimension_semantics=("parallel",),
        ),
        cost_estimate=cost,
    )(x2d, weight_prepared)

    return out2d[:B, :out_neurons].reshape(B, 1, out_neurons)


if __name__ == "__main__":
    # Module defaults: lin_blocks=0, lin_neurons=192 (=input_size), out_neurons=1211.
    B, D, OUT = 4, 192, 1211

    key = jax.random.PRNGKey(0)
    kx, kw = jax.random.split(key)
    x = jax.random.normal(kx, (B, 1, D), dtype=jnp.float32)

    # matches nn.init.xavier_uniform_ for a 2D (fan_out, fan_in) tensor
    limit = math.sqrt(6.0 / (D + OUT))
    weight = jax.random.uniform(kw, (OUT, D), jnp.float32, minval=-limit, maxval=limit)

    # One-time weight prep (pad to tile grid + bf16 cast) outside the forward.
    wp = prepare_classifier_weight(weight, class_tile=640, dtype=jnp.bfloat16)

    out = classifier_forward(x, wp, out_neurons=OUT, class_tile=640)
    out = jax.block_until_ready(out)

    # Pure-JAX f32 reference of the same math. Tolerance loosened because the
    # weight/embedding stream into the MXU is bf16 (accumulation is f32).
    xr = x.reshape(B, D)
    xr = xr / jnp.maximum(jnp.linalg.norm(xr, axis=-1, keepdims=True), 1e-12)
    wr = weight / jnp.maximum(jnp.linalg.norm(weight, axis=-1, keepdims=True), 1e-12)
    ref = (xr @ wr.T).reshape(B, 1, OUT)

    assert out.shape == (B, 1, OUT)
    err = float(jnp.max(jnp.abs(out - ref)))
    assert jnp.allclose(out, ref, atol=1e-2), f"mismatch vs reference: {err}"

    print("KERNEL_OK")
</pallas_src>

<mosaic_0001>
module attributes {stable_mosaic.version = 11 : i64} {
  func.func @_classifier_kernel(%arg0: i32, %arg1: memref<8x192xf32, #tpu.memory_space<vmem>>, %arg2: memref<640x192xbf16, #tpu.memory_space<vmem>>, %arg3: memref<8x640xf32, #tpu.memory_space<vmem>>) attributes {dimension_semantics = [#tpu.dimension_semantics<parallel>], iteration_bounds = array<i64: 2>, scalar_prefetch = 0 : i64, scratch_operands = 0 : i64, tpu.core_type = #tpu.core_type<tc>, window_params = [{pipeline_mode = #tpu.pipeline_mode<synchronous>, transform_indices = @transform_0, window_bounds = array<i64: 8, 192>}, {transform_indices = @transform_1, window_bounds = array<i64: 640, 192>}, {transform_indices = @transform_2, window_bounds = array<i64: 8, 640>}]} {
    %c0 = arith.constant 0 : index
    %c0_0 = arith.constant 0 : index
    %0 = vector.load %arg1[%c0, %c0_0] : memref<8x192xf32, #tpu.memory_space<vmem>>, vector<8x192xf32>
    %1 = arith.mulf %0, %0 : vector<8x192xf32>
    %cst = arith.constant dense<0.000000e+00> : vector<8xf32>
    %2 = vector.multi_reduction <add>, %1, %cst [1] : vector<8x192xf32> to vector<8xf32>
    %3 = vector.shape_cast %2 : vector<8xf32> to vector<8x1xf32>
    %cst_1 = arith.constant 1.000000e-24 : f32
    %4 = vector.broadcast %cst_1 : f32 to vector<8x1xf32>
    %5 = arith.maximumf %3, %4 : vector<8x1xf32>
    %6 = math.rsqrt %5 : vector<8x1xf32>
    %7 = vector.broadcast %6 : vector<8x1xf32> to vector<8x192xf32>
    %8 = arith.mulf %0, %7 : vector<8x192xf32>
    %9 = arith.truncf %8 : vector<8x192xf32> to vector<8x192xbf16>
    %c0_2 = arith.constant 0 : index
    %c0_3 = arith.constant 0 : index
    %10 = vector.load %arg2[%c0_2, %c0_3] : memref<640x192xbf16, #tpu.memory_space<vmem>>, vector<640x192xbf16>
    %11 = arith.extf %10 : vector<640x192xbf16> to vector<640x192xf32>
    %12 = arith.mulf %11, %11 : vector<640x192xf32>
    %cst_4 = arith.constant dense<0.000000e+00> : vector<640xf32>
    %13 = vector.multi_reduction <add>, %12, %cst_4 [1] : vector<640x192xf32> to vector<640xf32>
    %14 = vector.shape_cast %13 : vector<640xf32> to vector<640x1xf32>
    %cst_5 = arith.constant 1.000000e-24 : f32
    %15 = vector.broadcast %cst_5 : f32 to vector<640x1xf32>
    %16 = arith.maximumf %14, %15 : vector<640x1xf32>
    %17 = math.rsqrt %16 : vector<640x1xf32>
    %18 = vector.broadcast %17 : vector<640x1xf32> to vector<640x192xf32>
    %19 = arith.mulf %11, %18 : vector<640x192xf32>
    %20 = arith.truncf %19 : vector<640x192xf32> to vector<640x192xbf16>
    %cst_6 = arith.constant dense<0.000000e+00> : vector<8x640xf32>
    %21 = tpu.matmul %9, %20, %cst_6 {dimension_numbers = #tpu.dot_dimension_numbers<[1], [1], [0], [0], [0, 0, 1, 0], [], []>} : vector<8x192xbf16>, vector<640x192xbf16>, vector<8x640xf32> -> vector<8x640xf32>
    %c0_7 = arith.constant 0 : index
    %c0_8 = arith.constant 0 : index
    %22 = vector.load %arg3[%c0_7, %c0_8] : memref<8x640xf32, #tpu.memory_space<vmem>>, vector<8x640xf32>
    tpu.vector_store %arg3[%c0_7, %c0_8], %21 {strides = array<i32>} : memref<8x640xf32, #tpu.memory_space<vmem>>, vector<8x640xf32>,
    return
  }
  func.func @transform_0(%arg0: i32) -> (i32, i32) {
    %c0_i32 = arith.constant 0 : i32
    %c0_i32_0 = arith.constant 0 : i32
    %c0_i32_1 = arith.constant 0 : i32
    return %c0_i32, %c0_i32_0 : i32, i32
  }
  func.func @transform_1(%arg0: i32) -> (i32, i32) {
    %c0_i32 = arith.constant 0 : i32
    %c0_i32_0 = arith.constant 0 : i32
    return %arg0, %c0_i32 : i32, i32
  }
  func.func @transform_2(%arg0: i32) -> (i32, i32) {
    %c0_i32 = arith.constant 0 : i32
    %c0_i32_0 = arith.constant 0 : i32
    return %c0_i32, %arg0 : i32, i32
  }
}

</mosaic_0001>

<bundles_post_ra>
// kernel: classifier_forward.1
= control target key start
LH: loop header
LB: loop body
LE: loop exit
PB: predicated region body
PF: predicated region fallthrough
CT: control target
= control target key end

     0   :  { %s2539_s9 = smov 0   ;;  %s5287_s0 = inlined_call_operand.vmem [shape: f32[8,192], index: 0, kind: input, shape index: {}]   ;;  %s5288_s1 = inlined_call_operand.vmem [shape: bf16[1280,192], index: 1, kind: input, shape index: {}]   ;;  %s5289_s2 = inlined_call_operand.vmem [shape: f32[8,1280], index: 2, kind: output, shape index: {}]  }
   0x1 LB: > { %s2328_s10 = sadd.s32 4294967295, %s2522_s9   ;;  %p2332_p0 = scmp.ge.s32.totalorder %s2522_s9, 1  ;;  %s2522_s9 = sphi %s2539_s9, %s12_s9  }
   0x2   : > { %p114_p1 = scmp.lt.s32.totalorder %s2522_s9, 3 }
   0x4   : > { %p115_p2 = pnand %p2332_p0, %p114_p1 }
   0x6   : > { %118 = sbr.rel (%p115_p2) target bundleno = 617 (0x269), region = 28 }
   0xb   : > { %s137_s11 = smul.u32 80, %s2328_s10  ;;  %vm154_vm0 = vcmask 523264  }
   0xc   : > { %s4864_s24 = smul.u32 5, %s2328_s10 }
   0xd   : > { %p138_p3 = scmp.lt.s32.totalorder %s137_s11, 159 }
   0xe   : > { %p145_p4 = scmp.lt.s32.totalorder %s4864_s24, 9 }
   0xf   : > { %s5846_s11 = smov (!%p138_p3, %s137_s11), 159 }
  0x10   : > { %s2343_s12 = sshll.u32 %s5846_s11, 3  ;;  %s5848_s24 = smov (!%p145_p4, %s4864_s24), 9 }
  0x11   : > { %s2552_s15 = scalar_lea.vmem %s5288_s1, %s2343_s12  ;;  %s2335_s25 = sshll.u32 %s5848_s24, 3 }
  0x12   : > { %v188_v0 = vld [vmem:[%s2552_s15 + $0x70] sm:$0xff]  ;;  %v186_v1 = vld [vmem:[%s2552_s15 + $0x60] sm:$0xff]  ;;  %v189_v7 = vld [vmem:[%s2552_s15 + $0x78] sm:$0xff]  ;;  %s5016_s28 = scalar_lea.vmem %s5289_s2, %s2335_s25 }
  0x13   : > { %v184_v2 = vld [vmem:[%s2552_s15 + $0x50] sm:$0xff]  ;;  %v2557_v3 = vunpack.c.l.bf16 %v188_v0  ;;  %v2559_v4 = vunpack.c.h.bf16 %v188_v0  ;;  %v2561_v5 = vunpack.c.l.bf16 %v186_v1  ;;  %v2563_v6 = vunpack.c.h.bf16 %v186_v1  ;;  %v187_v12 = vld [vmem:[%s2552_s15 + $0x68] sm:$0xff]  ;;  %v185_v24 = vld [vmem:[%s2552_s15 + $0x58] sm:$0xff] }
  0x14   : > { %v2566_v8 = vunpack.c.l.bf16 %v184_v2  ;;  %v2568_v9 = vunpack.c.h.bf16 %v184_v2  ;;  %v2570_v10 = vunpack.c.l.bf16 %v189_v7  ;;  %v2572_v11 = vunpack.c.h.bf16 %v189_v7  ;;  %v183_v28 = vld [vmem:[%s2552_s15 + $0x48] sm:$0xff]  ;;  %v182_v29 = vld [vmem:[%s2552_s15 + $0x40] sm:$0xff]  ;;  %v180_v37 = vld [vmem:[%s2552_s15 + $0x30] sm:$0xff] }
  0x15   : > { %v442_v13 = vmul.f32 %v2557_v3, %v2557_v3  ;;  %v443_v14 = vmul.f32 %v2559_v4, %v2559_v4  ;;  %v438_v15 = vmul.f32 %v2561_v5, %v2561_v5  ;;  %v439_v16 = vmul.f32 %v2563_v6, %v2563_v6  ;;  %v181_v53 = vld [vmem:[%s2552_s15 + $0x38] sm:$0xff]  ;;  %v178_v55 = vld [vmem:[%s2552_s15 + $0x20] sm:$0xff]  ;;  %v179_v56 = vld [vmem:[%s2552_s15 + $0x28] sm:$0xff] }
  0x16   : > { %v434_v17 = vmul.f32 %v2566_v8, %v2566_v8  ;;  %v435_v18 = vmul.f32 %v2568_v9, %v2568_v9  ;;  %v445_v19 = vmul.f32 %v2572_v11, %v2572_v11  ;;  %v2591_v22 = vunpack.c.l.bf16 %v187_v12 }
  0x17   : > { %v630_v20 = vsel %vm154_vm0, %v443_v14, 0.0  ;;  %v622_v21 = vsel %vm154_vm0, %v439_v16, 0.0  ;;  %v2593_v23 = vunpack.c.h.bf16 %v187_v12  ;;  %v444_v31 = vmul.f32 %v2570_v10, %v2570_v10 }
  0x18   : > { %v631_v25 = vadd.f32 %v630_v20, %v442_v13  ;;  %v623_v26 = vadd.f32 %v622_v21, %v438_v15  ;;  %v614_v27 = vsel %vm154_vm0, %v435_v18, 0.0  ;;  %v634_v33 = vsel %vm154_vm0, %v445_v19, 0.0  ;;  %v204_v19 = vld [vmem:[%s2552_s15 + $0xf0] sm:$0xff]  ;;  %v205_v20 = vld [vmem:[%s2552_s15 + $0xf8] sm:$0xff] }
  0x19   : > { %v615_v30 = vadd.f32 %v614_v27, %v434_v17  ;;  %v441_v32 = vmul.f32 %v2593_v23, %v2593_v23  ;;  %v440_v34 = vmul.f32 %v2591_v22, %v2591_v22  ;;  %v2606_v35 = vunpack.c.l.bf16 %v185_v24  ;;  %v176_v21 = vld [vmem:[%s2552_s15 + $0x10] sm:$0xff] }
  0x1a   : > { %632 = vadd.xlane.f32.xlu0 %v631_v25  ;;  %624 = vadd.xlane.f32.xlu1 %v623_v26  ;;  %v2608_v36 = vunpack.c.h.bf16 %v185_v24  ;;  %v2612_v39 = vunpack.c.h.bf16 %v183_v28  ;;  %v2614_v40 = vunpack.c.h.bf16 %v182_v29  ;;  %v635_v43 = vadd.f32 %v634_v33, %v444_v31 }
  0x1b   : > { %616 = vadd.xlane.f32.xlu2 %v615_v30  ;;  %v626_v38 = vsel %vm154_vm0, %v441_v32, 0.0  ;;  %v436_v41 = vmul.f32 %v2606_v35, %v2606_v35  ;;  %v2620_v44 = vunpack.c.h.bf16 %v180_v37  ;;  %v2623_v47 = vunpack.c.l.bf16 %v183_v28 }
  0x1c   : > { %v437_v42 = vmul.f32 %v2608_v36, %v2608_v36  ;;  %v627_v45 = vadd.f32 %v626_v38, %v440_v34  ;;  %v2625_v48 = vunpack.c.l.bf16 %v182_v29  ;;  %v433_v50 = vmul.f32 %v2612_v39, %v2612_v39 }
  0x1d   : > { %v431_v51 = vmul.f32 %v2614_v40, %v2614_v40  ;;  %v2631_v52 = vunpack.c.l.bf16 %v180_v37  ;;  %v427_v54 = vmul.f32 %v2620_v44, %v2620_v44  ;;  %v432_v57 = vmul.f32 %v2623_v47, %v2623_v47 }
  0x1e   : > { %v618_v46 = vsel %vm154_vm0, %v437_v42, 0.0  ;;  %v430_v58 = vmul.f32 %v2625_v48, %v2625_v48  ;;  %v2642_v59 = vunpack.c.h.bf16 %v181_v53  ;;  %v610_v60 = vsel %vm154_vm0, %v433_v50, 0.0  ;;  %v177_v50 = vld [vmem:[%s2552_s15 + $0x18] sm:$0xff] }
  0x1f   : > { %v619_v49 = vadd.f32 %v618_v46, %v436_v41  ;;  %v606_v61 = vsel %vm154_vm0, %v431_v51, 0.0  ;;  %v426_v62 = vmul.f32 %v2631_v52, %v2631_v52  ;;  %v2648_v63 = vunpack.c.h.bf16 %v178_v55  ;;  %v221_v51 = vld [vmem:[%s2552_s15 + $0x178] sm:$0xff] }
  0x20   : > { %v598_v0 = vsel %vm154_vm0, %v427_v54, 0.0  ;;  %v2651_v1 = vunpack.c.h.bf16 %v179_v56  ;;  %v2653_v2 = vunpack.c.l.bf16 %v181_v53  ;;  %v611_v7 = vadd.f32 %v610_v60, %v432_v57 }
  0x21   : > { %5465 = vst [vmem:[#allocation2_spill] sm:$0xff] %v2648_v63  ;;  %v607_v12 = vadd.f32 %v606_v61, %v430_v58  ;;  %v429_v13 = vmul.f32 %v2642_v59, %v2642_v59  ;;  %v2657_v14 = vunpack.c.l.bf16 %v178_v55  ;;  %v599_v15 = vadd.f32 %v598_v0, %v426_v62 }
  0x22   : > { %636 = vadd.xlane.f32.xlu0 %v635_v43  ;;  %628 = vadd.xlane.f32.xlu1 %v627_v45  ;;  %5466 = vst [vmem:[#allocation3_spill] sm:$0xff] %v2651_v1  ;;  %v2659_v16 = vunpack.c.l.bf16 %v179_v56  ;;  %v423_v17 = vmul.f32 %v2648_v63, %v2648_v63  ;;  %v425_v18 = vmul.f32 %v2651_v1, %v2651_v1  ;;  %v2676_v29 = vunpack.c.h.bf16 %v204_v19 }
  0x23   : > { %620 = vadd.xlane.f32.xlu2 %v619_v49  ;;  %5467 = vst [vmem:[#allocation4_spill] sm:$0xff] %v2657_v14  ;;  %v428_v24 = vmul.f32 %v2653_v2, %v2653_v2  ;;  %v602_v25 = vsel %vm154_vm0, %v429_v13, 0.0  ;;  %v422_v26 = vmul.f32 %v2657_v14, %v2657_v14  ;;  %v2678_v30 = vunpack.c.h.bf16 %v205_v20  ;;  %v220_v49 = vld [vmem:[%s2552_s15 + $0x170] sm:$0xff] }
  0x24   : > { %5468 = vst [vmem:[#allocation5_spill] sm:$0xff] %v2659_v16  ;;  %v424_v27 = vmul.f32 %v2659_v16, %v2659_v16  ;;  %v590_v28 = vsel %vm154_vm0, %v423_v17, 0.0  ;;  %v594_v31 = vsel %vm154_vm0, %v425_v18, 0.0  ;;  %v2681_v32 = vunpack.c.h.bf16 %v176_v21 }
  0x25   : > { %v2683_v33 = vunpack.c.l.bf16 %v204_v19  ;;  %v603_v34 = vadd.f32 %v602_v25, %v428_v24  ;;  %v591_v37 = vadd.f32 %v590_v28, %v422_v26  ;;  %v2685_v38 = vunpack.c.l.bf16 %v205_v20  ;;  %v203_v20 = vld [vmem:[%s2552_s15 + $0xe8] sm:$0xff]  ;;  %v202_v24 = vld [vmem:[%s2552_s15 + $0xe0] sm:$0xff] }
  0x26   : > { %5469 = vst [vmem:[#allocation6_spill] sm:$0xff] %v2681_v32  ;;  %v2687_v41 = vunpack.c.l.bf16 %v176_v21  ;;  %v595_v42 = vadd.f32 %v594_v31, %v424_v27  ;;  %v475_v43 = vmul.f32 %v2676_v29, %v2676_v29  ;;  %v477_v45 = vmul.f32 %v2678_v30, %v2678_v30  ;;  %v174_v25 = vld [vmem:[%s2552_s15] sm:$0xff] }
  0x27   : > { %v419_v46 = vmul.f32 %v2681_v32, %v2681_v32  ;;  %v474_v53 = vmul.f32 %v2683_v33, %v2683_v33  ;;  %v476_v54 = vmul.f32 %v2685_v38, %v2685_v38  ;;  %v2706_v58 = vunpack.c.h.bf16 %v220_v49 }
  0x28   : > { %5470 = vst [vmem:[#allocation7_spill] sm:$0xff] %v2687_v41  ;;  %v418_v55 = vmul.f32 %v2687_v41, %v2687_v41  ;;  %v694_v56 = vsel %vm154_vm0, %v475_v43, 0.0  ;;  %v698_v57 = vsel %vm154_vm0, %v477_v45, 0.0  ;;  %v2708_v60 = vunpack.c.h.bf16 %v177_v50 }
  0x29   : > { %5471 = vst [vmem:[#allocation8_spill] sm:$0xff] %v2706_v58  ;;  %v582_v61 = vsel %vm154_vm0, %v419_v46, 0.0  ;;  %v2711_v62 = vunpack.c.h.bf16 %v221_v51  ;;  %v695_v0 = vadd.f32 %v694_v56, %v474_v53  ;;  %v2715_v13 = vunpack.c.l.bf16 %v177_v50 }
  0x2a   : > { %612 = vadd.xlane.f32.xlu1 %v611_v7  ;;  %608 = vadd.xlane.f32.xlu0 %v607_v12  ;;  %5472 = vst [vmem:[#allocation9_spill] sm:$0xff] %v2708_v60  ;;  %v699_v7 = vadd.f32 %v698_v57, %v476_v54  ;;  %v2713_v12 = vunpack.c.l.bf16 %v220_v49  ;;  %v507_v17 = vmul.f32 %v2706_v58, %v2706_v58  ;;  %v2721_v19 = vunpack.c.l.bf16 %v221_v51  ;;  %v237_v58 = vld [vmem:[%s2552_s15 + $0x1f8] sm:$0xff] }
  0x2b   : > { %600 = vadd.xlane.f32.xlu2 %v599_v15  ;;  %5473 = vst [vmem:[#allocation10_spill] sm:$0xff] %v2711_v62  ;;  %v583_v15 = vadd.f32 %v582_v61, %v418_v55  ;;  %v421_v18 = vmul.f32 %v2708_v60, %v2708_v60  ;;  %v509_v21 = vmul.f32 %v2711_v62, %v2711_v62  ;;  %v2732_v28 = vunpack.c.h.bf16 %v203_v20  ;;  %v218_v61 = vld [vmem:[%s2552_s15 + $0x160] sm:$0xff]  ;;  %v200_v62 = vld [vmem:[%s2552_s15 + $0xd0] sm:$0xff] }
  0x2c   : > { %5474 = vst [vmem:[#allocation11_spill] sm:$0xff] %v2713_v12  ;;  %v506_v26 = vmul.f32 %v2713_v12, %v2713_v12  ;;  %v420_v27 = vmul.f32 %v2715_v13, %v2715_v13  ;;  %v758_v31 = vsel %vm154_vm0, %v507_v17, 0.0  ;;  %v2741_v45 = vunpack.c.h.bf16 %v174_v25 }
  0x2d   : > { %5475 = vst [vmem:[#allocation12_spill] sm:$0xff] %v2715_v13  ;;  %v762_v43 = vsel %vm154_vm0, %v509_v21, 0.0  ;;  %v2743_v46 = vunpack.c.l.bf16 %v203_v20  ;;  %v473_v51 = vmul.f32 %v2732_v28, %v2732_v28  ;;  %v2747_v53 = vunpack.c.l.bf16 %v202_v24 }
  0x2e   : > { %5476 = vst [vmem:[#allocation13_spill] sm:$0xff] %v2721_v19  ;;  %v759_v49 = vadd.f32 %v758_v31, %v506_v26  ;;  %v2751_v56 = vunpack.c.l.bf16 %v174_v25  ;;  %v415_v57 = vmul.f32 %v2741_v45, %v2741_v45 }
  0x2f   : > { %5477 = vst [vmem:[#allocation14_spill] sm:$0xff] %v2732_v28  ;;  %v690_v17 = vsel %vm154_vm0, %v473_v51, 0.0 }
  0x30   : > { %5479 = vst [vmem:[#allocation16_spill] sm:$0xff] %v2741_v45  ;;  %v414_v21 = vmul.f32 %v2751_v56, %v2751_v56  ;;  %v574_v26 = vsel %vm154_vm0, %v415_v57, 0.0  ;;  %v231_v45 = vld [vmem:[%s2552_s15 + $0x1c8] sm:$0xff] }
  0x31   : > { %5480 = vst [vmem:[#allocation17_spill] sm:$0xff] %v2743_v46 }
  0x32   : > { %604 = vadd.xlane.f32.xlu0 %v603_v34  ;;  %592 = vadd.xlane.f32.xlu1 %v591_v37  ;;  %v586_v34 = vsel %vm154_vm0, %v421_v18, 0.0  ;;  %v508_v37 = vmul.f32 %v2721_v19, %v2721_v19  ;;  %5481 = vst [vmem:[#allocation18_spill] sm:$0xff] %v2747_v53  ;;  %v470_v18 = vmul.f32 %v2747_v53, %v2747_v53  ;;  %v216_v19 = vld [vmem:[%s2552_s15 + $0x150] sm:$0xff] }
  0x33   : > { %596 = vadd.xlane.f32.xlu2 %v595_v42  ;;  %v2738_v42 = vunpack.c.h.bf16 %v202_v24  ;;  %v587_v50 = vadd.f32 %v586_v34, %v420_v27  ;;  %5482 = vst [vmem:[#allocation19_spill] sm:$0xff] %v2751_v56  ;;  %v2766_v24 = vunpack.c.h.bf16 %v218_v61 }
  0x34   : > { %v763_v54 = vadd.f32 %v762_v43, %v508_v37  ;;  %v2773_v37 = vunpack.c.l.bf16 %v218_v61 }
  0x35   : > { %5478 = vst [vmem:[#allocation15_spill] sm:$0xff] %v2738_v42  ;;  %v471_v55 = vmul.f32 %v2738_v42, %v2738_v42 }
  0x36   : > { %5483 = vst [vmem:[#allocation20_spill] sm:$0xff] %v2766_v24  ;;  %v502_v61 = vmul.f32 %v2773_v37, %v2773_v37 }
  0x37   : > { %v686_v20 = vsel %vm154_vm0, %v471_v55, 0.0  ;;  %5486 = vst [vmem:[#allocation23_spill] sm:$0xff] %v2773_v37  ;;  %v201_v55 = vld [vmem:[%s2552_s15 + $0xd8] sm:$0xff] }
  0x38   : > { %v687_v34 = vadd.f32 %v686_v20, %v470_v18 }
  0x3a   : > { %696 = vadd.xlane.f32.xlu0 %v695_v0  ;;  %700 = vadd.xlane.f32.xlu1 %v699_v7  ;;  %v175_v0 = vld [vmem:[%s2552_s15 + $0x8] sm:$0xff] }
  0x3b   : > { %584 = vadd.xlane.f32.xlu2 %v583_v15  ;;  %v219_v7 = vld [vmem:[%s2552_s15 + $0x168] sm:$0xff]  ;;  %v472_v15 = vmul.f32 %v2743_v46, %v2743_v46  ;;  %v2768_v25 = vunpack.c.h.bf16 %v175_v0  ;;  %v2775_v43 = vunpack.c.l.bf16 %v175_v0 }
  0x3c   : > { %v2771_v27 = vunpack.c.h.bf16 %v219_v7 }
  0x3d   : > { %5484 = vst [vmem:[#allocation21_spill] sm:$0xff] %v2768_v25  ;;  %v691_v31 = vadd.f32 %v690_v17, %v472_v15  ;;  %v417_v51 = vmul.f32 %v2768_v25, %v2768_v25  ;;  %v236_v15 = vld [vmem:[%s2552_s15 + $0x1f0] sm:$0xff]  ;;  %v416_v0 = vmul.f32 %v2775_v43, %v2775_v43  ;;  %v2792_v17 = vunpack.c.h.bf16 %v201_v55 }
  0x3e   : > { %5485 = vst [vmem:[#allocation22_spill] sm:$0xff] %v2771_v27  ;;  %v505_v57 = vmul.f32 %v2771_v27, %v2771_v27  ;;  %v2811_v37 = vunpack.c.l.bf16 %v236_v15 }
  0x3f   : > { %5487 = vst [vmem:[#allocation24_spill] sm:$0xff] %v2775_v43  ;;  %v578_v18 = vsel %vm154_vm0, %v417_v51, 0.0 }
  0x40   : > { %5489 = vst [vmem:[#allocation26_spill] sm:$0xff] %v2792_v17 }
  0x41   : > { %5494 = vst [vmem:[#allocation31_spill] sm:$0xff] %v2811_v37 }
  0x42   : > { %760 = vadd.xlane.f32.xlu1 %v759_v49  ;;  %588 = vadd.xlane.f32.xlu0 %v587_v50  ;;  %v575_v49 = vadd.f32 %v574_v26, %v414_v21  ;;  %v503_v50 = vmul.f32 %v2766_v24, %v2766_v24  ;;  %v2798_v21 = vunpack.c.h.bf16 %v200_v62  ;;  %v754_v26 = vsel %vm154_vm0, %v505_v57, 0.0 }
  0x43   : > { %764 = vadd.xlane.f32.xlu2 %v763_v54  ;;  %v2781_v54 = vunpack.c.l.bf16 %v219_v7  ;;  %v2807_v24 = vunpack.c.l.bf16 %v200_v62 }
  0x44   : > { %v750_v7 = vsel %vm154_vm0, %v503_v50, 0.0  ;;  %5490 = vst [vmem:[#allocation27_spill] sm:$0xff] %v2798_v21  ;;  %v469_v50 = vmul.f32 %v2792_v17, %v2792_v17 }
  0x45   : > { %5488 = vst [vmem:[#allocation25_spill] sm:$0xff] %v2781_v54  ;;  %v504_v20 = vmul.f32 %v2781_v54, %v2781_v54  ;;  %v751_v27 = vadd.f32 %v750_v7, %v502_v61  ;;  %v467_v54 = vmul.f32 %v2798_v21, %v2798_v21  ;;  %v217_v61 = vld [vmem:[%s2552_s15 + $0x158] sm:$0xff]  ;;  %v538_v7 = vmul.f32 %v2811_v37, %v2811_v37  ;;  %v252_v21 = vld [vmem:[%s2552_s15 + $0x270] sm:$0xff] }
  0x46   : > { %5493 = vst [vmem:[#allocation30_spill] sm:$0xff] %v2807_v24  ;;  %v682_v62 = vsel %vm154_vm0, %v469_v50, 0.0  ;;  %v2837_v12 = vunpack.c.l.bf16 %v217_v61 }
  0x47   : > { %v755_v51 = vadd.f32 %v754_v26, %v504_v20  ;;  %v2828_v20 = vunpack.c.h.bf16 %v237_v58  ;;  %v2831_v26 = vunpack.c.h.bf16 %v217_v61 }
  0x48   : > { %5500 = vst [vmem:[#allocation37_spill] sm:$0xff] %v2837_v12 }
  0x49   : > { %5496 = vst [vmem:[#allocation33_spill] sm:$0xff] %v2828_v20  ;;  %v541_v17 = vmul.f32 %v2828_v20, %v2828_v20  ;;  %v2865_v20 = vunpack.c.l.bf16 %v252_v21 }
  0x4a   : > { %692 = vadd.xlane.f32.xlu1 %v691_v31  ;;  %688 = vadd.xlane.f32.xlu0 %v687_v34  ;;  %v2801_v31 = vunpack.c.h.bf16 %v236_v15  ;;  %v2803_v34 = vunpack.c.l.bf16 %v201_v55  ;;  %v678_v15 = vsel %vm154_vm0, %v467_v54, 0.0  ;;  %5497 = vst [vmem:[#allocation34_spill] sm:$0xff] %v2831_v26 }
  0x4b   : > { %576 = vadd.xlane.f32.xlu2 %v575_v49  ;;  %v579_v49 = vadd.f32 %v578_v18, %v416_v0  ;;  %v466_v0 = vmul.f32 %v2807_v24, %v2807_v24  ;;  %v2826_v18 = vunpack.c.h.bf16 %v216_v19  ;;  %5504 = vst [vmem:[#allocation41_spill] sm:$0xff] %v2865_v20 }
  0x4c   : > { %5491 = vst [vmem:[#allocation28_spill] sm:$0xff] %v2801_v31  ;;  %v539_v57 = vmul.f32 %v2801_v31, %v2801_v31  ;;  %v468_v55 = vmul.f32 %v2803_v34, %v2803_v34  ;;  %v2833_v31 = vunpack.c.l.bf16 %v216_v19 }
  0x4d   : > { %5492 = vst [vmem:[#allocation29_spill] sm:$0xff] %v2803_v34  ;;  %v679_v50 = vadd.f32 %v678_v15, %v466_v0  ;;  %v499_v37 = vmul.f32 %v2826_v18, %v2826_v18  ;;  %v253_v34 = vld [vmem:[%s2552_s15 + $0x278] sm:$0xff]  ;;  %v2857_v15 = vunpack.c.h.bf16 %v252_v21 }
  0x4e   : > { %5495 = vst [vmem:[#allocation32_spill] sm:$0xff] %v2826_v18  ;;  %v2855_v0 = vunpack.c.h.bf16 %v253_v34  ;;  %v199_v18 = vld [vmem:[%s2552_s15 + $0xc8] sm:$0xff] }
  0x4f   : > { %5498 = vst [vmem:[#allocation35_spill] sm:$0xff] %v2833_v31  ;;  %v742_v61 = vsel %vm154_vm0, %v499_v37, 0.0 }
  0x50   : > { %5501 = vst [vmem:[#allocation38_spill] sm:$0xff] %v2855_v0 }
  0x51   : > { %5502 = vst [vmem:[#allocation39_spill] sm:$0xff] %v2857_v15 }
  0x52   : > { %752 = vadd.xlane.f32.xlu1 %v751_v27  ;;  %580 = vadd.xlane.f32.xlu0 %v579_v49  ;;  %v822_v27 = vsel %vm154_vm0, %v539_v57, 0.0  ;;  %v683_v49 = vadd.f32 %v682_v62, %v468_v55  ;;  %v501_v57 = vmul.f32 %v2831_v26, %v2831_v26  ;;  %v500_v55 = vmul.f32 %v2837_v12, %v2837_v12  ;;  %v198_v12 = vld [vmem:[%s2552_s15 + $0xc0] sm:$0xff] }
  0x53   : > { %756 = vadd.xlane.f32.xlu2 %v755_v51  ;;  %v2835_v51 = vunpack.c.l.bf16 %v237_v58  ;;  %v823_v54 = vadd.f32 %v822_v27, %v538_v7  ;;  %v498_v58 = vmul.f32 %v2833_v31, %v2833_v31  ;;  %v826_v62 = vsel %vm154_vm0, %v541_v17, 0.0  ;;  %v151_v27 = vld [vmem:[%s5287_s0 + $0x8] sm:$0xff] }
  0x54   : > { %v746_v7 = vsel %vm154_vm0, %v501_v57, 0.0  ;;  %v573_v17 = vmul.f32 %v2855_v0, %v2855_v0  ;;  %v150_v57 = vld [vmem:[%s5287_s0] sm:$0xff]  ;;  %v153_v26 = vmul.f32 %v151_v27, %v151_v27  ;;  %v235_v31 = vld [vmem:[%s2552_s15 + $0x1e8] sm:$0xff] }
  0x55   : > { %5499 = vst [vmem:[#allocation36_spill] sm:$0xff] %v2835_v51  ;;  %v540_v19 = vmul.f32 %v2835_v51, %v2835_v51  ;;  %v747_v37 = vadd.f32 %v746_v7, %v500_v55  ;;  %v571_v51 = vmul.f32 %v2857_v15, %v2857_v15  ;;  %v2885_v7 = vunpack.c.h.bf16 %v198_v12 }
  0x56   : > { %v890_v55 = vsel %vm154_vm0, %v573_v17, 0.0  ;;  %v155_v27 = vsel %vm154_vm0, %v153_v26, 0.0  ;;  %v2890_v15 = vunpack.c.l.bf16 %v199_v18 }
  0x57   : > { %5506 = vst [vmem:[#allocation43_spill] sm:$0xff] %v2885_v7 }
  0x58   : > { %5508 = vst [vmem:[#allocation45_spill] sm:$0xff] %v2890_v15 }
  0x5a   : > { %684 = vadd.xlane.f32.xlu1 %v683_v49  ;;  %680 = vadd.xlane.f32.xlu0 %v679_v50  ;;  %v743_v49 = vadd.f32 %v742_v61, %v498_v58  ;;  %v827_v50 = vadd.f32 %v826_v62, %v540_v19  ;;  %v234_v58 = vld [vmem:[%s2552_s15 + $0x1e0] sm:$0xff]  ;;  %v152_v19 = vmul.f32 %v150_v57, %v150_v57  ;;  %v886_v61 = vsel %vm154_vm0, %v571_v51, 0.0 }
  0x5b   : > { %824 = vadd.xlane.f32.xlu2 %v823_v54  ;;  %v2863_v54 = vunpack.c.l.bf16 %v253_v34  ;;  %v570_v34 = vmul.f32 %v2865_v20, %v2865_v20  ;;  %v2883_v62 = vunpack.c.h.bf16 %v199_v18  ;;  %v2892_v57 = vunpack.c.l.bf16 %v198_v12 }
  0x5c   : > { %v463_v51 = vmul.f32 %v2885_v7, %v2885_v7  ;;  %v2898_v20 = vunpack.c.l.bf16 %v234_v58  ;;  %v464_v12 = vmul.f32 %v2890_v15, %v2890_v15  ;;  %v251_v7 = vld [vmem:[%s2552_s15 + $0x268] sm:$0xff] }
  0x5d   : > { %5503 = vst [vmem:[#allocation40_spill] sm:$0xff] %v2863_v54  ;;  %v572_v21 = vmul.f32 %v2863_v54, %v2863_v54  ;;  %v887_v0 = vadd.f32 %v886_v61, %v570_v34  ;;  %v465_v17 = vmul.f32 %v2883_v62, %v2883_v62  ;;  %v214_v54 = vld [vmem:[%s2552_s15 + $0x140] sm:$0xff]  ;;  %v462_v18 = vmul.f32 %v2892_v57, %v2892_v57 }
  0x5e   : > { %5505 = vst [vmem:[#allocation42_spill] sm:$0xff] %v2883_v62  ;;  %v2909_v34 = vunpack.c.h.bf16 %v214_v54  ;;  %v2924_v62 = vunpack.c.l.bf16 %v235_v31 }
  0x5f   : > { %5509 = vst [vmem:[#allocation46_spill] sm:$0xff] %v2892_v57  ;;  %v250_v57 = vld [vmem:[%s2552_s15 + $0x260] sm:$0xff] }
  0x60   : > { %5510 = vst [vmem:[#allocation47_spill] sm:$0xff] %v2898_v20 }
  0x61   : > { %5511 = vst [vmem:[#allocation48_spill] sm:$0xff] %v2909_v34 }
  0x62   : > { %744 = vadd.xlane.f32.xlu1 %v743_v49  ;;  %828 = vadd.xlane.f32.xlu0 %v827_v50  ;;  %v2888_v49 = vunpack.c.h.bf16 %v234_v58  ;;  %v891_v50 = vadd.f32 %v890_v55, %v572_v21  ;;  %v215_v21 = vld [vmem:[%s2552_s15 + $0x148] sm:$0xff]  ;;  %v674_v58 = vsel %vm154_vm0, %v465_v17, 0.0  ;;  %v534_v55 = vmul.f32 %v2898_v20, %v2898_v20  ;;  %5515 = vst [vmem:[#allocation52_spill] sm:$0xff] %v2924_v62 }
  0x63   : > { %748 = vadd.xlane.f32.xlu2 %v747_v37  ;;  %v156_v37 = vadd.f32 %v155_v27, %v152_v19  ;;  %v670_v19 = vsel %vm154_vm0, %v463_v51, 0.0  ;;  %v2918_v27 = vunpack.c.h.bf16 %v215_v21  ;;  %v495_v17 = vmul.f32 %v2909_v34, %v2909_v34 }
  0x64   : > { %5507 = vst [vmem:[#allocation44_spill] sm:$0xff] %v2888_v49  ;;  %v535_v26 = vmul.f32 %v2888_v49, %v2888_v49  ;;  %v675_v49 = vadd.f32 %v674_v58, %v464_v12  ;;  %v2928_v15 = vunpack.c.l.bf16 %v215_v21  ;;  %v196_v12 = vld [vmem:[%s2552_s15 + $0xb0] sm:$0xff] }
  0x65   : > { %5513 = vst [vmem:[#allocation50_spill] sm:$0xff] %v2918_v27 }
  0x66   : > { %v814_v61 = vsel %vm154_vm0, %v535_v26, 0.0  ;;  %5516 = vst [vmem:[#allocation53_spill] sm:$0xff] %v2928_v15  ;;  %v497_v26 = vmul.f32 %v2918_v27, %v2918_v27  ;;  %v496_v58 = vmul.f32 %v2928_v15, %v2928_v15  ;;  %v232_v15 = vld [vmem:[%s2552_s15 + $0x1d0] sm:$0xff] }
  0x67   : > { %v815_v51 = vadd.f32 %v814_v61, %v534_v55  ;;  %v2945_v55 = vunpack.c.h.bf16 %v250_v57  ;;  %v2948_v61 = vunpack.c.h.bf16 %v196_v12 }
  0x69   : > { %5518 = vst [vmem:[#allocation55_spill] sm:$0xff] %v2945_v55  ;;  %v567_v34 = vmul.f32 %v2945_v55, %v2945_v55  ;;  %v2980_v55 = vunpack.c.l.bf16 %v232_v15 }
  0x6a   : > { %892 = vadd.xlane.f32.xlu1 %v891_v50  ;;  %888 = vadd.xlane.f32.xlu0 %v887_v0  ;;  %v2915_v0 = vunpack.c.h.bf16 %v235_v31  ;;  %v2920_v50 = vunpack.c.l.bf16 %v214_v54  ;;  %v734_v31 = vsel %vm154_vm0, %v495_v17, 0.0  ;;  %5519 = vst [vmem:[#allocation56_spill] sm:$0xff] %v2948_v61 }
  0x6b   : > { %157 = vadd.xlane.f32.xlu2 %v156_v37  ;;  %v671_v37 = vadd.f32 %v670_v19, %v462_v18  ;;  %v536_v18 = vmul.f32 %v2924_v62, %v2924_v62  ;;  %v2943_v19 = vunpack.c.h.bf16 %v251_v7  ;;  %5526 = vst [vmem:[#allocation63_spill] sm:$0xff] %v2980_v55 }
  0x6c   : > { %5512 = vst [vmem:[#allocation49_spill] sm:$0xff] %v2915_v0  ;;  %v537_v20 = vmul.f32 %v2915_v0, %v2915_v0  ;;  %v494_v54 = vmul.f32 %v2920_v50, %v2920_v50  ;;  %v2950_v0 = vunpack.c.l.bf16 %v251_v7 }
  0x6d   : > { %5514 = vst [vmem:[#allocation51_spill] sm:$0xff] %v2920_v50  ;;  %v569_v27 = vmul.f32 %v2943_v19, %v2943_v19  ;;  %v197_v50 = vld [vmem:[%s2552_s15 + $0xb8] sm:$0xff] }
  0x6e   : > { %v818_v21 = vsel %vm154_vm0, %v537_v20, 0.0  ;;  %5517 = vst [vmem:[#allocation54_spill] sm:$0xff] %v2943_v19  ;;  %v2954_v20 = vunpack.c.l.bf16 %v196_v12  ;;  %v568_v7 = vmul.f32 %v2950_v0, %v2950_v0 }
  0x6f   : > { %v819_v17 = vadd.f32 %v818_v21, %v536_v18  ;;  %5520 = vst [vmem:[#allocation57_spill] sm:$0xff] %v2950_v0  ;;  %v878_v18 = vsel %vm154_vm0, %v567_v34, 0.0  ;;  %v2973_v21 = vunpack.c.h.bf16 %v232_v15  ;;  %v2982_v0 = vunpack.c.l.bf16 %v197_v50 }
  0x70   : > { %5522 = vst [vmem:[#allocation59_spill] sm:$0xff] %v2954_v20  ;;  %v458_v12 = vmul.f32 %v2954_v20, %v2954_v20  ;;  %v212_v20 = vld [vmem:[%s2552_s15 + $0x130] sm:$0xff]  ;;  %v530_v15 = vmul.f32 %v2980_v55, %v2980_v55 }
  0x71   : > { %5523 = vst [vmem:[#allocation60_spill] sm:$0xff] %v2973_v21 }
  0x72   : > { %676 = vadd.xlane.f32.xlu1 %v675_v49  ;;  %672 = vadd.xlane.f32.xlu0 %v671_v37  ;;  %v738_v49 = vsel %vm154_vm0, %v497_v26, 0.0  ;;  %v735_v37 = vadd.f32 %v734_v31, %v494_v54  ;;  %v459_v26 = vmul.f32 %v2948_v61, %v2948_v61  ;;  %v233_v54 = vld [vmem:[%s2552_s15 + $0x1d8] sm:$0xff]  ;;  %v882_v31 = vsel %vm154_vm0, %v569_v27, 0.0  ;;  %5527 = vst [vmem:[#allocation64_spill] sm:$0xff] %v2982_v0 }
  0x73   : > { %816 = vadd.xlane.f32.xlu2 %v815_v51  ;;  %v2952_v51 = vunpack.c.l.bf16 %v250_v57  ;;  %v739_v62 = vadd.f32 %v738_v49, %v496_v58  ;;  %v2975_v58 = vunpack.c.h.bf16 %v197_v50  ;;  %v531_v27 = vmul.f32 %v2973_v21, %v2973_v21  ;;  %v213_v61 = vld [vmem:[%s2552_s15 + $0x138] sm:$0xff] }
  0x74   : > { %v662_v49 = vsel %vm154_vm0, %v459_v26, 0.0  ;;  %v460_v50 = vmul.f32 %v2982_v0, %v2982_v0  ;;  %v249_v0 = vld [vmem:[%s2552_s15 + $0x258] sm:$0xff] }
  0x75   : > { %5521 = vst [vmem:[#allocation58_spill] sm:$0xff] %v2952_v51  ;;  %v566_v57 = vmul.f32 %v2952_v51, %v2952_v51  ;;  %v461_v34 = vmul.f32 %v2975_v58, %v2975_v58  ;;  %v2988_v51 = vunpack.c.l.bf16 %v233_v54 }
  0x76   : > { %5524 = vst [vmem:[#allocation61_spill] sm:$0xff] %v2975_v58  ;;  %v194_v58 = vld [vmem:[%s2552_s15 + $0xa0] sm:$0xff] }
  0x77   : > { %v879_v19 = vadd.f32 %v878_v18, %v566_v57  ;;  %5528 = vst [vmem:[#allocation65_spill] sm:$0xff] %v2988_v51  ;;  %v2999_v57 = vunpack.c.h.bf16 %v213_v61 }
  0x79   : > { %5529 = vst [vmem:[#allocation66_spill] sm:$0xff] %v2999_v57 }
  0x7a   : > { %736 = vadd.xlane.f32.xlu1 %v735_v37  ;;  %820 = vadd.xlane.f32.xlu0 %v819_v17  ;;  %v2978_v37 = vunpack.c.h.bf16 %v233_v54  ;;  %v883_v17 = vadd.f32 %v882_v31, %v568_v7  ;;  %v248_v7 = vld [vmem:[%s2552_s15 + $0x250] sm:$0xff]  ;;  %v806_v54 = vsel %vm154_vm0, %v531_v27, 0.0  ;;  %v532_v31 = vmul.f32 %v2988_v51, %v2988_v51 }
  0x7b   : > { %740 = vadd.xlane.f32.xlu2 %v739_v62  ;;  %v663_v62 = vadd.f32 %v662_v49, %v458_v12  ;;  %v666_v12 = vsel %vm154_vm0, %v461_v34, 0.0  ;;  %v3008_v49 = vunpack.c.h.bf16 %v248_v7  ;;  %v3014_v27 = vunpack.c.l.bf16 %v212_v20 }
  0x7c   : > { %5525 = vst [vmem:[#allocation62_spill] sm:$0xff] %v2978_v37  ;;  %v533_v26 = vmul.f32 %v2978_v37, %v2978_v37  ;;  %v807_v37 = vadd.f32 %v806_v54, %v530_v15  ;;  %v667_v21 = vadd.f32 %v666_v12, %v460_v50  ;;  %v3018_v55 = vunpack.c.l.bf16 %v248_v7  ;;  %v195_v15 = vld [vmem:[%s2552_s15 + $0xa8] sm:$0xff] }
  0x7d   : > { %5531 = vst [vmem:[#allocation68_spill] sm:$0xff] %v3008_v49  ;;  %v490_v50 = vmul.f32 %v3014_v27, %v3014_v27  ;;  %v3030_v54 = vunpack.c.h.bf16 %v194_v58  ;;  %v3052_v25 = vunpack.c.l.bf16 %v195_v15 }
  0x7e   : > { %v810_v18 = vsel %vm154_vm0, %v533_v26, 0.0  ;;  %5533 = vst [vmem:[#allocation70_spill] sm:$0xff] %v3014_v27  ;;  %v563_v26 = vmul.f32 %v3008_v49, %v3008_v49  ;;  %v562_v12 = vmul.f32 %v3018_v55, %v3018_v55 }
  0x7f   : > { %v811_v34 = vadd.f32 %v810_v18, %v532_v31  ;;  %5534 = vst [vmem:[#allocation71_spill] sm:$0xff] %v3018_v55  ;;  %v3035_v31 = vunpack.c.h.bf16 %v249_v0  ;;  %v455_v55 = vmul.f32 %v3030_v54, %v3030_v54 }
  0x80   : > { %5535 = vst [vmem:[#allocation72_spill] sm:$0xff] %v3030_v54  ;;  %v870_v18 = vsel %vm154_vm0, %v563_v26, 0.0 }
  0x81   : > { %5536 = vst [vmem:[#allocation73_spill] sm:$0xff] %v3035_v31  ;;  %v871_v26 = vadd.f32 %v870_v18, %v562_v12  ;;  %v565_v27 = vmul.f32 %v3035_v31, %v3035_v31 }
  0x82   : > { %884 = vadd.xlane.f32.xlu1 %v883_v17  ;;  %880 = vadd.xlane.f32.xlu0 %v879_v19  ;;  %v3005_v19 = vunpack.c.h.bf16 %v212_v20  ;;  %v3010_v17 = vunpack.c.l.bf16 %v213_v61  ;;  %5540 = vst [vmem:[#allocation77_spill] sm:$0xff] %v3052_v25 }
  0x83   : > { %664 = vadd.xlane.f32.xlu2 %v663_v62  ;;  %v493_v62 = vmul.f32 %v2999_v57, %v2999_v57  ;;  %v3040_v57 = vunpack.c.l.bf16 %v194_v58  ;;  %v874_v18 = vsel %vm154_vm0, %v565_v27, 0.0 }
  0x84   : > { %5530 = vst [vmem:[#allocation67_spill] sm:$0xff] %v3005_v19  ;;  %v491_v51 = vmul.f32 %v3005_v19, %v3005_v19  ;;  %v492_v61 = vmul.f32 %v3010_v17, %v3010_v17 }
  0x85   : > { %5532 = vst [vmem:[#allocation69_spill] sm:$0xff] %v3010_v17  ;;  %v730_v20 = vsel %vm154_vm0, %v493_v62, 0.0  ;;  %v3046_v17 = vunpack.c.l.bf16 %v249_v0  ;;  %v210_v0 = vld [vmem:[%s2552_s15 + $0x120] sm:$0xff] }
  0x86   : > { %v726_v7 = vsel %vm154_vm0, %v491_v51, 0.0  ;;  %v731_v49 = vadd.f32 %v730_v20, %v492_v61  ;;  %5538 = vst [vmem:[#allocation75_spill] sm:$0xff] %v3040_v57  ;;  %v230_v61 = vld [vmem:[%s2552_s15 + $0x1c0] sm:$0xff]  ;;  %v454_v20 = vmul.f32 %v3040_v57, %v3040_v57 }
  0x87   : > { %v727_v51 = vadd.f32 %v726_v7, %v490_v50  ;;  %5539 = vst [vmem:[#allocation76_spill] sm:$0xff] %v3046_v17  ;;  %v654_v50 = vsel %vm154_vm0, %v455_v55, 0.0  ;;  %v564_v7 = vmul.f32 %v3046_v17, %v3046_v17  ;;  %v3072_v31 = vunpack.c.h.bf16 %v230_v61 }
  0x89   : > { %5542 = vst [vmem:[#allocation79_spill] sm:$0xff] %v3072_v31 }
  0x8a   : > { %808 = vadd.xlane.f32.xlu1 %v807_v37  ;;  %668 = vadd.xlane.f32.xlu0 %v667_v21  ;;  %v3038_v21 = vunpack.c.h.bf16 %v195_v15  ;;  %v3065_v15 = vunpack.c.h.bf16 %v231_v45 }
  0x8b   : > { %812 = vadd.xlane.f32.xlu2 %v811_v34 }
  0x8c   : > { %5537 = vst [vmem:[#allocation74_spill] sm:$0xff] %v3038_v21  ;;  %v457_v58 = vmul.f32 %v3038_v21, %v3038_v21  ;;  %v655_v21 = vadd.f32 %v654_v50, %v454_v20  ;;  %v527_v20 = vmul.f32 %v3072_v31, %v3072_v31  ;;  %v211_v50 = vld [vmem:[%s2552_s15 + $0x128] sm:$0xff] }
  0x8d   : > { %v633_v37 = vpop.xlane.xlu0 %632  ;;  %v625_v62 = vpop.xlane.xlu1 %624  ;;  %5541 = vst [vmem:[#allocation78_spill] sm:$0xff] %v3065_v15  ;;  %v3112_v31 = vunpack.c.h.bf16 %v211_v50 }
  0x8e   : > { %v3042_v34 = vmax.f32 %v633_v37, 1e-24  ;;  %v3048_v19 = vpop.xlane.xlu2 %616  ;;  %v3067_v12 = vmax.f32 %v625_v62, 1e-24  ;;  %v456_v37 = vmul.f32 %v3052_v25, %v3052_v25  ;;  %v3077_v62 = vunpack.c.l.bf16 %v231_v45 }
  0x8f   : > { %v875_v25 = vadd.f32 %v874_v18, %v564_v7  ;;  %v3092_v45 = vunpack.c.l.bf16 %v210_v0  ;;  %v247_v7 = vld [vmem:[%s2552_s15 + $0x248] sm:$0xff]  ;;  %5548 = vst [vmem:[#allocation85_spill] sm:$0xff] %v3112_v31 }
  0x90   : > { %2352 = vrsqrt.f32 %v3042_v34  ;;  %5544 = vst [vmem:[#allocation81_spill] sm:$0xff] %v3077_v62  ;;  %v3117_v43 = vunpack.c.h.bf16 %v247_v7  ;;  %v3126_v60 = vunpack.c.l.bf16 %v247_v7  ;;  %vm1120_vm4 = vweird.f32 %v3042_v34 }
  0x91   : > { %2354 = vrsqrt.f32 %v3067_v12  ;;  %5546 = vst [vmem:[#allocation83_spill] sm:$0xff] %v3092_v45  ;;  %vm1100_vm11 = vweird.f32 %v3067_v12 }
  0x92   : > { %732 = vadd.xlane.f32.xlu1 %v731_v49  ;;  %728 = vadd.xlane.f32.xlu0 %v727_v51  ;;  %v658_v49 = vsel %vm154_vm0, %v457_v58, 0.0  ;;  %v3075_v51 = vunpack.c.h.bf16 %v210_v0  ;;  %v529_v58 = vmul.f32 %v3065_v15, %v3065_v15  ;;  %5549 = vst [vmem:[#allocation86_spill] sm:$0xff] %v3117_v43  ;;  %v560_v28 = vmul.f32 %v3126_v60, %v3126_v60 }
  0x93   : > { %872 = vadd.xlane.f32.xlu2 %v871_v26  ;;  %v3079_v26 = vunpack.c.l.bf16 %v230_v61  ;;  %v659_v24 = vadd.f32 %v658_v49, %v456_v37  ;;  %v246_v61 = vld [vmem:[%s2552_s15 + $0x240] sm:$0xff]  ;;  %v528_v37 = vmul.f32 %v3077_v62, %v3077_v62  ;;  %v486_v62 = vmul.f32 %v3092_v45, %v3092_v45  ;;  %5552 = vst [vmem:[#allocation89_spill] sm:$0xff] %v3126_v60 }
  0x94   : > { %5543 = vst [vmem:[#allocation80_spill] sm:$0xff] %v3075_v51  ;;  %v3110_v15 = vunpack.c.h.bf16 %v246_v61 }
  0x95   : > { %v637_v55 = vpop.xlane.xlu0 %636  ;;  %v629_v17 = vpop.xlane.xlu1 %628  ;;  %5545 = vst [vmem:[#allocation82_spill] sm:$0xff] %v3079_v26  ;;  %v526_v49 = vmul.f32 %v3079_v26, %v3079_v26 }
  0x96   : > { %v3081_v27 = vmax.f32 %v637_v55, 1e-24  ;;  %v3083_v54 = vmax.f32 %v629_v17, 1e-24  ;;  %v3087_v57 = vpop.eup %2352  ;;  %v487_v17 = vmul.f32 %v3075_v51, %v3075_v51  ;;  %v3101_v18 = vpop.xlane.xlu2 %620  ;;  %v802_v55 = vsel %vm154_vm0, %v529_v58, 0.0  ;;  %5547 = vst [vmem:[#allocation84_spill] sm:$0xff] %v3110_v15 }
  0x97   : > { %v1115_v0 = vmul.f32 %v3087_v57, %v3042_v34  ;;  %v798_v51 = vsel %vm154_vm0, %v527_v20, 0.0  ;;  %v3120_v56 = vpop.eup %2354  ;;  %v3124_v58 = vunpack.c.l.bf16 %v211_v50  ;;  %vm1121_vm1 = vweird.f32 %v3087_v57 }
  0x98   : > { %2356 = vrsqrt.f32 %v3081_v27  ;;  %v718_v26 = vsel %vm154_vm0, %v487_v17, 0.0  ;;  %v799_v45 = vadd.f32 %v798_v51, %v526_v49  ;;  %v559_v17 = vmul.f32 %v3110_v15, %v3110_v15  ;;  %v192_v15 = vld [vmem:[%s2552_s15 + $0x90] sm:$0xff]  ;;  %vm1122_vm6 = vmor %vm1120_vm4, %vm1121_vm1 }
  0x99   : > { %2358 = vrsqrt.f32 %v3083_v54  ;;  %5551 = vst [vmem:[#allocation88_spill] sm:$0xff] %v3124_v58  ;;  %v1116_v20 = vmul.f32 %v3087_v57, %v1115_v0  ;;  %v719_v32 = vadd.f32 %v718_v26, %v486_v62  ;;  %v561_v51 = vmul.f32 %v3117_v43, %v3117_v43  ;;  %v193_v0 = vld [vmem:[%s2552_s15 + $0x98] sm:$0xff]  ;;  %v228_v62 = vld [vmem:[%s2552_s15 + $0x1b0] sm:$0xff] }
  0x9a   : > { %656 = vadd.xlane.f32.xlu1 %v655_v21  ;;  %876 = vadd.xlane.f32.xlu0 %v875_v25  ;;  %v803_v21 = vadd.f32 %v802_v55, %v528_v37  ;;  %v3122_v25 = vunpack.c.l.bf16 %v246_v61  ;;  %v489_v37 = vmul.f32 %v3112_v31, %v3112_v31  ;;  %v488_v41 = vmul.f32 %v3124_v58, %v3124_v58 }
  0x9b   : > { %660 = vadd.xlane.f32.xlu2 %v659_v24  ;;  %v1117_v26 = vmul.f32 0.5, %v1116_v20  ;;  %v1095_v43 = vmul.f32 %v3120_v56, %v3067_v12  ;;  %v862_v46 = vsel %vm154_vm0, %v559_v17, 0.0  ;;  %v3164_v58 = vunpack.c.h.bf16 %v193_v0 }
  0x9c   : > { %5550 = vst [vmem:[#allocation87_spill] sm:$0xff] %v3122_v25  ;;  %v558_v13 = vmul.f32 %v3122_v25, %v3122_v25  ;;  %v866_v25 = vsel %vm154_vm0, %v561_v51, 0.0  ;;  %v3166_v60 = vunpack.c.h.bf16 %v192_v15  ;;  %v3169_v53 = vunpack.c.h.bf16 %v228_v62 }
  0x9d   : > { %v3139_v50 = vpop.xlane.xlu1 %612  ;;  %v3141_v7 = vpop.xlane.xlu0 %608  ;;  %v3171_v63 = vunpack.c.l.bf16 %v193_v0  ;;  %v1118_v17 = vsub.f32 1.5, %v1117_v26  ;;  %v3174_v16 = vunpack.c.l.bf16 %v192_v15  ;;  %v453_v51 = vmul.f32 %v3164_v58, %v3164_v58 }
  0x9e   : > { %v3128_v24 = vpop.eup %2356  ;;  %v3161_v1 = vpop.xlane.xlu2 %600  ;;  %5553 = vst [vmem:[#allocation90_spill] sm:$0xff] %v3169_v53  ;;  %v451_v14 = vmul.f32 %v3166_v60, %v3166_v60  ;;  %vm1130_vm3 = vweird.f32 %v3081_v27  ;;  %vm1101_vm8 = vweird.f32 %v3120_v56  ;;  %vm1110_vm9 = vweird.f32 %v3083_v54 }
  0x9f   : > { %v3135_v55 = vpop.eup %2358  ;;  %v1125_v61 = vmul.f32 %v3128_v24, %v3081_v27  ;;  %vm1131_vm2 = vweird.f32 %v3128_v24  ;;  %v452_v15 = vmul.f32 %v3171_v63, %v3171_v63  ;;  %vm1102_vm12 = vmor %vm1100_vm11, %vm1101_vm8 }
  0xa0   : > { %v1105_v49 = vmul.f32 %v3135_v55, %v3083_v54  ;;  %v646_v26 = vsel %vm154_vm0, %v451_v14, 0.0  ;;  %vm1132_vm5 = vmor %vm1130_vm3, %vm1131_vm2  ;;  %vm1111_vm7 = vweird.f32 %v3135_v55  ;;  %v3237_v54 = vmax.f32 %v3139_v50, 1e-24 }
  0xa1   : > { %v1126_v31 = vmul.f32 %v3128_v24, %v1125_v61  ;;  %v722_v61 = vsel %vm154_vm0, %v489_v37, 0.0  ;;  %v867_v37 = vadd.f32 %v866_v25, %v560_v28  ;;  %v3188_v28 = vmax.f32 %v3101_v18, 1e-24  ;;  %vm1112_vm10 = vmor %vm1110_vm9, %vm1111_vm7 }
  0xa2   : > { %804 = vadd.xlane.f32.xlu1 %v803_v21  ;;  %800 = vadd.xlane.f32.xlu0 %v799_v45  ;;  %v1106_v20 = vmul.f32 %v3135_v55, %v1105_v49  ;;  %v863_v21 = vadd.f32 %v862_v46, %v558_v13  ;;  %v723_v45 = vadd.f32 %v722_v61, %v488_v41  ;;  %v3180_v49 = vunpack.c.l.bf16 %v228_v62 }
  0xa3   : > { %v1127_v42 = vmul.f32 0.5, %v1126_v31  ;;  %720 = vadd.xlane.f32.xlu2 %v719_v32  ;;  %v1096_v31 = vmul.f32 %v3120_v56, %v1095_v43  ;;  %v3183_v13 = vmax.f32 %v3048_v19, 1e-24  ;;  %v523_v46 = vmul.f32 %v3169_v53, %v3169_v53 }
  0xa4   : > { %5554 = vst [vmem:[#allocation91_spill] sm:$0xff] %v3180_v49  ;;  %v1107_v41 = vmul.f32 0.5, %v1106_v20  ;;  %v1119_v25 = vmul.f32 %v3087_v57, %v1118_v17  ;;  %v450_v18 = vmul.f32 %v3174_v16, %v3174_v16  ;;  %v650_v62 = vsel %vm154_vm0, %v453_v51, 0.0 }
  0xa5   : > { %v1128_v32 = vsub.f32 1.5, %v1127_v42  ;;  %v3190_v43 = vpop.xlane.xlu0 %604  ;;  %v3192_v42 = vpop.xlane.xlu1 %592  ;;  %v1097_v19 = vmul.f32 0.5, %v1096_v31  ;;  %v522_v61 = vmul.f32 %v3180_v49, %v3180_v49  ;;  %2360 = vrsqrt.f32 %v3183_v13 }
  0xa6   : > { %v1108_v27 = vsub.f32 1.5, %v1107_v41  ;;  %v790_v20 = vsel %vm154_vm0, %v523_v46, 0.0  ;;  %2362 = vrsqrt.f32 %v3188_v28  ;;  %v1123_v34 = vsel %vm1122_vm6, %v3087_v57, %v1119_v25  ;;  %v208_v41 = vld [vmem:[%s2552_s15 + $0x110] sm:$0xff] }
  0xa7   : > { %v1129_v0 = vmul.f32 %v3128_v24, %v1128_v32  ;;  %v651_v17 = vadd.f32 %v650_v62, %v452_v15  ;;  %v647_v31 = vadd.f32 %v646_v26, %v450_v18  ;;  %v791_v32 = vadd.f32 %v790_v20, %v522_v61 }
  0xa8   : > { %v1109_v51 = vmul.f32 %v3135_v55, %v1108_v27  ;;  %v1802_v46 = vmul.f32 %v1123_v34, %v2557_v3  ;;  %v1803_v25 = vmul.f32 %v1123_v34, %v2559_v4  ;;  %v3233_v18 = vunpack.c.h.bf16 %v208_v41 }
  0xa9   : > { %v1133_v14 = vsel %vm1132_vm5, %v3128_v24, %v1129_v0  ;;  %v3240_v62 = vunpack.c.l.bf16 %v208_v41  ;;  %2364 = vrsqrt.f32 %v3237_v54  ;;  %v3265_v34 = vmax.f32 %v3161_v1, 1e-24 }
  0xaa   : > { %864 = vadd.xlane.f32.xlu1 %v863_v21  ;;  %724 = vadd.xlane.f32.xlu0 %v723_v45  ;;  %v3213_v21 = vpop.xlane.xlu2 %596  ;;  %v1098_v45 = vsub.f32 1.5, %v1097_v19  ;;  %v1805_v3 = vmul.f32 %v1133_v14, %v2572_v11  ;;  %5555 = vst [vmem:[#allocation92_spill] sm:$0xff] %v3233_v18  ;;  %v1113_v0 = vsel %vm1112_vm10, %v3135_v55, %v1109_v51  ;;  %v3247_v11 = vmax.f32 %v3141_v7, 1e-24 }
  0xab   : > { %868 = vadd.xlane.f32.xlu2 %v867_v37  ;;  %v1804_v37 = vmul.f32 %v1133_v14, %v2570_v10  ;;  %v3224_v53 = vpop.eup %2360  ;;  %v1800_v7 = vmul.f32 %v1113_v0, %v2591_v22  ;;  %v1801_v14 = vmul.f32 %v1113_v0, %v2593_v23  ;;  %vm1080_vm13 = vweird.f32 %v3183_v13 }
  0xac   : > { %v1099_v57 = vmul.f32 %v3120_v56, %v1098_v45  ;;  %v3229_v24 = vpop.eup %2362  ;;  %v1075_v4 = vmul.f32 %v3224_v53, %v3183_v13  ;;  %v1949_v26 = vpack.c.bf16 %v1805_v3, %v1803_v25  ;;  %v483_v45 = vmul.f32 %v3233_v18, %v3233_v18 }
  0xad   : > { %v697_v10 = vpop.xlane.xlu0 %696  ;;  %v701_v15 = vpop.xlane.xlu1 %700  ;;  %v1948_v19 = vpack.c.bf16 %v1804_v37, %v1802_v46  ;;  %v1085_v12 = vmul.f32 %v3229_v24, %v3188_v28  ;;  %2366 = vrsqrt.f32 %v3247_v11  ;;  %vm1081_vm14 = vweird.f32 %v3224_v53 }
  0xae   : > { %v3251_v50 = vmax.f32 %v697_v10, 1e-24  ;;  %v3253_v55 = vmax.f32 %v701_v15, 1e-24  ;;  %v1103_v61 = vsel %vm1102_vm12, %v3120_v56, %v1099_v57  ;;  %v2039_v20 = vsel %vm154_vm0, %v1949_v26, 0  ;;  %vm1082_vm2 = vmor %vm1080_vm13, %vm1081_vm14 }
  0xaf   : > { %2137 = vmatpush.bf16.xpose.msra.mxu0 %v1948_v19  ;;  %2150 = vmatpush.bf16.xpose.msra.mxu1 %v2039_v20  ;;  %v482_v56 = vmul.f32 %v3240_v62, %v3240_v62  ;;  %v1798_v22 = vmul.f32 %v1103_v61, %v2561_v5  ;;  %v1799_v23 = vmul.f32 %v1103_v61, %v2563_v6  ;;  %v710_v41 = vsel %vm154_vm0, %v483_v45, 0.0  ;;  %v3286_v15 = vpop.eup %2364 }
  0xb0   : > { %v1086_v37 = vmul.f32 %v3229_v24, %v1085_v12  ;;  %2368 = vrsqrt.f32 %v3251_v50  ;;  %v3302_v20 = vmax.f32 %v3190_v43, 1e-24  ;;  %vm1090_vm15 = vweird.f32 %v3188_v28 }
  0xb1   : > { %2370 = vrsqrt.f32 %v3253_v55  ;;  %v1946_v1 = vpack.c.bf16 %v1800_v7, %v1798_v22  ;;  %v1947_v51 = vpack.c.bf16 %v1801_v14, %v1799_v23  ;;  %v711_v46 = vadd.f32 %v710_v41, %v482_v56 }
  0xb2   : > { %652 = vadd.xlane.f32.xlu1 %v651_v17  ;;  %648 = vadd.xlane.f32.xlu0 %v647_v31  ;;  %v3256_v27 = vpop.xlane.xlu2 %584  ;;  %v1076_v17 = vmul.f32 %v3224_v53, %v1075_v4  ;;  %v229_v31 = vld [vmem:[%s2552_s15 + $0x1b8] sm:$0xff]  ;;  %2372 = vrsqrt.f32 %v3265_v34  ;;  %v1087_v19 = vmul.f32 0.5, %v1086_v37  ;;  %v3312_v22 = vmax.f32 %v3213_v21, 1e-24 }
  0xb3   : > { %792 = vadd.xlane.f32.xlu2 %v791_v32  ;;  %v209_v32 = vld [vmem:[%s2552_s15 + $0x118] sm:$0xff]  ;;  %v3280_v57 = vunpack.c.l.bf16 %v229_v31  ;;  %v3282_v5 = vunpack.c.h.bf16 %v229_v31  ;;  %v3294_v4 = vpop.eup %2366  ;;  %v2036_v26 = vsel %vm154_vm0, %v1947_v51, 0  ;;  %v3323_v51 = vmax.f32 %v3192_v42, 1e-24 }
  0xb4   : > { %v1077_v6 = vmul.f32 0.5, %v1076_v17  ;;  %v3284_v10 = vunpack.c.l.bf16 %v209_v32  ;;  %v3292_v0 = vunpack.c.h.bf16 %v209_v32  ;;  %v1065_v17 = vmul.f32 %v3286_v15, %v3237_v54 }
  0xb5   : > { %5556 = vst [vmem:[#allocation93_spill] sm:$0xff] %v3280_v57  ;;  %v524_v25 = vmul.f32 %v3280_v57, %v3280_v57  ;;  %v525_v3 = vmul.f32 %v3282_v5, %v3282_v5  ;;  %v3314_v23 = vpop.xlane.xlu1 %760  ;;  %v1088_v32 = vsub.f32 1.5, %v1087_v19  ;;  %v3325_v41 = vpop.xlane.xlu0 %588  ;;  %vm1091_vm1 = vweird.f32 %v3229_v24  ;;  %v245_v19 = vld [vmem:[%s2552_s15 + $0x238] sm:$0xff] }
  0xb6   : > { %5557 = vst [vmem:[#allocation94_spill] sm:$0xff] %v3282_v5  ;;  %v484_v12 = vmul.f32 %v3284_v10, %v3284_v10  ;;  %v3299_v61 = vpop.eup %2368  ;;  %v485_v14 = vmul.f32 %v3292_v0, %v3292_v0  ;;  %v1078_v56 = vsub.f32 1.5, %v1077_v6  ;;  %2374 = vrsqrt.f32 %v3302_v20  ;;  %vm1092_vm3 = vmor %vm1090_vm15, %vm1091_vm1 }
  0xb7   : > { %2138 = vmatpush.bf16.xpose.msra.mxu0 %v1946_v1  ;;  %5558 = vst [vmem:[#allocation95_spill] sm:$0xff] %v3292_v0  ;;  %2151 = vmatpush.bf16.xpose.msra.mxu1 %v2036_v26  ;;  %v794_v7 = vsel %vm154_vm0, %v525_v3, 0.0  ;;  %v3307_v45 = vpop.eup %2370  ;;  %v1055_v1 = vmul.f32 %v3294_v4, %v3247_v11  ;;  %v1066_v3 = vmul.f32 %v3286_v15, %v1065_v17  ;;  %2376 = vrsqrt.f32 %v3312_v22 }
  0xb8   : > { %v795_v43 = vadd.f32 %v794_v7, %v524_v25  ;;  %v3318_v37 = vpop.eup %2372  ;;  %v714_v21 = vsel %vm154_vm0, %v485_v14, 0.0  ;;  %v1285_v42 = vmul.f32 %v3307_v45, %v3253_v55  ;;  %v244_v25 = vld [vmem:[%s2552_s15 + $0x230] sm:$0xff]  ;;  %2378 = vrsqrt.f32 %v3323_v51 }
  0xb9   : > { %v715_v6 = vadd.f32 %v714_v21, %v484_v12  ;;  %v1035_v26 = vmul.f32 %v3318_v37, %v3265_v34  ;;  %v1056_v12 = vmul.f32 %v3294_v4, %v1055_v1  ;;  %v1079_v7 = vmul.f32 %v3224_v53, %v1078_v56 }
  0xba   : > { %712 = vadd.xlane.f32.xlu1 %v711_v46  ;;  %v3316_v31 = vpop.xlane.xlu2 %764  ;;  %v1275_v46 = vmul.f32 %v3299_v61, %v3251_v50  ;;  %796 = vadd.xlane.f32.xlu0 %v795_v43  ;;  %v1089_v14 = vmul.f32 %v3229_v24, %v1088_v32  ;;  %v3352_v43 = vunpack.c.l.bf16 %v245_v19  ;;  %v3354_v21 = vunpack.c.h.bf16 %v245_v19  ;;  %v190_v32 = vld [vmem:[%s2552_s15 + $0x80] sm:$0xff] }
  0xbb   : > { %716 = vadd.xlane.f32.xlu2 %v715_v6  ;;  %v3356_v6 = vunpack.c.l.bf16 %v244_v25  ;;  %v1286_v13 = vmul.f32 %v3307_v45, %v1285_v42  ;;  %v1083_v1 = vsel %vm1082_vm2, %v3224_v53, %v1079_v7  ;;  %v3361_v56 = vunpack.c.h.bf16 %v244_v25 }
  0xbc   : > { %v1276_v17 = vmul.f32 %v3299_v61, %v1275_v46  ;;  %5559 = vst [vmem:[#allocation96_spill] sm:$0xff] %v3352_v43  ;;  %v1093_v5 = vsel %vm1092_vm3, %v3229_v24, %v1089_v14  ;;  %v1794_v28 = vmul.f32 %v1083_v1, %v2566_v8  ;;  %v1795_v46 = vmul.f32 %v1083_v1, %v2568_v9  ;;  %v3368_v49 = vpop.eup %2374 }
  0xbd   : > { %5560 = vst [vmem:[#allocation97_spill] sm:$0xff] %v3354_v21  ;;  %v1796_v57 = vmul.f32 %v1093_v5, %v2606_v35  ;;  %v1797_v19 = vmul.f32 %v1093_v5, %v2608_v36  ;;  %v556_v42 = vmul.f32 %v3352_v43, %v3352_v43  ;;  %v557_v53 = vmul.f32 %v3354_v21, %v3354_v21  ;;  %v3378_v25 = vpop.eup %2376  ;;  %v693_v9 = vpop.xlane.xlu1 %692 }
  0xbe   : > { %5561 = vst [vmem:[#allocation98_spill] sm:$0xff] %v3356_v6  ;;  %v554_v24 = vmul.f32 %v3356_v6, %v3356_v6  ;;  %v555_v8 = vmul.f32 %v3361_v56, %v3361_v56  ;;  %v1067_v35 = vmul.f32 0.5, %v1066_v3  ;;  %v3382_v14 = vunpack.c.l.bf16 %v190_v32  ;;  %v3384_v1 = vpop.eup %2378  ;;  %v689_v0 = vpop.xlane.xlu0 %688 }
  0xbf   : > { %5562 = vst [vmem:[#allocation99_spill] sm:$0xff] %v3361_v56  ;;  %v1944_v36 = vpack.c.bf16 %v1796_v57, %v1794_v28  ;;  %v1945_v5 = vpack.c.bf16 %v1797_v19, %v1795_v46  ;;  %v1057_v43 = vmul.f32 0.5, %v1056_v12  ;;  %v1277_v21 = vmul.f32 0.5, %v1276_v17 }
  0xc0   : > { %v858_v6 = vsel %vm154_vm0, %v557_v53, 0.0  ;;  %v854_v18 = vsel %vm154_vm0, %v555_v8, 0.0  ;;  %vm1070_vm4 = vweird.f32 %v3237_v54  ;;  %v1036_v3 = vmul.f32 %v3318_v37, %v1035_v26 }
  0xc1   : > { %v1287_v56 = vmul.f32 0.5, %v1286_v13  ;;  %2139 = vmatpush.bf16.xpose.msra.mxu0 %v1944_v36  ;;  %v2033_v57 = vsel %vm154_vm0, %v1945_v5, 0  ;;  %vm1060_vm5 = vweird.f32 %v3247_v11  ;;  %v859_v28 = vadd.f32 %v858_v6, %v556_v42 }
  0xc2   : > { %v3380_v7 = vpop.xlane.xlu2 %576  ;;  %2152 = vmatpush.bf16.xpose.msra.mxu1 %v2033_v57  ;;  %v855_v46 = vadd.f32 %v854_v18, %v554_v24  ;;  %v3392_v12 = vunpack.c.h.bf16 %v190_v32  ;;  %vm1071_vm6 = vweird.f32 %v3286_v15  ;;  %v1045_v17 = vmul.f32 %v3368_v49, %v3302_v20 }
  0xc3   : > { %v3397_v19 = vmax.f32 %v689_v0, 1e-24  ;;  %v446_v26 = vmul.f32 %v3382_v14, %v3382_v14  ;;  %v1068_v13 = vsub.f32 1.5, %v1067_v35  ;;  %v1058_v53 = vsub.f32 1.5, %v1057_v43  ;;  %860 = vadd.xlane.f32.xlu1 %v859_v28  ;;  %vm3419_vm9 = vmor %vm1070_vm4, %vm1071_vm6  ;;  %v226_v28 = vld [vmem:[%s2552_s15 + $0x1a0] sm:$0xff] }
  0xc4   : > { %5563 = vst [vmem:[#allocation100_spill] sm:$0xff] %v3392_v12  ;;  %v1278_v8 = vsub.f32 1.5, %v1277_v21  ;;  %856 = vadd.xlane.f32.xlu0 %v855_v46  ;;  %v447_v18 = vmul.f32 %v3392_v12, %v3392_v12  ;;  %vm1061_vm7 = vweird.f32 %v3294_v4  ;;  %v3404_v6 = vmul.f32 0.5, %v1036_v3 }
  0xc5   : > { %v1288_v32 = vsub.f32 1.5, %v1287_v56  ;;  %v3407_v42 = vmax.f32 %v3256_v27, 1e-24  ;;  %v1025_v0 = vmul.f32 %v3378_v25, %v3312_v22  ;;  %vm1280_vm8 = vweird.f32 %v3251_v50  ;;  %vm1062_vm10 = vmor %vm1060_vm5, %vm1061_vm7  ;;  %v3437_v3 = vpop.xlane.xlu1 %752 }
  0xc6   : > { %v3412_v43 = vmax.f32 %v693_v9, 1e-24  ;;  %v638_v21 = vsel %vm154_vm0, %v447_v18, 0.0  ;;  %v1046_v27 = vmul.f32 %v3368_v49, %v1045_v17  ;;  %v1015_v56 = vmul.f32 %v3384_v1, %v3323_v51 }
  0xc7   : > { %2380 = vrsqrt.f32 %v3397_v19  ;;  %v639_v35 = vadd.f32 %v638_v21, %v446_v26  ;;  %v1059_v9 = vmul.f32 %v3294_v4, %v1058_v53  ;;  %v1069_v54 = vmul.f32 %v3286_v15, %v1068_v13  ;;  %v191_v53 = vld [vmem:[%s2552_s15 + $0x88] sm:$0xff] }
  0xc8   : > { %v1279_v36 = vmul.f32 %v3299_v61, %v1278_v8  ;;  %vm1281_vm11 = vweird.f32 %v3299_v61  ;;  %vm1290_vm12 = vweird.f32 %v3253_v55  ;;  %v3435_v5 = vmax.f32 %v3325_v41, 1e-24 }
  0xc9   : > { %640 = vadd.xlane.f32.xlu2 %v639_v35  ;;  %vm1282_vm13 = vmor %vm1280_vm8, %vm1281_vm11  ;;  %v1289_v11 = vmul.f32 %v3307_v45, %v1288_v32  ;;  %vm1291_vm14 = vweird.f32 %v3307_v45  ;;  %2382 = vrsqrt.f32 %v3412_v43  ;;  %v1063_v55 = vsel %vm1062_vm10, %v3294_v4, %v1059_v9  ;;  %v3474_v32 = vpop.xlane.xlu0 %580 }
  0xca   : > { %v3439_v57 = vpop.xlane.xlu2 %756  ;;  %v1073_v41 = vsel %vm3419_vm9, %v3286_v15, %v1069_v54  ;;  %v1283_v46 = vsel %vm1282_vm13, %v3299_v61, %v1279_v36  ;;  %vm1292_vm15 = vmor %vm1290_vm12, %vm1291_vm14  ;;  %v1790_v17 = vmul.f32 %v1063_v55, %v2625_v48  ;;  %vm1040_vm1 = vweird.f32 %v3265_v34 }
  0xcb   : > { %v1792_v50 = vmul.f32 %v1073_v41, %v2623_v47  ;;  %v1293_v26 = vsel %vm1292_vm15, %v3307_v45, %v1289_v11  ;;  %v1834_v13 = vmul.f32 %v1283_v46, %v2683_v33  ;;  %v1791_v8 = vmul.f32 %v1063_v55, %v2614_v40 }
  0xcc   : > { %v1836_v4 = vmul.f32 %v1293_v26, %v2685_v38  ;;  %v3460_v18 = vunpack.c.l.bf16 %v226_v28  ;;  %v3462_v15 = vunpack.c.h.bf16 %v226_v28  ;;  %vm1041_vm2 = vweird.f32 %v3318_v37 }
  0xcd   : > { %v3464_v61 = vpop.eup %2380  ;;  %2384 = vrsqrt.f32 %v3407_v42  ;;  %v1942_v47 = vpack.c.bf16 %v1792_v50, %v1790_v17  ;;  %v1793_v48 = vmul.f32 %v1073_v41, %v2612_v39  ;;  %v1016_v33 = vmul.f32 %v3384_v1, %v1015_v56  ;;  %vm1042_vm5 = vmor %vm1040_vm1, %vm1041_vm2 }
  0xce   : > { %5566 = vst [vmem:[#allocation101_spill] sm:$0xff] %v3460_v18  ;;  %2386 = vrsqrt.f32 %v3435_v5  ;;  %v1964_v38 = vpack.c.bf16 %v1836_v4, %v1834_v13  ;;  %v3471_v45 = vunpack.c.l.bf16 %v191_v53  ;;  %v1038_v40 = vsub.f32 1.5, %v3404_v6  ;;  %v3506_v13 = vpop.xlane.xlu1 %684 }
  0xcf   : > { %5567 = vst [vmem:[#allocation102_spill] sm:$0xff] %v3462_v15  ;;  %2140 = vmatpush.bf16.xpose.msra.mxu0 %v1942_v47  ;;  %v1943_v21 = vpack.c.bf16 %v1793_v48, %v1791_v8  ;;  %v1835_v24 = vmul.f32 %v1283_v46, %v2676_v29  ;;  %v1837_v35 = vmul.f32 %v1293_v26, %v2678_v30  ;;  %v3478_v9 = vpop.eup %2382  ;;  %v1047_v39 = vmul.f32 0.5, %v1046_v27  ;;  %v227_v27 = vld [vmem:[%s2552_s15 + $0x1a8] sm:$0xff] }
  0xd0   : > { %5568 = vst [vmem:[#allocation103_spill] sm:$0xff] %v3471_v45  ;;  %vm1050_vm3 = vweird.f32 %v3302_v20  ;;  %v1026_v56 = vmul.f32 %v3378_v25, %v1025_v0  ;;  %2163 = vmatpush.bf16.xpose.msra.mxu2 %v1964_v38  ;;  %v518_v6 = vmul.f32 %v3460_v18, %v3460_v18  ;;  %v519_v54 = vmul.f32 %v3462_v15, %v3462_v15  ;;  %v5593_v15 = vld [vmem:[#allocation9_spill] sm:$0xff] }
  0xd1   : > { %v1255_v36 = vmul.f32 %v3464_v61, %v3397_v19  ;;  %v2030_v29 = vsel %vm154_vm0, %v1943_v21, 0  ;;  %v1965_v30 = vpack.c.bf16 %v1837_v35, %v1835_v24  ;;  %v3489_v11 = vunpack.c.h.bf16 %v191_v53 }
  0xd2   : > { %vm1051_vm4 = vweird.f32 %v3368_v49  ;;  %v3493_v28 = vmul.f32 0.5, %v1016_v33  ;;  %2153 = vmatpush.bf16.xpose.msra.mxu1 %v2030_v29  ;;  %v782_v0 = vsel %vm154_vm0, %v519_v54, 0.0  ;;  %v448_v55 = vmul.f32 %v3471_v45, %v3471_v45  ;;  %v3508_v53 = vpop.xlane.xlu2 %824  ;;  %v207_v54 = vld [vmem:[%s2552_s15 + $0x108] sm:$0xff] }
  0xd3   : > { %5569 = vst [vmem:[#allocation104_spill] sm:$0xff] %v3489_v11  ;;  %v3498_v41 = vpop.eup %2384  ;;  %v3501_v46 = vmax.f32 %v3314_v23, 1e-24  ;;  %v2063_v17 = vsel %vm154_vm0, %v1965_v30, 0  ;;  %v783_v50 = vadd.f32 %v782_v0, %v518_v6  ;;  %v449_v26 = vmul.f32 %v3489_v11, %v3489_v11  ;;  %v206_v30 = vld [vmem:[%s2552_s15 + $0x100] sm:$0xff]  ;;  %vm1052_vm7 = vmor %vm1050_vm3, %vm1051_vm4 }
  0xd4   : > { %v3510_v4 = vpop.eup %2386  ;;  %v1048_v8 = vsub.f32 1.5, %v1047_v39  ;;  %v3512_v47 = vmul.f32 0.5, %v1026_v56  ;;  %2176 = vmatpush.bf16.xpose.msra.mxu3 %v2063_v17  ;;  %v3514_v48 = vunpack.c.l.bf16 %v227_v27  ;;  %v3516_v23 = vunpack.c.h.bf16 %v227_v27 }
  0xd5   : > { %v1265_v33 = vmul.f32 %v3478_v9, %v3412_v43  ;;  %v1256_v38 = vmul.f32 %v3464_v61, %v1255_v36  ;;  %784 = vadd.xlane.f32.xlu1 %v783_v50  ;;  %v642_v21 = vsel %vm154_vm0, %v449_v26, 0.0  ;;  %v1039_v24 = vmul.f32 %v3318_v37, %v1038_v40  ;;  %v681_v26 = vpop.xlane.xlu0 %680 }
  0xd6   : > { %5570 = vst [vmem:[#allocation105_spill] sm:$0xff] %v3514_v48  ;;  %v643_v39 = vadd.f32 %v642_v21, %v448_v55  ;;  %v520_v56 = vmul.f32 %v3514_v48, %v3514_v48  ;;  %v521_v6 = vmul.f32 %v3516_v23, %v3516_v23  ;;  %vm1030_vm6 = vweird.f32 %v3312_v22 }
  0xd7   : > { %5571 = vst [vmem:[#allocation106_spill] sm:$0xff] %v3516_v23  ;;  %v995_v40 = vmul.f32 %v3498_v41, %v3407_v42  ;;  %2388 = vrsqrt.f32 %v3501_v46  ;;  %v1005_v36 = vmul.f32 %v3510_v4, %v3435_v5  ;;  %v3540_v29 = vmax.f32 %v3316_v31, 1e-24 }
  0xd8   : > { %v3544_v27 = vmax.f32 %v3380_v7, 1e-24  ;;  %644 = vadd.xlane.f32.xlu0 %v643_v39  ;;  %v786_v34 = vsel %vm154_vm0, %v521_v6, 0.0  ;;  %v1043_v0 = vsel %vm1042_vm5, %v3318_v37, %v1039_v24  ;;  %v1049_v55 = vmul.f32 %v3368_v49, %v1048_v8 }
  0xd9   : > { %v1266_v17 = vmul.f32 %v3478_v9, %v1265_v33  ;;  %v1257_v31 = vmul.f32 0.5, %v1256_v38  ;;  %v787_v50 = vadd.f32 %v786_v34, %v520_v56  ;;  %v3554_v21 = vunpack.c.l.bf16 %v207_v54  ;;  %v3580_v34 = vpop.xlane.xlu1 %744 }
  0xda   : > { %vm1020_vm8 = vweird.f32 %v3323_v51  ;;  %v1053_v7 = vsel %vm1052_vm7, %v3368_v49, %v1049_v55  ;;  %v3558_v39 = vunpack.c.h.bf16 %v207_v54  ;;  %v3560_v37 = vunpack.c.l.bf16 %v206_v30 }
  0xdb   : > { %5572 = vst [vmem:[#allocation107_spill] sm:$0xff] %v3554_v21  ;;  %v3562_v8 = vunpack.c.h.bf16 %v206_v30  ;;  %788 = vadd.xlane.f32.xlu2 %v787_v50  ;;  %v1786_v20 = vmul.f32 %v1043_v0, %v2631_v52  ;;  %v1788_v33 = vmul.f32 %v1053_v7, %v2653_v2  ;;  %v1787_v38 = vmul.f32 %v1043_v0, %v2620_v44  ;;  %v3582_v0 = vpop.xlane.xlu2 %748 }
  0xdc   : > { %5573 = vst [vmem:[#allocation108_spill] sm:$0xff] %v3558_v39  ;;  %v1789_v24 = vmul.f32 %v1053_v7, %v2642_v59  ;;  %v480_v56 = vmul.f32 %v3554_v21, %v3554_v21  ;;  %v481_v49 = vmul.f32 %v3558_v39, %v3558_v39  ;;  %v478_v6 = vmul.f32 %v3560_v37, %v3560_v37  ;;  %v5656_v21 = vld [vmem:[#allocation56_spill] sm:$0xff] }
  0xdd   : > { %5574 = vst [vmem:[#allocation109_spill] sm:$0xff] %v3560_v37  ;;  %v479_v54 = vmul.f32 %v3562_v8, %v3562_v8  ;;  %v3576_v30 = vpop.eup %2388  ;;  %v996_v52 = vmul.f32 %v3498_v41, %v995_v40  ;;  %v1006_v44 = vmul.f32 %v3510_v4, %v1005_v36  ;;  %v1940_v2 = vpack.c.bf16 %v1788_v33, %v1786_v20  ;;  %v5657_v37 = vld [vmem:[#allocation61_spill] sm:$0xff] }
  0xde   : > { %5575 = vst [vmem:[#allocation110_spill] sm:$0xff] %v3562_v8  ;;  %v1941_v59 = vpack.c.bf16 %v1789_v24, %v1787_v38  ;;  %v1267_v55 = vmul.f32 0.5, %v1266_v17  ;;  %2390 = vrsqrt.f32 %v3544_v27  ;;  %v706_v50 = vsel %vm154_vm0, %v481_v49, 0.0 }
  0xdf   : > { %v702_v7 = vsel %vm154_vm0, %v479_v54, 0.0  ;;  %v1028_v35 = vsub.f32 1.5, %v3512_v47  ;;  %vm1031_vm9 = vweird.f32 %v3378_v25  ;;  %v1258_v40 = vsub.f32 1.5, %v1257_v31  ;;  %2141 = vmatpush.bf16.xpose.msra.mxu0 %v1940_v2  ;;  %v5580_v2 = vld [vmem:[#allocation5_spill] sm:$0xff] }
  0xe0   : > { %v2027_v36 = vsel %vm154_vm0, %v1941_v59, 0  ;;  %vm1021_vm10 = vweird.f32 %v3384_v1  ;;  %v3592_v20 = vmax.f32 %v3474_v32, 1e-24  ;;  %v707_v17 = vadd.f32 %v706_v50, %v480_v56  ;;  %vm3603_vm12 = vmor %vm1030_vm6, %vm1031_vm9  ;;  %v5581_v50 = vld [vmem:[#allocation2_spill] sm:$0xff] }
  0xe1   : > { %2154 = vmatpush.bf16.xpose.msra.mxu1 %v2027_v36  ;;  %v703_v33 = vadd.f32 %v702_v7, %v478_v6  ;;  %v3594_v38 = vmul.f32 0.5, %v996_v52  ;;  %2392 = vrsqrt.f32 %v3540_v29  ;;  %vm1261_vm11 = vweird.f32 %v3464_v61  ;;  %vm1022_vm13 = vmor %vm1020_vm8, %vm1021_vm10 }
  0xe2   : > { %v3599_v47 = vmax.f32 %v3437_v3, 1e-24  ;;  %v1435_v32 = vmul.f32 %v3576_v30, %v3501_v46  ;;  %v3609_v24 = vmul.f32 0.5, %v1006_v44  ;;  %v1268_v56 = vsub.f32 1.5, %v1267_v55  ;;  %708 = vadd.xlane.f32.xlu1 %v707_v17  ;;  %v3621_v3 = vpop.xlane.xlu0 %828 }
  0xe3   : > { %704 = vadd.xlane.f32.xlu0 %v703_v33  ;;  %v5578_v49 = vsub.f32 1.5, %v3493_v28  ;;  %vm1260_vm14 = vweird.f32 %v3397_v19  ;;  %v3619_v22 = vmax.f32 %v681_v26, 1e-24  ;;  %v1029_v54 = vmul.f32 %v3378_v25, %v1028_v35  ;;  %v5579_v28 = vld [vmem:[#allocation4_spill] sm:$0xff]  ;;  %v158_v33 = vpop.xlane.xlu2 %157 }
  0xe4   : > { %v1259_v52 = vmul.f32 %v3464_v61, %v1258_v40  ;;  %v3625_v44 = vpop.eup %2390  ;;  %vm1270_vm15 = vweird.f32 %v3412_v43  ;;  %vm1271_vm1 = vweird.f32 %v3478_v9  ;;  %vm1262_vm2 = vmor %vm1260_vm14, %vm1261_vm11  ;;  %2394 = vrsqrt.f32 %v3592_v20 }
  0xe5   : > { %v1019_v6 = vmul.f32 %v3384_v1, %v5578_v49  ;;  %2396 = vrsqrt.f32 %v3599_v47  ;;  %v1033_v19 = vsel %vm3603_vm12, %v3378_v25, %v1029_v54  ;;  %v3640_v43 = vmax.f32 %v3506_v13, 1e-24  ;;  %vm1272_vm3 = vmor %vm1270_vm15, %vm1271_vm1  ;;  %v5582_v25 = vld [vmem:[#allocation18_spill] sm:$0xff]  ;;  %v3652_v13 = vpop.xlane.xlu1 %892  ;;  %v5584_v49 = vld [vmem:[#allocation15_spill] sm:$0xff] }
  0xe6   : > { %v1263_v26 = vsel %vm1262_vm2, %v3464_v61, %v1259_v52  ;;  %v1784_v59 = vmul.f32 %v1033_v19, %v5580_v2  ;;  %v1269_v55 = vmul.f32 %v3478_v9, %v1268_v56  ;;  %v975_v40 = vmul.f32 %v3625_v44, %v3544_v27  ;;  %v5583_v61 = vld [vmem:[#allocation3_spill] sm:$0xff]  ;;  %v5585_v52 = vld [vmem:[#allocation17_spill] sm:$0xff]  ;;  %v5586_v2 = vld [vmem:[#allocation14_spill] sm:$0xff] }
  0xe7   : > { %v1023_v51 = vsel %vm1022_vm13, %v3384_v1, %v1019_v6  ;;  %v3645_v1 = vpop.eup %2392  ;;  %2398 = vrsqrt.f32 %v3619_v22  ;;  %v1830_v36 = vmul.f32 %v1263_v26, %v5582_v25  ;;  %v1785_v17 = vmul.f32 %v1033_v19, %v5583_v61 }
  0xe8   : > { %v1782_v35 = vmul.f32 %v1023_v51, %v5579_v28  ;;  %v1783_v7 = vmul.f32 %v1023_v51, %v5581_v50  ;;  %v1273_v56 = vsel %vm1272_vm3, %v3478_v9, %v1269_v55  ;;  %v1831_v6 = vmul.f32 %v1263_v26, %v5584_v49 }
  0xe9   : > { %v998_v54 = vsub.f32 1.5, %v3594_v38  ;;  %v1832_v51 = vmul.f32 %v1273_v56, %v5585_v52  ;;  %v1833_v50 = vmul.f32 %v1273_v56, %v5586_v2  ;;  %v1436_v25 = vmul.f32 %v3576_v30, %v1435_v32 }
  0xea   : > { %v1938_v31 = vpack.c.bf16 %v1784_v59, %v1782_v35  ;;  %v1939_v28 = vpack.c.bf16 %v1785_v17, %v1783_v7  ;;  %v3659_v23 = vpop.eup %2394  ;;  %v1445_v19 = vmul.f32 %v3645_v1, %v3540_v29  ;;  %2400 = vrsqrt.f32 %v3640_v43 }
  0xeb   : > { %v3665_v9 = vmax.f32 %v158_v33, 1e-24  ;;  %v3667_v35 = vpop.eup %2396  ;;  %v1008_v38 = vsub.f32 1.5, %v3609_v24  ;;  %v976_v26 = vmul.f32 %v3625_v44, %v975_v40  ;;  %v3672_v59 = vmax.f32 %v3439_v57, 1e-24  ;;  %v3683_v57 = vpop.xlane.xlu0 %888  ;;  %v243_v40 = vld [vmem:[%s2552_s15 + $0x228] sm:$0xff] }
  0xec   : > { %2142 = vmatpush.bf16.xpose.msra.mxu0 %v1938_v31  ;;  %v1962_v55 = vpack.c.bf16 %v1832_v51, %v1830_v36  ;;  %vm1000_vm4 = vweird.f32 %v3407_v42  ;;  %vm1001_vm5 = vweird.f32 %v3498_v41  ;;  %v2024_v32 = vsel %vm154_vm0, %v1939_v28, 0  ;;  %v242_v31 = vld [vmem:[%s2552_s15 + $0x220] sm:$0xff] }
  0xed   : > { %v1963_v7 = vpack.c.bf16 %v1833_v50, %v1831_v6  ;;  %v3677_v61 = vpop.eup %2398  ;;  %vm1010_vm6 = vweird.f32 %v3435_v5  ;;  %vm1011_vm7 = vweird.f32 %v3510_v4  ;;  %v985_v24 = vmul.f32 %v3659_v23, %v3592_v20  ;;  %2155 = vmatpush.bf16.xpose.msra.mxu1 %v2024_v32  ;;  %vm1002_vm8 = vmor %vm1000_vm4, %vm1001_vm5  ;;  %v3720_v5 = vpop.xlane.xlu1 %676 }
  0xee   : > { %2164 = vmatpush.bf16.xpose.msra.mxu2 %v1962_v55  ;;  %v3686_v36 = vmul.f32 0.5, %v1436_v25  ;;  %v1446_v17 = vmul.f32 %v3645_v1, %v1445_v19  ;;  %2402 = vrsqrt.f32 %v3665_v9  ;;  %v3696_v56 = vmul.f32 0.5, %v976_v26  ;;  %vm1012_vm9 = vmor %vm1010_vm6, %vm1011_vm7  ;;  %v5591_v55 = vld [vmem:[#allocation12_spill] sm:$0xff] }
  0xef   : > { %v2060_v33 = vsel %vm154_vm0, %v1963_v7, 0  ;;  %2404 = vrsqrt.f32 %v3672_v59  ;;  %v999_v49 = vmul.f32 %v3498_v41, %v998_v54  ;;  %v1009_v6 = vmul.f32 %v3510_v4, %v1008_v38  ;;  %v5590_v38 = vld [vmem:[#allocation7_spill] sm:$0xff]  ;;  %v5592_v7 = vld [vmem:[#allocation6_spill] sm:$0xff] }
  0xf0   : > { %2177 = vmatpush.bf16.xpose.msra.mxu3 %v2060_v33  ;;  %v3701_v52 = vpop.eup %2400  ;;  %v1415_v42 = vmul.f32 %v3667_v35, %v3599_v47  ;;  %v1235_v51 = vmul.f32 %v3677_v61, %v3619_v22  ;;  %v3711_v28 = vunpack.c.l.bf16 %v243_v40  ;;  %v3713_v2 = vunpack.c.h.bf16 %v243_v40 }
  0xf1   : > { %v986_v54 = vmul.f32 %v3659_v23, %v985_v24  ;;  %v1003_v50 = vsel %vm1002_vm8, %v3498_v41, %v999_v49  ;;  %v1013_v25 = vsel %vm1012_vm9, %v3510_v4, %v1009_v6  ;;  %v3718_v19 = vunpack.c.l.bf16 %v242_v31 }
  0xf2   : > { %5587 = vst [vmem:[#allocation4_spill] sm:$0xff] %v3711_v28  ;;  %v1778_v26 = vmul.f32 %v1003_v50, %v5590_v38  ;;  %v1780_v32 = vmul.f32 %v1013_v25, %v5591_v55  ;;  %v1779_v33 = vmul.f32 %v1003_v50, %v5592_v7  ;;  %v1781_v48 = vmul.f32 %v1013_v25, %v5593_v15 }
  0xf3   : > { %5588 = vst [vmem:[#allocation5_spill] sm:$0xff] %v3713_v2  ;;  %v1245_v40 = vmul.f32 %v3701_v52, %v3640_v43  ;;  %v552_v41 = vmul.f32 %v3711_v28, %v3711_v28  ;;  %v553_v4 = vmul.f32 %v3713_v2, %v3713_v2  ;;  %v3732_v24 = vunpack.c.h.bf16 %v242_v31 }
  0xf4   : > { %5589 = vst [vmem:[#allocation2_spill] sm:$0xff] %v3718_v19  ;;  %v3734_v49 = vpop.eup %2402  ;;  %v1236_v6 = vmul.f32 %v3677_v61, %v1235_v51  ;;  %v3738_v38 = vmax.f32 %v3580_v34, 1e-24  ;;  %v1936_v50 = vpack.c.bf16 %v1780_v32, %v1778_v26  ;;  %v1937_v15 = vpack.c.bf16 %v1781_v48, %v1779_v33  ;;  %v673_v32 = vpop.xlane.xlu0 %672 }
  0xf5   : > { %5594 = vst [vmem:[#allocation18_spill] sm:$0xff] %v3732_v24  ;;  %v3740_v25 = vpop.eup %2404  ;;  %v3742_v55 = vmul.f32 0.5, %v1446_v17  ;;  %v987_v7 = vmul.f32 0.5, %v986_v54  ;;  %v161_v28 = vmul.f32 %v3734_v49, %v3665_v9  ;;  %v850_v31 = vsel %vm154_vm0, %v553_v4, 0.0 }
  0xf6   : > { %v1416_v2 = vmul.f32 %v3667_v35, %v1415_v42  ;;  %2143 = vmatpush.bf16.xpose.msra.mxu0 %v1936_v50  ;;  %v2021_v51 = vsel %vm154_vm0, %v1937_v15, 0  ;;  %v851_v34 = vadd.f32 %v850_v31, %v552_v41  ;;  %v550_v48 = vmul.f32 %v3718_v19, %v3718_v19  ;;  %v3758_v41 = vpop.xlane.xlu2 %816  ;;  %v224_v50 = vld [vmem:[%s2552_s15 + $0x190] sm:$0xff] }
  0xf7   : > { %v1246_v26 = vmul.f32 %v3701_v52, %v1245_v40  ;;  %v162_v17 = vmul.f32 %v3734_v49, %v161_v28  ;;  %2156 = vmatpush.bf16.xpose.msra.mxu1 %v2021_v51  ;;  %v551_v54 = vmul.f32 %v3732_v24, %v3732_v24  ;;  %v978_v42 = vsub.f32 1.5, %v3696_v56  ;;  %v3771_v24 = vpop.xlane.xlu1 %736 }
  0xf8   : > { %v1237_v4 = vmul.f32 0.5, %v1236_v6  ;;  %2406 = vrsqrt.f32 %v3738_v38  ;;  %852 = vadd.xlane.f32.xlu0 %v851_v34  ;;  %vm980_vm10 = vweird.f32 %v3544_v27  ;;  %v988_v40 = vsub.f32 1.5, %v987_v7 }
  0xf9   : > { %v163_v28 = vmul.f32 0.5, %v162_v17  ;;  %v846_v15 = vsel %vm154_vm0, %v551_v54, 0.0  ;;  %v3764_v51 = vmul.f32 0.5, %v1416_v2  ;;  %v1425_v56 = vmul.f32 %v3740_v25, %v3672_v59 }
  0xfa   : > { %v847_v6 = vadd.f32 %v846_v15, %v550_v48  ;;  %vm981_vm11 = vweird.f32 %v3625_v44  ;;  %v1247_v34 = vmul.f32 0.5, %v1246_v26  ;;  %v3769_v19 = vunpack.c.l.bf16 %v224_v50 }
  0xfb   : > { %v164_v33 = vsub.f32 1.5, %v163_v28  ;;  %vm991_vm12 = vweird.f32 %v3659_v23  ;;  %v1238_v7 = vsub.f32 1.5, %v1237_v4  ;;  %v3774_v17 = vunpack.c.h.bf16 %v224_v50  ;;  %vm982_vm3 = vmor %vm980_vm10, %vm981_vm11 }
  0xfc   : > { %5595 = vst [vmem:[#allocation3_spill] sm:$0xff] %v3769_v19  ;;  %848 = vadd.xlane.f32.xlu2 %v847_v6  ;;  %v979_v2 = vmul.f32 %v3625_v44, %v978_v42  ;;  %vm1441_vm13 = vweird.f32 %v3576_v30  ;;  %vm166_vm14 = vweird.f32 %v3665_v9  ;;  %vm167_vm15 = vweird.f32 %v3734_v49  ;;  %v3820_v9 = vpop.xlane.xlu0 %820 }
  0xfd   : > { %5596 = vst [vmem:[#allocation15_spill] sm:$0xff] %v3774_v17  ;;  %v165_v48 = vmul.f32 %v3734_v49, %v164_v33  ;;  %v989_v26 = vmul.f32 %v3659_v23, %v988_v40  ;;  %vm1450_vm1 = vweird.f32 %v3540_v29  ;;  %vm1451_vm2 = vweird.f32 %v3645_v1  ;;  %vm168_vm8 = vmor %vm166_vm14, %vm167_vm15 }
  0xfe   : > { %v3782_v54 = vpop.eup %2406  ;;  %vm990_vm4 = vweird.f32 %v3592_v20  ;;  %v1426_v33 = vmul.f32 %v3740_v25, %v1425_v56  ;;  %vm1241_vm5 = vweird.f32 %v3677_v61  ;;  %vm1440_vm6 = vweird.f32 %v3501_v46 }
  0xff   : > { %vm992_vm7 = vmor %vm990_vm4, %vm991_vm12  ;;  %v1248_v4 = vsub.f32 1.5, %v1247_v34  ;;  %v3798_v50 = vmax.f32 %v3582_v0, 1e-24  ;;  %v514_v27 = vmul.f32 %v3769_v19, %v3769_v19  ;;  %v515_v40 = vmul.f32 %v3774_v17, %v3774_v17  ;;  %v5601_v17 = vld [vmem:[#allocation21_spill] sm:$0xff] }
 0x100   : > { %v3809_v20 = vmax.f32 %v3720_v5, 1e-24  ;;  %v983_v28 = vsel %vm982_vm3, %v3625_v44, %v979_v2  ;;  %v993_v15 = vsel %vm992_vm7, %v3659_v23, %v989_v26  ;;  %v1239_v0 = vmul.f32 %v3677_v61, %v1238_v7  ;;  %v3827_v23 = vpop.xlane.xlu2 %740  ;;  %v5597_v5 = vld [vmem:[#allocation19_spill] sm:$0xff]  ;;  %vm1442_vm3 = vmor %vm1440_vm6, %vm1441_vm13 }
 0x101   : > { %v1395_v56 = vmul.f32 %v3782_v54, %v3738_v38  ;;  %v169_v6 = vsel %vm168_vm8, %v3734_v49, %v165_v48  ;;  %v3817_v34 = vmax.f32 %v673_v32, 1e-24  ;;  %v774_v42 = vsel %vm154_vm0, %v515_v40, 0.0  ;;  %v5598_v32 = vld [vmem:[#allocation24_spill] sm:$0xff]  ;;  %vm1452_vm13 = vmor %vm1450_vm1, %vm1451_vm2 }
 0x102   : > { %v3822_v31 = vmul.f32 0.5, %v1426_v33  ;;  %vm1250_vm9 = vweird.f32 %v3640_v43  ;;  %vm1251_vm10 = vweird.f32 %v3701_v52  ;;  %vm1240_vm11 = vweird.f32 %v3619_v22  ;;  %v2514_v43 = vld [vmem:[%s5287_s0] sm:$0xff]  ;;  %v240_v40 = vld [vmem:[%s2552_s15 + $0x210] sm:$0xff] }
 0x103   : > { %vm1242_vm12 = vmor %vm1240_vm11, %vm1241_vm5  ;;  %2408 = vrsqrt.f32 %v3798_v50  ;;  %v775_v44 = vadd.f32 %v774_v42, %v514_v27  ;;  %v1774_v49 = vmul.f32 %v983_v28, %v5597_v5  ;;  %v1776_v7 = vmul.f32 %v993_v15, %v5598_v32  ;;  %v5599_v33 = vld [vmem:[#allocation30_spill] sm:$0xff]  ;;  %v3844_v5 = vpop.xlane.xlu1 %884 }
 0x104   : > { %v170_v2 = vmul.f32 %v2514_v43, %v169_v6  ;;  %2410 = vrsqrt.f32 %v3809_v20  ;;  %v1243_v22 = vsel %vm1242_vm12, %v3677_v61, %v1239_v0  ;;  %v1249_v48 = vmul.f32 %v3701_v52, %v1248_v4  ;;  %vm1252_vm14 = vmor %vm1250_vm9, %vm1251_vm10  ;;  %v5600_v43 = vld [vmem:[#allocation16_spill] sm:$0xff]  ;;  %v5602_v0 = vld [vmem:[#allocation27_spill] sm:$0xff] }
 0x105   : > { %v1396_v26 = vmul.f32 %v3782_v54, %v1395_v56  ;;  %2412 = vrsqrt.f32 %v3817_v34  ;;  %776 = vadd.xlane.f32.xlu1 %v775_v44  ;;  %v1934_v42 = vpack.c.bf16 %v1776_v7, %v1774_v49  ;;  %v1826_v27 = vmul.f32 %v1243_v22, %v5599_v33  ;;  %v2515_v56 = vld [vmem:[%s5287_s0 + $0x8] sm:$0xff]  ;;  %v5603_v49 = vld [vmem:[#allocation29_spill] sm:$0xff]  ;;  %v5604_v33 = vld [vmem:[#allocation26_spill] sm:$0xff] }
 0x106   : > { %v1253_v32 = vsel %vm1252_vm14, %v3701_v52, %v1249_v48  ;;  %v1775_v19 = vmul.f32 %v983_v28, %v5600_v43  ;;  %v1777_v61 = vmul.f32 %v993_v15, %v5601_v17  ;;  %v1827_v4 = vmul.f32 %v1243_v22, %v5602_v0  ;;  %v5610_v0 = vld [vmem:[#allocation11_spill] sm:$0xff] }
 0x107   : > { %vm1421_vm15 = vweird.f32 %v3667_v35  ;;  %v171_v44 = vmul.f32 %v2515_v56, %v169_v6  ;;  %2144 = vmatpush.bf16.xpose.msra.mxu0 %v1934_v42  ;;  %v1828_v7 = vmul.f32 %v1253_v32, %v5603_v49  ;;  %v1829_v18 = vmul.f32 %v1253_v32, %v5604_v33  ;;  %v5611_v49 = vld [vmem:[#allocation8_spill] sm:$0xff] }
 0x108   : > { %v5605_v52 = vsub.f32 1.5, %v3686_v36  ;;  %vm1430_vm4 = vweird.f32 %v3672_v59  ;;  %vm1431_vm5 = vweird.f32 %v3740_v25  ;;  %v3865_v17 = vpack.c.bf16 %v170_v2, %v170_v2 }
 0x109   : > { %v1935_v15 = vpack.c.bf16 %v1777_v61, %v1775_v19  ;;  %v5607_v6 = vsub.f32 1.5, %v3742_v55  ;;  %v3870_v36 = vunpack.c.l.bf16 %v240_v40  ;;  %v3872_v48 = vpop.eup %2408  ;;  %vm1420_vm6 = vweird.f32 %v3599_v47  ;;  %v225_v55 = vld [vmem:[%s2552_s15 + $0x198] sm:$0xff]  ;;  %vm1432_vm2 = vmor %vm1430_vm4, %vm1431_vm5 }
 0x10a   : > { %v1439_v28 = vmul.f32 %v3576_v30, %v5605_v52  ;;  %5606 = vst [vmem:[#allocation17_spill] sm:$0xff] %v3865_v17  ;;  %v1960_v46 = vpack.c.bf16 %v1828_v7, %v1826_v27  ;;  %v1961_v42 = vpack.c.bf16 %v1829_v18, %v1827_v4  ;;  %v3880_v19 = vunpack.c.h.bf16 %v240_v40  ;;  %v3883_v32 = vpop.eup %2410  ;;  %v5613_v40 = vld [vmem:[#allocation10_spill] sm:$0xff]  ;;  %v3896_v52 = vpop.xlane.xlu0 %880  ;;  %vm1422_vm1 = vmor %vm1420_vm6, %vm1421_vm15 }
 0x10b   : > { %v1449_v22 = vmul.f32 %v3645_v1, %v5607_v6  ;;  %5608 = vst [vmem:[#allocation14_spill] sm:$0xff] %v3870_v36  ;;  %v2018_v43 = vsel %vm154_vm0, %v1935_v15, 0  ;;  %v3889_v33 = vpop.eup %2412  ;;  %v546_v7 = vmul.f32 %v3870_v36, %v3870_v36  ;;  %v3902_v15 = vunpack.c.l.bf16 %v225_v55 }
 0x10c   : > { %v1443_v2 = vsel %vm1442_vm3, %v3576_v30, %v1439_v28  ;;  %5609 = vst [vmem:[#allocation7_spill] sm:$0xff] %v3880_v19  ;;  %2165 = vmatpush.bf16.xpose.msra.mxu2 %v1960_v46  ;;  %2157 = vmatpush.bf16.xpose.msra.mxu1 %v2018_v43  ;;  %v2057_v18 = vsel %vm154_vm0, %v1961_v42, 0  ;;  %v5612_v30 = vld [vmem:[#allocation13_spill] sm:$0xff]  ;;  %v547_v28 = vmul.f32 %v3880_v19, %v3880_v19  ;;  %v3904_v6 = vunpack.c.h.bf16 %v225_v55 }
 0x10d   : > { %v1453_v61 = vsel %vm1452_vm13, %v3645_v1, %v1449_v22  ;;  %v1866_v56 = vmul.f32 %v1443_v2, %v5610_v0  ;;  %v1867_v29 = vmul.f32 %v1443_v2, %v5611_v49  ;;  %v1405_v1 = vmul.f32 %v3872_v48, %v3798_v50  ;;  %2178 = vmatpush.bf16.xpose.msra.mxu3 %v2057_v18  ;;  %v3906_v22 = vpop.xlane.xlu2 %664  ;;  %v241_v18 = vld [vmem:[%s2552_s15 + $0x218] sm:$0xff] }
 0x10e   : > { %v1868_v27 = vmul.f32 %v1453_v61, %v5612_v30  ;;  %v1869_v4 = vmul.f32 %v1453_v61, %v5613_v40  ;;  %5614 = vst [vmem:[#allocation12_spill] sm:$0xff] %v3902_v15  ;;  %v1428_v46 = vsub.f32 1.5, %v3822_v31  ;;  %v3909_v42 = vpack.c.bf16 %v171_v44, %v171_v44  ;;  %2145 = vmatmul.bf16.vlgmr.msra.gmra.mxu0 %v3865_v17  ;;  %v223_v30 = vld [vmem:[%s2552_s15 + $0x188] sm:$0xff]  ;;  %v5625_v19 = vld [vmem:[#allocation25_spill] sm:$0xff]  ;;  %v5646_v17 = vld [vmem:[#allocation50_spill] sm:$0xff] }
 0x10f   : > { %5615 = vst [vmem:[#allocation6_spill] sm:$0xff] %v3904_v6  ;;  %v838_v61 = vsel %vm154_vm0, %v547_v28, 0.0  ;;  %v516_v0 = vmul.f32 %v3902_v15, %v3902_v15  ;;  %v517_v49 = vmul.f32 %v3904_v6, %v3904_v6  ;;  %v3917_v55 = vmax.f32 %v3771_v24, 1e-24  ;;  %v5635_v6 = vld [vmem:[#allocation34_spill] sm:$0xff] }
 0x110   : > { %5616 = vst [vmem:[#allocation9_spill] sm:$0xff] %v3909_v42  ;;  %v1980_v2 = vpack.c.bf16 %v1868_v27, %v1866_v56  ;;  %v1981_v43 = vpack.c.bf16 %v1869_v4, %v1867_v29  ;;  %v3922_v31 = vmax.f32 %v3508_v53, 1e-24  ;;  %v3924_v44 = vmul.f32 0.5, %v1396_v26  ;;  %v3928_v27 = vpop.xlane.xlu1 %808 }
 0x111   : > { %v839_v29 = vadd.f32 %v838_v61, %v546_v7  ;;  %v1406_v40 = vmul.f32 %v3872_v48, %v1405_v1  ;;  %v1225_v24 = vmul.f32 %v3883_v32, %v3809_v20  ;;  %v1215_v4 = vmul.f32 %v3889_v33, %v3817_v34  ;;  %v222_v1 = vld [vmem:[%s2552_s15 + $0x180] sm:$0xff] }
 0x112   : > { %2189 = vmatpush.bf16.xpose.msrb.mxu0 %v1980_v2  ;;  %v2087_v56 = vsel %vm154_vm0, %v1981_v43, 0  ;;  %v778_v53 = vsel %vm154_vm0, %v517_v49, 0.0  ;;  %v3936_v28 = vunpack.c.l.bf16 %v241_v18  ;;  %v3938_v2 = vunpack.c.h.bf16 %v241_v18  ;;  %v3968_v18 = vpop.xlane.xlu0 %668 }
 0x113   : > { %840 = vadd.xlane.f32.xlu0 %v839_v29  ;;  %v779_v26 = vadd.f32 %v778_v53, %v516_v0  ;;  %v5619_v7 = vsub.f32 1.5, %v3764_v51  ;;  %2414 = vrsqrt.f32 %v3917_v55  ;;  %v3950_v61 = vmax.f32 %v3827_v23, 1e-24  ;;  %2336 = vmatmul.msk.bf16.vlgmr.msra.gmra.mxu1 %vm154_vm0, %v3909_v42  ;;  %v5622_v29 = vld [vmem:[#allocation23_spill] sm:$0xff] }
 0x114   : > { %2202 = vmatpush.bf16.xpose.msrb.mxu1 %v2087_v56  ;;  %5617 = vst [vmem:[#allocation19_spill] sm:$0xff] %v3936_v28  ;;  %v1429_v0 = vmul.f32 %v3740_v25, %v1428_v46  ;;  %v3953_v49 = vunpack.c.l.bf16 %v223_v30  ;;  %v548_v47 = vmul.f32 %v3936_v28, %v3936_v28  ;;  %v549_v51 = vmul.f32 %v3938_v2, %v3938_v2 }
 0x115   : > { %5618 = vst [vmem:[#allocation24_spill] sm:$0xff] %v3938_v2  ;;  %v1419_v43 = vmul.f32 %v3667_v35, %v5619_v7  ;;  %780 = vadd.xlane.f32.xlu2 %v779_v26  ;;  %v3966_v46 = vunpack.c.h.bf16 %v223_v30  ;;  %v5623_v7 = vld [vmem:[#allocation20_spill] sm:$0xff]  ;;  %v3973_v36 = vunpack.c.l.bf16 %v222_v1  ;;  %v1216_v26 = vmul.f32 %v3889_v33, %v1215_v4 }
 0x116   : > { %5620 = vst [vmem:[#allocation30_spill] sm:$0xff] %v3953_v49  ;;  %v1433_v56 = vsel %vm1432_vm2, %v3740_v25, %v1429_v0  ;;  %v842_v28 = vsel %vm154_vm0, %v549_v51, 0.0  ;;  %v3978_v15 = vunpack.c.h.bf16 %v222_v1  ;;  %2416 = vrsqrt.f32 %v3950_v61  ;;  %v3982_v0 = vpop.xlane.xlu2 %812 }
 0x117   : > { %v1423_v23 = vsel %vm1422_vm1, %v3667_v35, %v1419_v43  ;;  %5621 = vst [vmem:[#allocation16_spill] sm:$0xff] %v3966_v46  ;;  %v1864_v2 = vmul.f32 %v1433_v56, %v5625_v19  ;;  %v1407_v35 = vmul.f32 0.5, %v1406_v40  ;;  %v843_v30 = vadd.f32 %v842_v28, %v548_v47  ;;  %v5627_v43 = vld [vmem:[#allocation22_spill] sm:$0xff] }
 0x118   : > { %v1862_v53 = vmul.f32 %v1423_v23, %v5622_v29  ;;  %v1863_v59 = vmul.f32 %v1423_v23, %v5623_v7  ;;  %5624 = vst [vmem:[#allocation21_spill] sm:$0xff] %v3973_v36  ;;  %v1865_v25 = vmul.f32 %v1433_v56, %v5627_v43  ;;  %2418 = vrsqrt.f32 %v3922_v31  ;;  %v4007_v29 = vpop.xlane.xlu1 %732 }
 0x119   : > { %5626 = vst [vmem:[#allocation27_spill] sm:$0xff] %v3978_v15  ;;  %v3986_v23 = vmax.f32 %v3652_v13, 1e-24  ;;  %v512_v51 = vmul.f32 %v3953_v49, %v3953_v49  ;;  %v3990_v19 = vpop.eup %2414  ;;  %v3993_v40 = vmax.f32 %v3621_v3, 1e-24  ;;  %844 = vadd.xlane.f32.xlu1 %v843_v30  ;;  %v513_v1 = vmul.f32 %v3966_v46, %v3966_v46 }
 0x11a   : > { %v1978_v4 = vpack.c.bf16 %v1864_v2, %v1862_v53  ;;  %v1979_v28 = vpack.c.bf16 %v1865_v25, %v1863_v59  ;;  %v510_v47 = vmul.f32 %v3973_v36, %v3973_v36  ;;  %v4000_v13 = vmax.f32 %v3683_v57, 1e-24  ;;  %v4016_v43 = vpop.xlane.xlu0 %728  ;;  %v5633_v36 = vld [vmem:[#allocation37_spill] sm:$0xff] }
 0x11b   : > { %v1226_v2 = vmul.f32 %v3883_v32, %v1225_v24  ;;  %v4003_v56 = vmul.f32 0.5, %v1216_v26  ;;  %v511_v3 = vmul.f32 %v3978_v15, %v3978_v15  ;;  %v1398_v53 = vsub.f32 1.5, %v3924_v44  ;;  %v238_v26 = vld [vmem:[%s2552_s15 + $0x200] sm:$0xff] }
 0x11c   : > { %2190 = vmatpush.bf16.xpose.msrb.mxu0 %v1978_v4  ;;  %v1408_v7 = vsub.f32 1.5, %v1407_v35  ;;  %v2084_v59 = vsel %vm154_vm0, %v1979_v28, 0  ;;  %v770_v30 = vsel %vm154_vm0, %v513_v1, 0.0  ;;  %vm1401_vm7 = vweird.f32 %v3782_v54  ;;  %v4018_v25 = vpop.eup %2416  ;;  %v239_v35 = vld [vmem:[%s2552_s15 + $0x208] sm:$0xff] }
 0x11d   : > { %2420 = vrsqrt.f32 %v3986_v23  ;;  %2203 = vmatpush.bf16.xpose.msrb.mxu1 %v2084_v59  ;;  %v771_v57 = vadd.f32 %v770_v30, %v512_v51  ;;  %v766_v24 = vsel %vm154_vm0, %v511_v3, 0.0  ;;  %vm1400_vm8 = vweird.f32 %v3738_v38 }
 0x11e   : > { %vm1410_vm9 = vweird.f32 %v3798_v50  ;;  %vm1411_vm10 = vweird.f32 %v3872_v48  ;;  %v767_v44 = vadd.f32 %v766_v24, %v510_v47  ;;  %v4024_v4 = vpop.eup %2418  ;;  %2422 = vrsqrt.f32 %v4000_v13  ;;  %vm1402_vm11 = vmor %vm1400_vm8, %vm1401_vm7 }
 0x11f   : > { %v1227_v51 = vmul.f32 0.5, %v1226_v2  ;;  %v1218_v28 = vsub.f32 1.5, %v4003_v56  ;;  %v1375_v1 = vmul.f32 %v3990_v19, %v3917_v55  ;;  %772 = vadd.xlane.f32.xlu0 %v771_v57  ;;  %v1399_v38 = vmul.f32 %v3782_v54, %v1398_v53  ;;  %vm1412_vm12 = vmor %vm1410_vm9, %vm1411_vm10 }
 0x120   : > { %768 = vadd.xlane.f32.xlu2 %v767_v44  ;;  %v1409_v47 = vmul.f32 %v3872_v48, %v1408_v7  ;;  %v4034_v3 = vunpack.c.l.bf16 %v238_v26  ;;  %v4036_v59 = vunpack.c.h.bf16 %v238_v26  ;;  %v1385_v2 = vmul.f32 %v4018_v25, %v3950_v61  ;;  %v4051_v7 = vpop.xlane.xlu2 %872 }
 0x121   : > { %v4045_v56 = vmax.f32 %v3906_v22, 1e-24  ;;  %v4047_v30 = vunpack.c.l.bf16 %v239_v35  ;;  %v4049_v53 = vunpack.c.h.bf16 %v239_v35  ;;  %v1403_v57 = vsel %vm1402_vm11, %v3782_v54, %v1399_v38  ;;  %v5632_v22 = vld [vmem:[#allocation35_spill] sm:$0xff]  ;;  %v5634_v35 = vld [vmem:[#allocation32_spill] sm:$0xff] }
 0x122   : > { %5628 = vst [vmem:[#allocation29_spill] sm:$0xff] %v4034_v3  ;;  %v1413_v24 = vsel %vm1412_vm12, %v3872_v48, %v1409_v47  ;;  %v542_v50 = vmul.f32 %v4034_v3, %v4034_v3  ;;  %v543_v26 = vmul.f32 %v4036_v59, %v4036_v59  ;;  %v1858_v49 = vmul.f32 %v1403_v57, %v5632_v22 }
 0x123   : > { %5629 = vst [vmem:[#allocation26_spill] sm:$0xff] %v4036_v59  ;;  %v4059_v44 = vpop.eup %2420  ;;  %v1860_v46 = vmul.f32 %v1413_v24, %v5633_v36  ;;  %v1859_v15 = vmul.f32 %v1403_v57, %v5634_v35  ;;  %v1861_v42 = vmul.f32 %v1413_v24, %v5635_v6  ;;  %v1376_v54 = vmul.f32 %v3990_v19, %v1375_v1  ;;  %v4075_v35 = vpop.xlane.xlu1 %656 }
 0x124   : > { %5630 = vst [vmem:[#allocation11_spill] sm:$0xff] %v4047_v30  ;;  %v830_v48 = vsel %vm154_vm0, %v543_v26, 0.0  ;;  %v544_v38 = vmul.f32 %v4047_v30, %v4047_v30  ;;  %v545_v47 = vmul.f32 %v4049_v53, %v4049_v53  ;;  %v4071_v3 = vpop.eup %2422  ;;  %v1386_v22 = vmul.f32 %v4018_v25, %v1385_v2  ;;  %v4083_v59 = vpop.xlane.xlu0 %876 }
 0x125   : > { %5631 = vst [vmem:[#allocation8_spill] sm:$0xff] %v4049_v53  ;;  %2424 = vrsqrt.f32 %v4045_v56  ;;  %v1976_v36 = vpack.c.bf16 %v1860_v46, %v1858_v49  ;;  %v1977_v57 = vpack.c.bf16 %v1861_v42, %v1859_v15  ;;  %v1765_v6 = vmul.f32 %v4059_v44, %v3986_v23 }
 0x126   : > { %v1228_v1 = vsub.f32 1.5, %v1227_v51  ;;  %v831_v24 = vadd.f32 %v830_v48, %v542_v50  ;;  %v834_v26 = vsel %vm154_vm0, %v545_v47, 0.0  ;;  %v1595_v30 = vmul.f32 %v4024_v4, %v3922_v31 }
 0x127   : > { %2191 = vmatpush.bf16.xpose.msrb.mxu0 %v1976_v36  ;;  %v2081_v53 = vsel %vm154_vm0, %v1977_v57, 0  ;;  %v835_v2 = vadd.f32 %v834_v26, %v544_v38  ;;  %2426 = vrsqrt.f32 %v3993_v40  ;;  %v1755_v15 = vmul.f32 %v4071_v3, %v4000_v13  ;;  %v5637_v57 = vld [vmem:[#allocation43_spill] sm:$0xff] }
 0x128   : > { %vm1221_vm14 = vweird.f32 %v3889_v33  ;;  %v1377_v42 = vmul.f32 0.5, %v1376_v54  ;;  %2204 = vmatpush.bf16.xpose.msrb.mxu1 %v2081_v53  ;;  %832 = vadd.xlane.f32.xlu1 %v831_v24  ;;  %vm1231_vm15 = vweird.f32 %v3883_v32  ;;  %v1387_v49 = vmul.f32 0.5, %v1386_v22  ;;  %v5636_v22 = vld [vmem:[#allocation46_spill] sm:$0xff] }
 0x129   : > { %836 = vadd.xlane.f32.xlu2 %v835_v2  ;;  %v4091_v46 = vmax.f32 %v3968_v18, 1e-24  ;;  %v1219_v51 = vmul.f32 %v3889_v33, %v1218_v28  ;;  %v1766_v50 = vmul.f32 %v4059_v44, %v1765_v6  ;;  %vm1220_vm3 = vweird.f32 %v3817_v34  ;;  %v4106_v18 = vpop.xlane.xlu2 %660  ;;  %v5640_v2 = vld [vmem:[#allocation42_spill] sm:$0xff] }
 0x12a   : > { %v4097_v48 = vmax.f32 %v3758_v41, 1e-24  ;;  %v1229_v54 = vmul.f32 %v3883_v32, %v1228_v1  ;;  %vm1230_vm4 = vweird.f32 %v3809_v20  ;;  %vm1222_vm5 = vmor %vm1220_vm3, %vm1221_vm14  ;;  %v1596_v28 = vmul.f32 %v4024_v4, %v1595_v30 }
 0x12b   : > { %v4100_v53 = vpop.eup %2424  ;;  %2428 = vrsqrt.f32 %v4091_v46  ;;  %v1756_v34 = vmul.f32 %v4071_v3, %v1755_v15  ;;  %vm1232_vm13 = vmor %vm1230_vm4, %vm1231_vm15  ;;  %v1378_v41 = vsub.f32 1.5, %v1377_v42  ;;  %v1223_v38 = vsel %vm1222_vm5, %v3889_v33, %v1219_v51  ;;  %v4128_v42 = vpop.xlane.xlu1 %804 }
 0x12c   : > { %v1388_v47 = vsub.f32 1.5, %v1387_v49  ;;  %v1233_v20 = vsel %vm1232_vm13, %v3883_v32, %v1229_v54  ;;  %v1822_v36 = vmul.f32 %v1223_v38, %v5636_v22  ;;  %v1823_v6 = vmul.f32 %v1223_v38, %v5637_v57  ;;  %v5639_v32 = vld [vmem:[#allocation45_spill] sm:$0xff]  ;;  %v4144_v57 = vpop.xlane.xlu0 %800 }
 0x12d   : > { %v4116_v1 = vpop.eup %2426  ;;  %v1767_v24 = vmul.f32 0.5, %v1766_v50  ;;  %2430 = vrsqrt.f32 %v4097_v48  ;;  %v4120_v30 = vmax.f32 %v3820_v9, 1e-24  ;;  %v1195_v26 = vmul.f32 %v4100_v53, %v4045_v56 }
 0x12e   : > { %vm1381_vm6 = vweird.f32 %v3990_v19  ;;  %vm1390_vm1 = vweird.f32 %v3950_v61  ;;  %v1824_v33 = vmul.f32 %v1233_v20, %v5639_v32  ;;  %v1825_v15 = vmul.f32 %v1233_v20, %v5640_v2  ;;  %v5643_v61 = vld [vmem:[#allocation51_spill] sm:$0xff] }
 0x12f   : > { %5638 = vst [vmem:[#allocation13_spill] sm:$0xff] %v4120_v30  ;;  %vm1391_vm2 = vweird.f32 %v4018_v25  ;;  %v4132_v49 = vmax.f32 %v3844_v5, 1e-24  ;;  %v4135_v9 = vmax.f32 %v4007_v29, 1e-24  ;;  %v1379_v22 = vmul.f32 %v3990_v19, %v1378_v41 }
 0x130   : > { %v4138_v51 = vmax.f32 %v4016_v43, 1e-24  ;;  %v1958_v54 = vpack.c.bf16 %v1824_v33, %v1822_v36  ;;  %v1959_v38 = vpack.c.bf16 %v1825_v15, %v1823_v6  ;;  %v1389_v20 = vmul.f32 %v4018_v25, %v1388_v47  ;;  %vm1392_vm9 = vmor %vm1390_vm1, %vm1391_vm2 }
 0x131   : > { %5641 = vst [vmem:[#allocation10_spill] sm:$0xff] %v4132_v49  ;;  %v4140_v50 = vpop.eup %2428  ;;  %vm1380_vm7 = vweird.f32 %v3917_v55  ;;  %v1196_v5 = vmul.f32 %v4100_v53, %v1195_v26  ;;  %v4151_v43 = vmul.f32 0.5, %v1596_v28  ;;  %v1605_v55 = vmul.f32 %v4116_v1, %v3993_v40  ;;  %v4170_v33 = vpop.xlane.xlu2 %720 }
 0x132   : > { %v1205_v29 = vmul.f32 %v4140_v50, %v4091_v46  ;;  %2432 = vrsqrt.f32 %v4138_v51  ;;  %vm1382_vm8 = vmor %vm1380_vm7, %vm1381_vm6  ;;  %2166 = vmatpush.bf16.xpose.msra.mxu2 %v1958_v54  ;;  %v2054_v41 = vsel %vm154_vm0, %v1959_v38, 0  ;;  %v1757_v36 = vmul.f32 0.5, %v1756_v34 }
 0x133   : > { %2434 = vrsqrt.f32 %v4120_v30  ;;  %v4157_v47 = vpop.eup %2430  ;;  %2179 = vmatpush.bf16.xpose.msra.mxu3 %v2054_v41  ;;  %v1768_v6 = vsub.f32 1.5, %v1767_v24  ;;  %v1383_v26 = vsel %vm1382_vm8, %v3990_v19, %v1379_v22  ;;  %v1393_v32 = vsel %vm1392_vm9, %v4018_v25, %v1389_v20  ;;  %v5645_v41 = vld [vmem:[#allocation48_spill] sm:$0xff] }
 0x134   : > { %v1206_v28 = vmul.f32 %v4140_v50, %v1205_v29  ;;  %2436 = vrsqrt.f32 %v4135_v9  ;;  %v4173_v34 = vmax.f32 %v3896_v52, 1e-24  ;;  %v1197_v2 = vmul.f32 0.5, %v1196_v5  ;;  %v5644_v29 = vld [vmem:[#allocation53_spill] sm:$0xff] }
 0x135   : > { %2438 = vrsqrt.f32 %v4132_v49  ;;  %v1854_v15 = vmul.f32 %v1383_v26, %v5643_v61  ;;  %v4177_v54 = vmax.f32 %v4075_v35, 1e-24  ;;  %v1856_v24 = vmul.f32 %v1393_v32, %v5644_v29 }
 0x136   : > { %5642 = vst [vmem:[#allocation23_spill] sm:$0xff] %v4173_v34  ;;  %v1207_v38 = vmul.f32 0.5, %v1206_v28  ;;  %v1855_v39 = vmul.f32 %v1383_v26, %v5645_v41  ;;  %v1857_v19 = vmul.f32 %v1393_v32, %v5646_v17  ;;  %v1606_v52 = vmul.f32 %v4116_v1, %v1605_v55  ;;  %v4193_v17 = vpop.xlane.xlu1 %864 }
 0x137   : > { %vm1770_vm10 = vweird.f32 %v3986_v23  ;;  %v1758_v20 = vsub.f32 1.5, %v1757_v36  ;;  %vm1771_vm11 = vweird.f32 %v4059_v44  ;;  %vm1760_vm12 = vweird.f32 %v4000_v13 }
 0x138   : > { %v4182_v22 = vpop.eup %2432  ;;  %v1974_v28 = vpack.c.bf16 %v1856_v24, %v1854_v15  ;;  %v1769_v32 = vmul.f32 %v4059_v44, %v1768_v6  ;;  %vm1761_vm14 = vweird.f32 %v4071_v3  ;;  %2440 = vrsqrt.f32 %v4173_v34  ;;  %v725_v24 = vpop.xlane.xlu0 %724  ;;  %vm1772_vm15 = vmor %vm1770_vm10, %vm1771_vm11 }
 0x139   : > { %v4187_v5 = vpop.eup %2434  ;;  %v1355_v35 = vmul.f32 %v4182_v22, %v4138_v51  ;;  %v1975_v55 = vpack.c.bf16 %v1857_v19, %v1855_v39  ;;  %v1198_v61 = vsub.f32 1.5, %v1197_v2  ;;  %v1208_v29 = vsub.f32 1.5, %v1207_v38  ;;  %vm1762_vm5 = vmor %vm1760_vm12, %vm1761_vm14 }
 0x13a   : > { %v4195_v26 = vpop.eup %2436  ;;  %2192 = vmatpush.bf16.xpose.msrb.mxu0 %v1974_v28  ;;  %2442 = vrsqrt.f32 %v4177_v54  ;;  %v4204_v15 = vmax.f32 %v4106_v18, 1e-24  ;;  %v1759_v41 = vmul.f32 %v4071_v3, %v1758_v20  ;;  %v1575_v6 = vmul.f32 %v4157_v47, %v4097_v48  ;;  %v4240_v28 = vpop.xlane.xlu2 %868 }
 0x13b   : > { %v4200_v36 = vpop.eup %2438  ;;  %v1356_v25 = vmul.f32 %v4182_v22, %v1355_v35  ;;  %v2078_v39 = vsel %vm154_vm0, %v1975_v55, 0  ;;  %v1585_v2 = vmul.f32 %v4187_v5, %v4120_v30  ;;  %v4214_v38 = vmax.f32 %v3928_v27, 1e-24 }
 0x13c   : > { %5647 = vst [vmem:[#allocation20_spill] sm:$0xff] %v4200_v36  ;;  %v1365_v18 = vmul.f32 %v4195_v26, %v4135_v9  ;;  %2205 = vmatpush.bf16.xpose.msrb.mxu1 %v2078_v39  ;;  %2444 = vrsqrt.f32 %v4204_v15  ;;  %v1745_v19 = vmul.f32 %v4200_v36, %v4132_v49  ;;  %vm1200_vm3 = vweird.f32 %v4045_v56 }
 0x13d   : > { %5648 = vst [vmem:[#allocation25_spill] sm:$0xff] %v4214_v38  ;;  %vm1201_vm4 = vweird.f32 %v4100_v53  ;;  %v4228_v27 = vmax.f32 %v3982_v0, 1e-24  ;;  %vm1211_vm13 = vweird.f32 %v4140_v50  ;;  %v4236_v23 = vmax.f32 %v4051_v7, 1e-24 }
 0x13e   : > { %v1199_v20 = vmul.f32 %v4100_v53, %v1198_v61  ;;  %v1209_v35 = vmul.f32 %v4140_v50, %v1208_v29  ;;  %v4242_v55 = vpop.eup %2440  ;;  %v4244_v0 = vmul.f32 0.5, %v1606_v52  ;;  %v4247_v39 = vsel %vm1772_vm15, %v4059_v44, %v1769_v32  ;;  %vm1202_vm6 = vmor %vm1200_vm3, %vm1201_vm4  ;;  %v4277_v29 = vpop.xlane.xlu1 %652 }
 0x13f   : > { %5649 = vst [vmem:[#allocation22_spill] sm:$0xff] %v4228_v27  ;;  %v4250_v13 = vsel %vm1762_vm5, %v4071_v3, %v1759_v41  ;;  %v1357_v49 = vmul.f32 0.5, %v1356_v25  ;;  %v1576_v7 = vmul.f32 %v4157_v47, %v1575_v6  ;;  %2446 = vrsqrt.f32 %v4214_v38  ;;  %v5654_v6 = vld [vmem:[#allocation59_spill] sm:$0xff] }
 0x140   : > { %5650 = vst [vmem:[#allocation35_spill] sm:$0xff] %v4236_v23  ;;  %v4252_v8 = vpop.eup %2442  ;;  %vm1210_vm1 = vweird.f32 %v4091_v46  ;;  %v1366_v44 = vmul.f32 %v4195_v26, %v1365_v18  ;;  %v1586_v52 = vmul.f32 %v4187_v5, %v1585_v2  ;;  %2448 = vrsqrt.f32 %v4228_v27  ;;  %v649_v12 = vpop.xlane.xlu0 %648 }
 0x141   : > { %5651 = vst [vmem:[#allocation37_spill] sm:$0xff] %v4242_v55  ;;  %vm1212_vm2 = vmor %vm1210_vm1, %vm1211_vm13  ;;  %v4267_v3 = vmax.f32 %v4170_v33, 1e-24  ;;  %v1203_v25 = vsel %vm1202_vm6, %v4100_v53, %v1199_v20  ;;  %v1746_v32 = vmul.f32 %v4200_v36, %v1745_v19  ;;  %v1735_v46 = vmul.f32 %v4242_v55, %v4173_v34  ;;  %v5655_v53 = vld [vmem:[#allocation64_spill] sm:$0xff] }
 0x142   : > { %5652 = vst [vmem:[#allocation32_spill] sm:$0xff] %v4247_v39  ;;  %v4270_v56 = vpop.eup %2444  ;;  %2450 = vrsqrt.f32 %v4236_v23  ;;  %v1213_v61 = vsel %vm1212_vm2, %v4140_v50, %v1209_v35  ;;  %v1358_v41 = vsub.f32 1.5, %v1357_v49  ;;  %v1175_v33 = vmul.f32 %v4252_v8, %v4177_v54 }
 0x143   : > { %5653 = vst [vmem:[#allocation34_spill] sm:$0xff] %v4250_v13  ;;  %v1818_v2 = vmul.f32 %v1203_v25, %v5654_v6  ;;  %v1820_v18 = vmul.f32 %v1213_v61, %v5655_v53  ;;  %v1367_v20 = vmul.f32 0.5, %v1366_v44  ;;  %v1185_v19 = vmul.f32 %v4270_v56, %v4204_v15 }
 0x144   : > { %v1819_v34 = vmul.f32 %v1203_v25, %v5656_v21  ;;  %v1821_v11 = vmul.f32 %v1213_v61, %v5657_v37  ;;  %v4287_v50 = vmul.f32 0.5, %v1576_v7  ;;  %v4289_v35 = vmul.f32 0.5, %v1586_v52  ;;  %v4315_v61 = vpop.xlane.xlu2 %792 }
 0x145   : > { %2452 = vrsqrt.f32 %v4267_v3  ;;  %v1956_v49 = vpack.c.bf16 %v1820_v18, %v1818_v2  ;;  %v4292_v30 = vpop.eup %2446  ;;  %v4294_v6 = vmul.f32 0.5, %v1746_v32  ;;  %v1736_v44 = vmul.f32 %v4242_v55, %v1735_v46  ;;  %v5660_v46 = vld [vmem:[#allocation40_spill] sm:$0xff] }
 0x146   : > { %v1957_v53 = vpack.c.bf16 %v1821_v11, %v1819_v34  ;;  %v4297_v45 = vmax.f32 %v725_v24, 1e-24  ;;  %v4299_v21 = vpop.eup %2448  ;;  %vm1361_vm7 = vweird.f32 %v4182_v22  ;;  %v1176_v37 = vmul.f32 %v4252_v8, %v1175_v33  ;;  %v5662_v33 = vld [vmem:[#allocation41_spill] sm:$0xff] }
 0x147   : > { %5658 = vst [vmem:[#allocation46_spill] sm:$0xff] %v4299_v21  ;;  %v4304_v7 = vmax.f32 %v4083_v59, 1e-24  ;;  %2167 = vmatpush.bf16.xpose.msra.mxu2 %v1956_v49  ;;  %v1359_v52 = vmul.f32 %v4182_v22, %v1358_v41  ;;  %v4312_v11 = vmul.f32 %v4247_v39, %v5660_v46  ;;  %v1368_v34 = vsub.f32 1.5, %v1367_v20 }
 0x148   : > { %v4307_v25 = vpop.eup %2450  ;;  %v1186_v24 = vmul.f32 %v4270_v56, %v1185_v19  ;;  %v4319_v59 = vmul.f32 %v4250_v13, %v5662_v33  ;;  %vm1360_vm8 = vweird.f32 %v4138_v51  ;;  %v2051_v41 = vsel %vm154_vm0, %v1957_v53, 0  ;;  %v4355_v32 = vpop.xlane.xlu0 %796  ;;  %v5667_v13 = vld [vmem:[#allocation69_spill] sm:$0xff] }
 0x149   : > { %5659 = vst [vmem:[#allocation43_spill] sm:$0xff] %v4304_v7  ;;  %v4325_v49 = vmul.f32 0.5, %v1736_v44  ;;  %vm1371_vm9 = vweird.f32 %v4195_v26  ;;  %vm1362_vm10 = vmor %vm1360_vm8, %vm1361_vm7  ;;  %2180 = vmatpush.bf16.xpose.msra.mxu3 %v2051_v41  ;;  %2454 = vrsqrt.f32 %v4297_v45  ;;  %v1748_v19 = vsub.f32 1.5, %v4294_v6  ;;  %v713_v41 = vpop.xlane.xlu1 %712  ;;  %v5664_v6 = vld [vmem:[#allocation70_spill] sm:$0xff] }
 0x14a   : > { %5661 = vst [vmem:[#allocation45_spill] sm:$0xff] %v4312_v11  ;;  %v1177_v46 = vmul.f32 0.5, %v1176_v37  ;;  %2456 = vrsqrt.f32 %v4304_v7  ;;  %v1363_v51 = vsel %vm1362_vm10, %v4182_v22, %v1359_v52  ;;  %v1555_v44 = vmul.f32 %v4292_v30, %v4214_v38  ;;  %v5665_v22 = vld [vmem:[#allocation67_spill] sm:$0xff] }
 0x14b   : > { %5663 = vst [vmem:[#allocation42_spill] sm:$0xff] %v4319_v59  ;;  %v4331_v20 = vpop.eup %2452  ;;  %vm1370_vm11 = vweird.f32 %v4135_v9  ;;  %v1187_v53 = vmul.f32 0.5, %v1186_v24  ;;  %v1369_v33 = vmul.f32 %v4195_v26, %v1368_v34  ;;  %v1565_v18 = vmul.f32 %v4299_v21, %v4228_v27  ;;  %v5668_v59 = vld [vmem:[#allocation66_spill] sm:$0xff] }
 0x14c   : > { %vm1372_vm12 = vmor %vm1370_vm11, %vm1371_vm9  ;;  %vm1180_vm14 = vweird.f32 %v4177_v54  ;;  %v1850_v37 = vmul.f32 %v1363_v51, %v5664_v6  ;;  %v1851_v52 = vmul.f32 %v1363_v51, %v5665_v22  ;;  %v1715_v2 = vmul.f32 %v4307_v25, %v4236_v23 }
 0x14d   : > { %v4350_v9 = vmax.f32 %v4128_v42, 1e-24  ;;  %v1335_v34 = vmul.f32 %v4331_v20, %v4267_v3  ;;  %v1373_v24 = vsel %vm1372_vm12, %v4195_v26, %v1369_v33  ;;  %v1178_v39 = vsub.f32 1.5, %v1177_v46 }
 0x14e   : > { %v1852_v11 = vmul.f32 %v1373_v24, %v5667_v13  ;;  %v1853_v6 = vmul.f32 %v1373_v24, %v5668_v59  ;;  %v4359_v38 = vmax.f32 %v649_v12, 1e-24  ;;  %vm1181_vm15 = vweird.f32 %v4252_v8 }
 0x14f   : > { %5666 = vst [vmem:[#allocation51_spill] sm:$0xff] %v4350_v9  ;;  %v4361_v51 = vpop.eup %2454  ;;  %v1188_v42 = vsub.f32 1.5, %v1187_v53  ;;  %vm1190_vm3 = vweird.f32 %v4204_v15  ;;  %v4366_v22 = vmax.f32 %v4277_v29, 1e-24  ;;  %v4371_v46 = vmax.f32 %v4193_v17, 1e-24  ;;  %v717_v29 = vpop.xlane.xlu2 %716  ;;  %vm1182_vm5 = vmor %vm1180_vm14, %vm1181_vm15 }
 0x150   : > { %v4368_v26 = vpop.eup %2456  ;;  %v1345_v13 = vmul.f32 %v4361_v51, %v4297_v45  ;;  %v1972_v12 = vpack.c.bf16 %v1852_v11, %v1850_v37  ;;  %v1973_v59 = vpack.c.bf16 %v1853_v6, %v1851_v52  ;;  %vm1191_vm4 = vweird.f32 %v4270_v56  ;;  %v5674_v15 = vld [vmem:[#allocation75_spill] sm:$0xff] }
 0x151   : > { %5669 = vst [vmem:[#allocation53_spill] sm:$0xff] %v4371_v46  ;;  %2458 = vrsqrt.f32 %v4350_v9  ;;  %v1336_v53 = vmul.f32 %v4331_v20, %v1335_v34  ;;  %v4379_v33 = vmax.f32 %v4240_v28, 1e-24  ;;  %v1179_v11 = vmul.f32 %v4252_v8, %v1178_v39  ;;  %vm1192_vm13 = vmor %vm1190_vm3, %vm1191_vm4 }
 0x152   : > { %v1346_v24 = vmul.f32 %v4361_v51, %v1345_v13  ;;  %2193 = vmatpush.bf16.xpose.msrb.mxu0 %v1972_v12  ;;  %v2075_v17 = vsel %vm154_vm0, %v1973_v59, 0  ;;  %2460 = vrsqrt.f32 %v4359_v38  ;;  %v1725_v37 = vmul.f32 %v4368_v26, %v4304_v7 }
 0x153   : > { %5670 = vst [vmem:[#allocation48_spill] sm:$0xff] %v4379_v33  ;;  %v4392_v28 = vmax.f32 %v4144_v57, 1e-24  ;;  %2206 = vmatpush.bf16.xpose.msrb.mxu1 %v2075_v17  ;;  %2462 = vrsqrt.f32 %v4366_v22  ;;  %v1189_v52 = vmul.f32 %v4270_v56, %v1188_v42  ;;  %v1738_v34 = vsub.f32 1.5, %v4325_v49  ;;  %v4409_v49 = vpop.xlane.xlu1 %860 }
 0x154   : > { %v1556_v39 = vmul.f32 %v4292_v30, %v1555_v44  ;;  %2464 = vrsqrt.f32 %v4371_v46  ;;  %v1183_v54 = vsel %vm1182_vm5, %v4252_v8, %v1179_v11  ;;  %v4401_v6 = vmul.f32 %v4200_v36, %v1748_v19  ;;  %v4421_v11 = vpop.xlane.xlu0 %856 }
 0x155   : > { %5671 = vst [vmem:[#allocation50_spill] sm:$0xff] %v4392_v28  ;;  %v1566_v13 = vmul.f32 %v4299_v21, %v1565_v18  ;;  %v1337_v57 = vmul.f32 0.5, %v1336_v53  ;;  %2466 = vrsqrt.f32 %v4379_v33  ;;  %v1716_v44 = vmul.f32 %v4307_v25, %v1715_v2  ;;  %v5675_v53 = vld [vmem:[#allocation77_spill] sm:$0xff] }
 0x156   : > { %5672 = vst [vmem:[#allocation59_spill] sm:$0xff] %v4401_v6  ;;  %v1347_v42 = vmul.f32 0.5, %v1346_v24  ;;  %v1193_v8 = vsel %vm1192_vm13, %v4270_v56, %v1189_v52  ;;  %v4413_v12 = vmax.f32 %v713_v41, 1e-24  ;;  %v1726_v18 = vmul.f32 %v4368_v26, %v1725_v37  ;;  %v5677_v41 = vld [vmem:[#allocation72_spill] sm:$0xff] }
 0x157   : > { %v4415_v19 = vpop.eup %2458  ;;  %2468 = vrsqrt.f32 %v4392_v28  ;;  %v1814_v59 = vmul.f32 %v1183_v54, %v5674_v15  ;;  %v1816_v17 = vmul.f32 %v1193_v8, %v5675_v53  ;;  %v4426_v2 = vmul.f32 %v4242_v55, %v1738_v34  ;;  %v5678_v53 = vld [vmem:[#allocation74_spill] sm:$0xff] }
 0x158   : > { %5673 = vst [vmem:[#allocation64_spill] sm:$0xff] %v4415_v19  ;;  %v4423_v6 = vpop.eup %2460  ;;  %v4428_v56 = vmul.f32 0.5, %v1556_v39  ;;  %v1815_v24 = vmul.f32 %v1183_v54, %v5677_v41  ;;  %v4431_v52 = vmax.f32 %v717_v29, 1e-24  ;;  %v4435_v7 = vmul.f32 0.5, %v1566_v13 }
 0x159   : > { %5676 = vst [vmem:[#allocation56_spill] sm:$0xff] %v4426_v2  ;;  %v4433_v37 = vpop.eup %2462  ;;  %v1338_v15 = vsub.f32 1.5, %v1337_v57  ;;  %v1954_v23 = vpack.c.bf16 %v1816_v17, %v1814_v59  ;;  %v1817_v36 = vmul.f32 %v1193_v8, %v5678_v53  ;;  %v1717_v27 = vmul.f32 0.5, %v1716_v44  ;;  %v641_v57 = vpop.xlane.xlu2 %640  ;;  %v5683_v2 = vld [vmem:[#allocation80_spill] sm:$0xff] }
 0x15a   : > { %v4438_v21 = vpop.eup %2464  ;;  %vm1340_vm6 = vweird.f32 %v4267_v3  ;;  %v1348_v34 = vsub.f32 1.5, %v1347_v42  ;;  %2470 = vrsqrt.f32 %v4413_v12  ;;  %v1727_v29 = vmul.f32 0.5, %v1726_v18 }
 0x15b   : > { %5679 = vst [vmem:[#allocation61_spill] sm:$0xff] %v4438_v21  ;;  %v4442_v39 = vpop.eup %2466  ;;  %vm1341_vm1 = vweird.f32 %v4331_v20  ;;  %v1155_v54 = vmul.f32 %v4423_v6, %v4359_v38  ;;  %2168 = vmatpush.bf16.xpose.msra.mxu2 %v1954_v23  ;;  %v1955_v13 = vpack.c.bf16 %v1817_v36, %v1815_v24  ;;  %v1545_v8 = vmul.f32 %v4415_v19, %v4350_v9 }
 0x15c   : > { %5680 = vst [vmem:[#allocation40_spill] sm:$0xff] %v4442_v39  ;;  %vm1351_vm2 = vweird.f32 %v4361_v51  ;;  %v1165_v44 = vmul.f32 %v4433_v37, %v4366_v22  ;;  %2472 = vrsqrt.f32 %v4431_v52  ;;  %v1695_v18 = vmul.f32 %v4438_v21, %v4371_v46  ;;  %vm1342_vm8 = vmor %vm1340_vm6, %vm1341_vm1  ;;  %v645_v46 = vpop.xlane.xlu0 %644 }
 0x15d   : > { %v4453_v42 = vpop.eup %2468  ;;  %vm1350_vm7 = vweird.f32 %v4297_v45  ;;  %v2048_v36 = vsel %vm154_vm0, %v1955_v13, 0  ;;  %v1339_v23 = vmul.f32 %v4331_v20, %v1338_v15  ;;  %v1705_v59 = vmul.f32 %v4442_v39, %v4379_v33  ;;  %v4474_v13 = vpop.xlane.xlu1 %784 }
 0x15e   : > { %v4465_v17 = vmax.f32 %v4315_v61, 1e-24  ;;  %2181 = vmatpush.bf16.xpose.msra.mxu3 %v2048_v36  ;;  %v4467_v41 = vmax.f32 %v641_v57, 1e-24  ;;  %v1349_v24 = vmul.f32 %v4361_v51, %v1348_v34  ;;  %v1718_v53 = vsub.f32 1.5, %v1717_v27  ;;  %vm1352_vm9 = vmor %vm1350_vm7, %vm1351_vm2 }
 0x15f   : > { %v1728_v45 = vsub.f32 1.5, %v1727_v29  ;;  %v1156_v15 = vmul.f32 %v4423_v6, %v1155_v54  ;;  %v1343_v3 = vsel %vm1342_vm8, %v4331_v20, %v1339_v23  ;;  %v1546_v61 = vmul.f32 %v4415_v19, %v1545_v8  ;;  %v5681_v54 = vld [vmem:[#allocation83_spill] sm:$0xff]  ;;  %v5682_v20 = vld [vmem:[#allocation88_spill] sm:$0xff] }
 0x160   : > { %v4476_v33 = vpop.eup %2470  ;;  %v1535_v57 = vmul.f32 %v4453_v42, %v4392_v28  ;;  %v1166_v34 = vmul.f32 %v4433_v37, %v1165_v44  ;;  %v1353_v27 = vsel %vm1352_vm9, %v4361_v51, %v1349_v24  ;;  %v1696_v29 = vmul.f32 %v4438_v21, %v1695_v18  ;;  %v5684_v44 = vld [vmem:[#allocation85_spill] sm:$0xff] }
 0x161   : > { %2474 = vrsqrt.f32 %v4467_v41  ;;  %v1846_v36 = vmul.f32 %v1343_v3, %v5681_v54  ;;  %v1848_v23 = vmul.f32 %v1353_v27, %v5682_v20  ;;  %v1706_v8 = vmul.f32 %v4442_v39, %v1705_v59 }
 0x162   : > { %v4487_v9 = vpop.eup %2472  ;;  %2476 = vrsqrt.f32 %v4465_v17  ;;  %v1847_v28 = vmul.f32 %v1343_v3, %v5683_v2  ;;  %v1849_v19 = vmul.f32 %v1353_v27, %v5684_v44  ;;  %v1157_v51 = vmul.f32 0.5, %v1156_v15 }
 0x163   : > { %v1315_v18 = vmul.f32 %v4476_v33, %v4413_v12  ;;  %v1325_v24 = vmul.f32 %v4487_v9, %v4431_v52  ;;  %v1970_v54 = vpack.c.bf16 %v1848_v23, %v1846_v36  ;;  %v1536_v21 = vmul.f32 %v4453_v42, %v1535_v57 }
 0x164   : > { %v1167_v55 = vmul.f32 0.5, %v1166_v34  ;;  %v1971_v59 = vpack.c.bf16 %v1849_v19, %v1847_v28  ;;  %v4501_v2 = vmul.f32 %v4307_v25, %v1718_v53  ;;  %v4504_v15 = vmul.f32 %v4368_v26, %v1728_v45 }
 0x165   : > { %2194 = vmatpush.bf16.xpose.msrb.mxu0 %v1970_v54  ;;  %v4506_v3 = vmax.f32 %v645_v46, 1e-24  ;;  %v4508_v27 = vmul.f32 0.5, %v1546_v61  ;;  %v4510_v36 = vmul.f32 0.5, %v1696_v29  ;;  %v4513_v23 = vmax.f32 %v4355_v32, 1e-24  ;;  %v709_v44 = vpop.xlane.xlu1 %708  ;;  %v705_v54 = vpop.xlane.xlu0 %704 }
 0x166   : > { %v2072_v28 = vsel %vm154_vm0, %v1971_v59, 0  ;;  %v4518_v57 = vmul.f32 0.5, %v1706_v8  ;;  %v1158_v53 = vsub.f32 1.5, %v1157_v51  ;;  %v1316_v45 = vmul.f32 %v4476_v33, %v1315_v18 }
 0x167   : > { %v4516_v19 = vpop.eup %2474  ;;  %v1326_v34 = vmul.f32 %v4487_v9, %v1325_v24  ;;  %2207 = vmatpush.bf16.xpose.msrb.mxu1 %v2072_v28  ;;  %v4524_v61 = vmul.f32 0.5, %v1536_v21  ;;  %v1168_v29 = vsub.f32 1.5, %v1167_v55  ;;  %vm1170_vm10 = vweird.f32 %v4366_v22 }
 0x168   : > { %v4522_v46 = vpop.eup %2476  ;;  %v1135_v32 = vmul.f32 %v4516_v19, %v4467_v41  ;;  %vm1160_vm11 = vweird.f32 %v4359_v38  ;;  %vm1161_vm12 = vweird.f32 %v4423_v6  ;;  %v4532_v8 = vmax.f32 %v4409_v49, 1e-24 }
 0x169   : > { %2478 = vrsqrt.f32 %v4506_v3  ;;  %v1698_v51 = vsub.f32 1.5, %v4510_v36  ;;  %vm1171_vm14 = vweird.f32 %v4433_v37  ;;  %v1317_v18 = vmul.f32 0.5, %v1316_v45  ;;  %vm1162_vm15 = vmor %vm1160_vm11, %vm1161_vm12 }
 0x16a   : > { %2480 = vrsqrt.f32 %v4513_v23  ;;  %v1136_v55 = vmul.f32 %v4516_v19, %v1135_v32  ;;  %v1327_v38 = vmul.f32 0.5, %v1326_v34  ;;  %v1159_v24 = vmul.f32 %v4423_v6, %v1158_v53  ;;  %vm1172_vm3 = vmor %vm1170_vm10, %vm1171_vm14 }
 0x16b   : > { %v4543_v49 = vmul.f32 %v4522_v46, %v4465_v17  ;;  %v1169_v28 = vmul.f32 %v4433_v37, %v1168_v29  ;;  %v4546_v39 = vmax.f32 %v709_v44, 1e-24  ;;  %vm1320_vm4 = vweird.f32 %v4413_v12 }
 0x16c   : > { %v1137_v59 = vmul.f32 0.5, %v1136_v55  ;;  %2482 = vrsqrt.f32 %v4532_v8  ;;  %v4553_v53 = vmax.f32 %v4421_v11, 1e-24  ;;  %v1163_v45 = vsel %vm1162_vm15, %v4423_v6, %v1159_v24 }
 0x16d   : > { %vm1321_vm5 = vweird.f32 %v4476_v33  ;;  %v1173_v34 = vsel %vm1172_vm3, %v4433_v37, %v1169_v28  ;;  %v1810_v29 = vmul.f32 %v1163_v45, %v3174_v16  ;;  %v4559_v32 = vmax.f32 %v705_v54, 1e-24 }
 0x16e   : > { %v1318_v22 = vsub.f32 1.5, %v1317_v18  ;;  %v1328_v55 = vsub.f32 1.5, %v1327_v38  ;;  %v1812_v20 = vmul.f32 %v1173_v34, %v3171_v63  ;;  %v1811_v21 = vmul.f32 %v1163_v45, %v3166_v60  ;;  %v789_v38 = vpop.xlane.xlu2 %788  ;;  %vm1322_vm8 = vmor %vm1320_vm4, %vm1321_vm5 }
 0x16f   : > { %v4561_v44 = vpop.eup %2478  ;;  %vm1600_vm13 = vweird.f32 %v3922_v31  ;;  %vm1601_vm6 = vweird.f32 %v4024_v4  ;;  %v1138_v6 = vsub.f32 1.5, %v1137_v59  ;;  %v1813_v37 = vmul.f32 %v1173_v34, %v3164_v58 }
 0x170   : > { %v4565_v11 = vpop.eup %2480  ;;  %v1145_v16 = vmul.f32 %v4561_v44, %v4506_v3  ;;  %2484 = vrsqrt.f32 %v4546_v39  ;;  %vm1330_vm1 = vweird.f32 %v4431_v52  ;;  %vm1331_vm2 = vweird.f32 %v4487_v9 }
 0x171   : > { %2486 = vrsqrt.f32 %v4553_v53  ;;  %v1952_v63 = vpack.c.bf16 %v1812_v20, %v1810_v29  ;;  %vm1611_vm7 = vweird.f32 %v4116_v1  ;;  %v4578_v60 = vmax.f32 %v4474_v13, 1e-24  ;;  %vm1332_vm11 = vmor %vm1330_vm1, %vm1331_vm2 }
 0x172   : > { %v1146_v18 = vmul.f32 %v4561_v44, %v1145_v16  ;;  %v1953_v24 = vpack.c.bf16 %v1813_v37, %v1811_v21  ;;  %2488 = vrsqrt.f32 %v4559_v32  ;;  %v4582_v58 = vpop.eup %2482  ;;  %v4590_v20 = vmul.f32 %v4565_v11, %v4513_v23  ;;  %v5685_v16 = vld [vmem:[#allocation92_spill] sm:$0xff] }
 0x173   : > { %vm1140_vm9 = vweird.f32 %v4467_v41  ;;  %2169 = vmatpush.bf16.xpose.msra.mxu2 %v1952_v63  ;;  %v1319_v13 = vmul.f32 %v4476_v33, %v1318_v22  ;;  %v1329_v21 = vmul.f32 %v4487_v9, %v1328_v55  ;;  %vm1610_vm10 = vweird.f32 %v3993_v40  ;;  %v5695_v40 = vld [vmem:[#allocation36_spill] sm:$0xff] }
 0x174   : > { %vm1141_vm12 = vweird.f32 %v4516_v19  ;;  %v1147_v12 = vmul.f32 0.5, %v1146_v18  ;;  %v2045_v54 = vsel %vm154_vm0, %v1953_v24, 0  ;;  %v1139_v59 = vmul.f32 %v4516_v19, %v1138_v6 }
 0x175   : > { %vm1151_vm14 = vweird.f32 %v4561_v44  ;;  %v4604_v28 = vmax.f32 %v789_v38, 1e-24  ;;  %2182 = vmatpush.bf16.xpose.msra.mxu3 %v2045_v54  ;;  %v1323_v45 = vsel %vm1322_vm8, %v4476_v33, %v1319_v13  ;;  %v1333_v34 = vsel %vm1332_vm11, %v4487_v9, %v1329_v21  ;;  %vm1142_vm15 = vmor %vm1140_vm9, %vm1141_vm12  ;;  %v5686_v33 = vld [vmem:[#allocation95_spill] sm:$0xff]  ;;  %v853_v54 = vpop.xlane.xlu0 %852 }
 0x176   : > { %v4608_v29 = vpop.eup %2484  ;;  %v1148_v52 = vsub.f32 1.5, %v1147_v12  ;;  %v1842_v22 = vmul.f32 %v1323_v45, %v3240_v62  ;;  %v1844_v55 = vmul.f32 %v1333_v34, %v3284_v10  ;;  %v1843_v37 = vmul.f32 %v1323_v45, %v5685_v16  ;;  %vm1602_vm9 = vmor %vm1600_vm13, %vm1601_vm6  ;;  %v5689_v16 = vld [vmem:[#allocation13_spill] sm:$0xff] }
 0x177   : > { %v4613_v63 = vpop.eup %2486  ;;  %2490 = vrsqrt.f32 %v4578_v60  ;;  %vm1150_vm3 = vweird.f32 %v4506_v3  ;;  %v1305_v9 = vmul.f32 %v4608_v29, %v4546_v39  ;;  %v1845_v62 = vmul.f32 %v1333_v34, %v5686_v33  ;;  %vm1612_vm13 = vmor %vm1610_vm10, %vm1611_vm7 }
 0x178   : > { %v4624_v6 = vpop.eup %2488  ;;  %v1968_v10 = vpack.c.bf16 %v1844_v55, %v1842_v22  ;;  %v1143_v18 = vsel %vm1142_vm15, %v4516_v19, %v1139_v59  ;;  %v1149_v38 = vmul.f32 %v4561_v44, %v1148_v52  ;;  %v5687_v24 = vsub.f32 1.5, %v4151_v43  ;;  %vm1152_vm1 = vmor %vm1150_vm3, %vm1151_vm14  ;;  %v5688_v52 = vld [vmem:[#allocation103_spill] sm:$0xff]  ;;  %v849_v55 = vpop.xlane.xlu2 %848 }
 0x179   : > { %vm1580_vm4 = vweird.f32 %v4097_v48  ;;  %vm1581_vm5 = vweird.f32 %v4157_v47  ;;  %v4635_v3 = vmul.f32 %v4582_v58, %v4532_v8  ;;  %v1306_v13 = vmul.f32 %v4608_v29, %v1305_v9  ;;  %v5709_v48 = vld [vmem:[#allocation20_spill] sm:$0xff] }
 0x17a   : > { %v1599_v41 = vmul.f32 %v4024_v4, %v5687_v24  ;;  %v1295_v19 = vmul.f32 %v4624_v6, %v4559_v32  ;;  %v1969_v21 = vpack.c.bf16 %v1845_v62, %v1843_v37  ;;  %vm1591_vm2 = vweird.f32 %v4187_v5  ;;  %2195 = vmatpush.bf16.xpose.msrb.mxu0 %v1968_v10  ;;  %vm4713_vm3 = vmor %vm1580_vm4, %vm1581_vm5 }
 0x17b   : > { %2492 = vrsqrt.f32 %v4604_v28  ;;  %vm1310_vm8 = vweird.f32 %v4546_v39  ;;  %v1153_v43 = vsel %vm1152_vm1, %v4561_v44, %v1149_v38  ;;  %v1806_v12 = vmul.f32 %v1143_v18, %v3382_v14  ;;  %v5690_v44 = vld [vmem:[#allocation100_spill] sm:$0xff] }
 0x17c   : > { %v1307_v59 = vmul.f32 0.5, %v1306_v13  ;;  %v1296_v45 = vmul.f32 %v4624_v6, %v1295_v19  ;;  %v2069_v34 = vsel %vm154_vm0, %v1969_v21, 0  ;;  %v1808_v22 = vmul.f32 %v1153_v43, %v5688_v52  ;;  %v5691_v14 = vld [vmem:[#allocation104_spill] sm:$0xff]  ;;  %v5694_v21 = vld [vmem:[#allocation31_spill] sm:$0xff]  ;;  %v5697_v52 = vld [vmem:[#allocation33_spill] sm:$0xff] }
 0x17d   : > { %vm1590_vm11 = vweird.f32 %v5689_v16  ;;  %2208 = vmatpush.bf16.xpose.msrb.mxu1 %v2069_v34  ;;  %v1807_v37 = vmul.f32 %v1143_v18, %v5690_v44  ;;  %v1809_v9 = vmul.f32 %v1153_v43, %v5691_v14  ;;  %v1603_v33 = vsel %vm1602_vm9, %v4024_v4, %v1599_v41  ;;  %v4661_v10 = vpop.eup %2490  ;;  %v777_v14 = vpop.xlane.xlu1 %776  ;;  %v5712_v16 = vld [vmem:[#allocation17_spill] sm:$0xff] }
 0x17e   : > { %v5692_v31 = vsub.f32 1.5, %v4244_v0  ;;  %v1308_v38 = vsub.f32 1.5, %v1307_v59  ;;  %v1297_v24 = vmul.f32 0.5, %v1296_v45  ;;  %v1950_v13 = vpack.c.bf16 %v1808_v22, %v1806_v12  ;;  %vm1592_vm4 = vmor %vm1590_vm11, %vm1591_vm2  ;;  %v5713_v22 = vld [vmem:[#allocation108_spill] sm:$0xff] }
 0x17f   : > { %v4667_v19 = vmax.f32 %v853_v54, 1e-24  ;;  %vm1311_vm6 = vweird.f32 %v4608_v29  ;;  %v1951_v18 = vpack.c.bf16 %v1809_v9, %v1807_v37  ;;  %v4671_v0 = vmax.f32 %v849_v55, 1e-24  ;;  %v5696_v54 = vld [vmem:[#allocation28_spill] sm:$0xff] }
 0x180   : > { %v1609_v62 = vmul.f32 %v4116_v1, %v5692_v31  ;;  %v1298_v41 = vsub.f32 1.5, %v1297_v24  ;;  %vm1301_vm12 = vweird.f32 %v4624_v6  ;;  %2170 = vmatpush.bf16.xpose.msra.mxu2 %v1950_v13  ;;  %v1898_v43 = vmul.f32 %v1603_v33, %v5694_v21  ;;  %vm4684_vm10 = vmor %vm1310_vm8, %vm1311_vm6  ;;  %v5704_v13 = vld [vmem:[#allocation22_spill] sm:$0xff] }
 0x181   : > { %5693 = vst [vmem:[#allocation41_spill] sm:$0xff] %v4671_v0  ;;  %v4676_v59 = vpop.eup %2492  ;;  %vm1300_vm7 = vweird.f32 %v4559_v32  ;;  %v2042_v12 = vsel %vm154_vm0, %v1951_v18, 0  ;;  %v1899_v45 = vmul.f32 %v1603_v33, %v5696_v54  ;;  %2494 = vrsqrt.f32 %v4667_v19  ;;  %v5705_v18 = vld [vmem:[#allocation46_spill] sm:$0xff] }
 0x182   : > { %v1613_v4 = vsel %vm1612_vm13, %v4116_v1, %v1609_v62  ;;  %2183 = vmatpush.bf16.xpose.msra.mxu3 %v2042_v12  ;;  %v1299_v44 = vmul.f32 %v4624_v6, %v1298_v41  ;;  %v1309_v32 = vmul.f32 %v4608_v29, %v1308_v38  ;;  %v1516_v37 = vmul.f32 %v4522_v46, %v4543_v49  ;;  %vm1302_vm14 = vmor %vm1300_vm7, %vm1301_vm12  ;;  %v5707_v41 = vld [vmem:[#allocation107_spill] sm:$0xff]  ;;  %v5708_v21 = vld [vmem:[#allocation110_spill] sm:$0xff] }
 0x183   : > { %v1900_v34 = vmul.f32 %v1613_v4, %v5695_v40  ;;  %v1901_v1 = vmul.f32 %v1613_v4, %v5697_v52  ;;  %2496 = vrsqrt.f32 %v4671_v0  ;;  %v5700_v9 = vsub.f32 1.5, %v4287_v50  ;;  %v5706_v4 = vld [vmem:[#allocation109_spill] sm:$0xff] }
 0x184   : > { %vm1561_vm15 = vweird.f32 %v4292_v30  ;;  %v4700_v31 = vmax.f32 %v777_v14, 1e-24  ;;  %v1303_v62 = vsel %vm1302_vm14, %v4624_v6, %v1299_v44  ;;  %v1313_v49 = vsel %vm4684_vm10, %v4608_v29, %v1309_v32  ;;  %v5710_v40 = vld [vmem:[#allocation25_spill] sm:$0xff] }
 0x185   : > { %v1996_v55 = vpack.c.bf16 %v1900_v34, %v1898_v43  ;;  %v1997_v39 = vpack.c.bf16 %v1901_v1, %v1899_v45  ;;  %v1579_v33 = vmul.f32 %v4157_v47, %v5700_v9  ;;  %v5701_v38 = vsub.f32 1.5, %v4289_v35  ;;  %v5711_v52 = vld [vmem:[#allocation37_spill] sm:$0xff] }
 0x186   : > { %vm1570_vm1 = vweird.f32 %v5704_v13  ;;  %vm1571_vm8 = vweird.f32 %v5705_v18  ;;  %v1838_v29 = vmul.f32 %v1303_v62, %v5706_v4  ;;  %v1840_v35 = vmul.f32 %v1313_v49, %v5707_v41  ;;  %v5715_v14 = vld [vmem:[#allocation61_spill] sm:$0xff] }
 0x187   : > { %v1589_v24 = vmul.f32 %v4187_v5, %v5701_v38  ;;  %v2111_v6 = vsel %vm154_vm0, %v1997_v39, 0  ;;  %v1839_v43 = vmul.f32 %v1303_v62, %v5708_v21  ;;  %vm1751_vm5 = vweird.f32 %v5709_v48  ;;  %2171 = vmatmul.bf16.vlgmr.msra.gmra.mxu2 %v5712_v16  ;;  %v4743_v32 = vpop.eup %2494  ;;  %v5726_v21 = vld [vmem:[#allocation42_spill] sm:$0xff]  ;;  %vm1572_vm10 = vmor %vm1570_vm1, %vm1571_vm8 }
 0x188   : > { %2215 = vmatpush.bf16.xpose.msrb.mxu2 %v1996_v55  ;;  %vm1560_vm9 = vweird.f32 %v5710_v40  ;;  %v1526_v12 = vmul.f32 %v4565_v11, %v4590_v20  ;;  %v1686_v54 = vmul.f32 %v4582_v58, %v4635_v3  ;;  %v1675_v45 = vmul.f32 %v4613_v63, %v4553_v53  ;;  %v5714_v3 = vld [vmem:[#allocation10_spill] sm:$0xff] }
 0x189   : > { %vm1741_vm13 = vweird.f32 %v5711_v52  ;;  %v1966_v1 = vpack.c.bf16 %v1840_v35, %v1838_v29  ;;  %v1841_v55 = vmul.f32 %v1313_v49, %v5713_v22  ;;  %v1583_v44 = vsel %vm4713_vm3, %v4157_v47, %v1579_v33  ;;  %v5718_v49 = vld [vmem:[#allocation40_spill] sm:$0xff]  ;;  %v841_v47 = vpop.xlane.xlu0 %840  ;;  %v5721_v33 = vld [vmem:[#allocation23_spill] sm:$0xff]  ;;  %v781_v29 = vpop.xlane.xlu2 %780  ;;  %v5727_v22 = vld [vmem:[#allocation45_spill] sm:$0xff] }
 0x18a   : > { %2228 = vmatpush.bf16.xpose.msrb.mxu3 %v2111_v6  ;;  %v1593_v20 = vsel %vm1592_vm4, %v4187_v5, %v1589_v24  ;;  %vm1750_vm2 = vweird.f32 %v5714_v3  ;;  %v4750_v9 = vmul.f32 %v5715_v14, %v1698_v51  ;;  %v5717_v62 = vsub.f32 1.5, %v4518_v57  ;;  %v4759_v5 = vpop.eup %2496  ;;  %v5722_v24 = vld [vmem:[#allocation9_spill] sm:$0xff]  ;;  %v5723_v51 = vld [vmem:[#allocation47_spill] sm:$0xff]  ;;  %v5724_v57 = vld [vmem:[#allocation52_spill] sm:$0xff] }
 0x18b   : > { %v4757_v50 = vmul.f32 0.5, %v1516_v37  ;;  %vm1740_vm11 = vweird.f32 %v5721_v33  ;;  %2498 = vrsqrt.f32 %v4700_v31  ;;  %2337 = vmatmul.msk.bf16.vlgmr.msra.gmra.mxu3 %vm154_vm0, %v5722_v24  ;;  %2196 = vmatpush.bf16.xpose.msrb.mxu0 %v1966_v1  ;;  %v1967_v36 = vpack.c.bf16 %v1841_v55, %v1839_v43  ;;  %vm1562_vm6 = vmor %vm1560_vm9, %vm1561_vm15  ;;  %v5740_v3 = vld [vmem:[#allocation43_spill] sm:$0xff] }
 0x18c   : > { %5716 = vst [vmem:[#allocation70_spill] sm:$0xff] %v4750_v9  ;;  %v4755_v38 = vmul.f32 %v5718_v49, %v5717_v62  ;;  %v1894_v6 = vmul.f32 %v1583_v44, %v5723_v51  ;;  %v1896_v4 = vmul.f32 %v1593_v20, %v5724_v57  ;;  %v4767_v41 = vmul.f32 0.5, %v1526_v12  ;;  %v5729_v51 = vld [vmem:[#allocation49_spill] sm:$0xff]  ;;  %vm4830_vm15 = vmor %vm1750_vm2, %vm1751_vm5 }
 0x18d   : > { %5720 = vst [vmem:[#allocation69_spill] sm:$0xff] %v4757_v50  ;;  %v4769_v37 = vmul.f32 0.5, %v1686_v54  ;;  %v1676_v35 = vmul.f32 %v4613_v63, %v1675_v45  ;;  %v2012_v62 = vpack.c.bf16 %v5727_v22, %v5726_v21  ;;  %v1495_v34 = vmul.f32 %v4661_v10, %v4578_v60  ;;  %v5728_v54 = vld [vmem:[#allocation44_spill] sm:$0xff]  ;;  %v5731_v22 = vld [vmem:[#allocation34_spill] sm:$0xff]  ;;  %vm1742_vm1 = vmor %vm1740_vm11, %vm1741_vm13 }
 0x18e   : > { %5719 = vst [vmem:[#allocation67_spill] sm:$0xff] %v4755_v38  ;;  %v4776_v39 = vmax.f32 %v841_v47, 1e-24  ;;  %v2066_v43 = vsel %vm154_vm0, %v1967_v36, 0  ;;  %v1994_v1 = vpack.c.bf16 %v1896_v4, %v1894_v6  ;;  %v1665_v55 = vmul.f32 %v4743_v32, %v4667_v19  ;;  %v5730_v47 = vld [vmem:[#allocation39_spill] sm:$0xff]  ;;  %v5732_v36 = vld [vmem:[#allocation38_spill] sm:$0xff] }
 0x18f   : > { %5725 = vst [vmem:[#allocation66_spill] sm:$0xff] %v4767_v41  ;;  %2209 = vmatpush.bf16.xpose.msrb.mxu1 %v2066_v43  ;;  %v4781_v12 = vmax.f32 %v781_v29, 1e-24  ;;  %v1895_v45 = vmul.f32 %v1583_v44, %v5728_v54  ;;  %v1897_v57 = vmul.f32 %v1593_v20, %v5729_v51  ;;  %v1505_v21 = vmul.f32 %v4676_v59, %v4604_v28  ;;  %v5733_v6 = vld [vmem:[#allocation32_spill] sm:$0xff] }
 0x190   : > { %2216 = vmatpush.bf16.xpose.msrb.mxu2 %v1994_v1  ;;  %v1931_v38 = vmul.f32 %v5731_v22, %v5730_v47  ;;  %v1933_v4 = vmul.f32 %v5733_v6, %v5732_v36  ;;  %v5734_v9 = vsub.f32 1.5, %v4428_v56  ;;  %v4794_v29 = vmul.f32 0.5, %v1676_v35  ;;  %v5736_v56 = vld [vmem:[#allocation35_spill] sm:$0xff]  ;;  %v5741_v36 = vld [vmem:[#allocation64_spill] sm:$0xff] }
 0x191   : > { %v1655_v44 = vmul.f32 %v4759_v5, %v4671_v0  ;;  %v1995_v20 = vpack.c.bf16 %v1897_v57, %v1895_v45  ;;  %v5735_v43 = vsub.f32 1.5, %v4435_v7  ;;  %v4801_v54 = vpop.eup %2498  ;;  %vm1720_vm12 = vweird.f32 %v5736_v56  ;;  %v845_v45 = vpop.xlane.xlu1 %844  ;;  %v5739_v47 = vld [vmem:[#allocation63_spill] sm:$0xff]  ;;  %v5761_v56 = vld [vmem:[#allocation48_spill] sm:$0xff] }
 0x192   : > { %vm1721_vm7 = vweird.f32 %v4307_v25  ;;  %v1496_v35 = vmul.f32 %v4661_v10, %v1495_v34  ;;  %2500 = vrsqrt.f32 %v4776_v39  ;;  %v2013_v7 = vpack.c.bf16 %v1933_v4, %v1931_v38  ;;  %2197 = vmatmul.bf16.vlgmr.msrb.gmra.mxu0 %v5712_v16  ;;  %v4824_v38 = vpop.f32.mrf.mxu1 }
 0x193   : > { %2241 = vmatpush.bf16.xpose.msra.mxu0 %v2012_v62  ;;  %v1559_v62 = vmul.f32 %v4292_v30, %v5734_v9  ;;  %v1569_v1 = vmul.f32 %v5705_v18, %v5735_v43  ;;  %v1688_v9 = vsub.f32 1.5, %v4769_v37  ;;  %vm1731_vm14 = vweird.f32 %v4368_v26  ;;  %v4822_v37 = vpop.f32.mrf.mxu0  ;;  %v5743_v43 = vld [vmem:[#allocation50_spill] sm:$0xff] }
 0x194   : > { %v1666_v40 = vmul.f32 %v4743_v32, %v1665_v55  ;;  %2502 = vrsqrt.f32 %v4781_v12  ;;  %v2108_v51 = vsel %vm154_vm0, %v1995_v20, 0  ;;  %vm1541_vm3 = vweird.f32 %v4453_v42 }
 0x195   : > { %v1563_v34 = vsel %vm1562_vm6, %v4292_v30, %v1559_v62  ;;  %v1506_v55 = vmul.f32 %v4676_v59, %v1505_v21  ;;  %2229 = vmatpush.bf16.xpose.msrb.mxu3 %v2108_v51  ;;  %v2135_v57 = vsel %vm154_vm0, %v2013_v7, 0  ;;  %v1573_v30 = vsel %vm1572_vm10, %v5705_v18, %v1569_v1  ;;  %v773_v18 = vpop.xlane.xlu0 %772  ;;  %v5742_v62 = vld [vmem:[#allocation65_spill] sm:$0xff]  ;;  %v5744_v7 = vld [vmem:[#allocation56_spill] sm:$0xff]  ;;  %v5745_v51 = vld [vmem:[#allocation59_spill] sm:$0xff] }
 0x196   : > { %v1890_v22 = vmul.f32 %v1563_v34, %v5739_v47  ;;  %vm1730_vm8 = vweird.f32 %v5740_v3  ;;  %vm1551_vm4 = vweird.f32 %v5741_v36  ;;  %v1656_v6 = vmul.f32 %v4759_v5, %v1655_v44  ;;  %2338 = vmatmul.msk.bf16.vlgmr.msrb.gmra.mxu1 %vm154_vm0, %v5722_v24  ;;  %v769_v24 = vpop.xlane.xlu2 %768 }
 0x197   : > { %v1475_v21 = vmul.f32 %v4801_v54, %v4700_v31  ;;  %2254 = vmatpush.bf16.xpose.msra.mxu1 %v2135_v57  ;;  %v4848_v4 = vmax.f32 %v845_v45, 1e-24  ;;  %v1892_v20 = vmul.f32 %v1573_v30, %v5742_v62  ;;  %vm1540_vm5 = vweird.f32 %v5743_v43  ;;  %v5746_v57 = vld [vmem:[#allocation51_spill] sm:$0xff] }
 0x198   : > { %v1743_v44 = vsel %vm1742_vm1, %v5711_v52, %v5744_v7  ;;  %v1753_v45 = vsel %vm4830_vm15, %v5709_v48, %v5745_v51  ;;  %vm1550_vm9 = vweird.f32 %v5746_v57  ;;  %v4868_v47 = vmul.f32 %v4582_v58, %v1688_v9  ;;  %v4871_v16 = vpop.eup %2500  ;;  %v5748_v48 = vld [vmem:[#allocation58_spill] sm:$0xff]  ;;  %v5749_v51 = vld [vmem:[#allocation57_spill] sm:$0xff]  ;;  %vm4909_vm15 = vmor %vm1720_vm12, %vm1721_vm7 }
 0x199   : > { %v1678_v62 = vsub.f32 1.5, %v4794_v29  ;;  %v1667_v1 = vmul.f32 0.5, %v1666_v40  ;;  %v1992_v33 = vpack.c.bf16 %v1892_v20, %v1890_v22  ;;  %v4873_v52 = vmul.f32 0.5, %v1496_v35  ;;  %v5750_v22 = vld [vmem:[#allocation60_spill] sm:$0xff]  ;;  %v5751_v20 = vld [vmem:[#allocation62_spill] sm:$0xff]  ;;  %vm4922_vm1 = vmor %vm1730_vm8, %vm1731_vm14 }
 0x19a   : > { %5747 = vst [vmem:[#allocation75_spill] sm:$0xff] %v4868_v47  ;;  %v4875_v13 = vmax.f32 %v773_v18, 1e-24  ;;  %v1926_v7 = vmul.f32 %v1743_v44, %v5748_v48  ;;  %v1928_v0 = vmul.f32 %v1753_v45, %v5749_v51  ;;  %v4879_v41 = vpop.eup %2502  ;;  %v4881_v9 = vmul.f32 0.5, %v1506_v55  ;;  %v5753_v51 = vld [vmem:[#allocation54_spill] sm:$0xff]  ;;  %vm1542_vm14 = vmor %vm1540_vm5, %vm1541_vm3 }
 0x19b   : > { %v1657_v47 = vmul.f32 0.5, %v1656_v6  ;;  %v1476_v29 = vmul.f32 %v4801_v54, %v1475_v21  ;;  %2504 = vrsqrt.f32 %v4848_v4  ;;  %2217 = vmatpush.bf16.xpose.msrb.mxu2 %v1992_v33  ;;  %vm1701_vm13 = vweird.f32 %v5715_v14  ;;  %v5752_v21 = vld [vmem:[#allocation55_spill] sm:$0xff]  ;;  %vm1552_vm3 = vmor %vm1550_vm9, %vm1551_vm4  ;;  %v5762_v57 = vld [vmem:[#allocation82_spill] sm:$0xff] }
 0x19c   : > { %v2010_v35 = vpack.c.bf16 %v1928_v0, %v1926_v7  ;;  %v4886_v40 = vmax.f32 %v769_v24, 1e-24  ;;  %v1891_v18 = vmul.f32 %v1563_v34, %v5750_v22  ;;  %v1893_v48 = vmul.f32 %v1573_v30, %v5751_v20  ;;  %v2148_v0 = vpop.f32.mrf.mxu0  ;;  %v2161_v24 = vpop.f32.mrf.mxu1  ;;  %v5754_v7 = vld [vmem:[#allocation53_spill] sm:$0xff] }
 0x19d   : > { %vm1520_vm2 = vweird.f32 %v4465_v17  ;;  %vm1521_vm11 = vweird.f32 %v4522_v46  ;;  %v1668_v55 = vsub.f32 1.5, %v1667_v1  ;;  %v1635_v6 = vmul.f32 %v4871_v16, %v4776_v39 }
 0x19e   : > { %v1927_v33 = vmul.f32 %v1743_v44, %v5752_v21  ;;  %v1929_v50 = vmul.f32 %v1753_v45, %v5753_v51  ;;  %vm1700_vm6 = vweird.f32 %v5754_v7  ;;  %v1485_v34 = vmul.f32 %v4879_v41, %v4781_v12  ;;  %2242 = vmatpush.bf16.xpose.msra.mxu0 %v2010_v35  ;;  %v837_v24 = vpop.xlane.xlu2 %836  ;;  %v5782_v7 = vld [vmem:[#allocation93_spill] sm:$0xff] }
 0x19f   : > { %2506 = vrsqrt.f32 %v4875_v13  ;;  %v1993_v30 = vpack.c.bf16 %v1893_v48, %v1891_v18  ;;  %v5755_v1 = vsub.f32 1.5, %v4524_v61  ;;  %v1658_v22 = vsub.f32 1.5, %v1657_v47  ;;  %v833_v48 = vpop.xlane.xlu1 %832 }
 0x1a0   : > { %v4913_v20 = vmul.f32 0.5, %v1476_v29  ;;  %v2011_v21 = vpack.c.bf16 %v1929_v50, %v1927_v33  ;;  %v5758_v35 = vsub.f32 1.5, %v4508_v27  ;;  %vm1710_vm12 = vweird.f32 %v5761_v56 }
 0x1a1   : > { %v1539_v44 = vmul.f32 %v4453_v42, %v5755_v1  ;;  %vm1711_vm7 = vweird.f32 %v5718_v49  ;;  %vm1530_vm10 = vweird.f32 %v4513_v23  ;;  %v4930_v50 = vmul.f32 %v4613_v63, %v1678_v62  ;;  %v4940_v3 = vpop.eup %2504 }
 0x1a2   : > { %v1549_v18 = vmul.f32 %v5741_v36, %v5758_v35  ;;  %v1498_v27 = vsub.f32 1.5, %v4873_v52  ;;  %2508 = vrsqrt.f32 %v4886_v40  ;;  %v2105_v47 = vsel %vm154_vm0, %v1993_v30, 0 }
 0x1a3   : > { %v1636_v29 = vmul.f32 %v4871_v16, %v1635_v6  ;;  %2230 = vmatpush.bf16.xpose.msrb.mxu3 %v2105_v47  ;;  %v2132_v62 = vsel %vm154_vm0, %v2011_v21, 0  ;;  %v1723_v33 = vsel %vm4909_vm15, %v4307_v25, %v4501_v2  ;;  %v1733_v51 = vsel %vm4922_vm1, %v4368_v26, %v4504_v15  ;;  %v5765_v21 = vld [vmem:[#allocation76_spill] sm:$0xff]  ;;  %v5767_v47 = vld [vmem:[#allocation78_spill] sm:$0xff] }
 0x1a4   : > { %v1508_v43 = vsub.f32 1.5, %v4881_v9  ;;  %v4962_v6 = vmul.f32 %v4743_v32, %v1668_v55  ;;  %v1486_v0 = vmul.f32 %v4879_v41, %v1485_v34  ;;  %2255 = vmatpush.bf16.xpose.msra.mxu1 %v2132_v62  ;;  %v1543_v25 = vsel %vm1542_vm14, %v4453_v42, %v1539_v44  ;;  %v5763_v42 = vld [vmem:[#allocation81_spill] sm:$0xff]  ;;  %v5764_v44 = vld [vmem:[#allocation71_spill] sm:$0xff]  ;;  %vm5002_vm14 = vmor %vm1700_vm6, %vm1701_vm13 }
 0x1a5   : > { %vm1510_vm8 = vweird.f32 %v4604_v28  ;;  %vm1511_vm5 = vweird.f32 %v4676_v59  ;;  %v4969_v26 = vmul.f32 %v4759_v5, %v1658_v22  ;;  %v1478_v2 = vsub.f32 1.5, %v4913_v20  ;;  %v4974_v30 = vpop.eup %2506  ;;  %vm5022_vm13 = vmor %vm1520_vm2, %vm1521_vm11 }
 0x1a6   : > { %v1553_v15 = vsel %vm1552_vm3, %v5741_v36, %v1549_v18  ;;  %v1886_v55 = vmul.f32 %v1543_v25, %v5762_v57  ;;  %vm1681_vm4 = vweird.f32 %v4613_v63  ;;  %v4977_v34 = vmax.f32 %v833_v48, 1e-24  ;;  %v5766_v18 = vld [vmem:[#allocation79_spill] sm:$0xff] }
 0x1a7   : > { %v1888_v1 = vmul.f32 %v1553_v15, %v5763_v42  ;;  %v1922_v45 = vmul.f32 %v1723_v33, %v5764_v44  ;;  %v1924_v22 = vmul.f32 %v1733_v51, %v5765_v21  ;;  %v4984_v35 = vmul.f32 0.5, %v1636_v29 }
 0x1a8   : > { %v1645_v36 = vmul.f32 %v4940_v3, %v4848_v4  ;;  %v1887_v61 = vmul.f32 %v1543_v25, %v5766_v18  ;;  %v1889_v62 = vmul.f32 %v1553_v15, %v5767_v47  ;;  %v4990_v48 = vpop.eup %2508  ;;  %vm1680_vm1 = vweird.f32 %v4553_v53  ;;  %v5770_v15 = vld [vmem:[#allocation68_spill] sm:$0xff] }
 0x1a9   : > { %v4994_v57 = vmul.f32 0.5, %v1486_v0  ;;  %v1990_v42 = vpack.c.bf16 %v1888_v1, %v1886_v55  ;;  %v2008_v44 = vpack.c.bf16 %v1924_v22, %v1922_v45  ;;  %v4996_v21 = vmax.f32 %v837_v24, 1e-24  ;;  %v5771_v24 = vld [vmem:[#allocation73_spill] sm:$0xff]  ;;  %v5776_v22 = vld [vmem:[#allocation66_spill] sm:$0xff] }
 0x1aa   : > { %v1465_v0 = vmul.f32 %v4974_v30, %v4875_v13  ;;  %v1991_v25 = vpack.c.bf16 %v1889_v62, %v1887_v61  ;;  %v1923_v55 = vmul.f32 %v1723_v33, %v5770_v15  ;;  %v1925_v1 = vmul.f32 %v1733_v51, %v5771_v24  ;;  %v5774_v51 = vld [vmem:[#allocation69_spill] sm:$0xff]  ;;  %v5781_v24 = vld [vmem:[#allocation91_spill] sm:$0xff] }
 0x1ab   : > { %2510 = vrsqrt.f32 %v4977_v34  ;;  %2218 = vmatpush.bf16.xpose.msrb.mxu2 %v1990_v42  ;;  %2243 = vmatpush.bf16.xpose.msra.mxu0 %v2008_v44  ;;  %v2160_v33 = vadd.f32 %v4824_v38, %v4822_v37  ;;  %v5775_v17 = vsub.f32 1.5, %v5774_v51  ;;  %v5777_v18 = vsub.f32 1.5, %v5776_v22  ;;  %v5779_v42 = vld [vmem:[#allocation41_spill] sm:$0xff]  ;;  %v5780_v44 = vld [vmem:[#allocation70_spill] sm:$0xff]  ;;  %v5784_v51 = vld [vmem:[#allocation87_spill] sm:$0xff] }
 0x1ac   : > { %vm5778_vm2 = vweird.f32 %v4565_v11  ;;  %vm1490_vm15 = vweird.f32 %v4781_v12  ;;  %vm1491_vm9 = vweird.f32 %v4879_v41  ;;  %v1646_v47 = vmul.f32 %v4940_v3, %v1645_v36 }
 0x1ad   : > { %v1519_v45 = vmul.f32 %v4522_v46, %v5775_v17  ;;  %v1529_v61 = vmul.f32 %v4565_v11, %v5777_v18  ;;  %vm1532_vm11 = vmor %vm1530_vm10, %vm5778_vm2  ;;  %v1455_v37 = vmul.f32 %v4990_v48, %v4886_v40  ;;  %v2102_v38 = vsel %vm154_vm0, %v1991_v25, 0  ;;  %2267 = vst [vmem:[%s5016_s28] sm:$0xff] %v2160_v33 }
 0x1ae   : > { %v2009_v62 = vpack.c.bf16 %v1925_v1, %v1923_v55  ;;  %vm1660_vm6 = vweird.f32 %v5779_v42  ;;  %vm1661_vm3 = vweird.f32 %v4759_v5  ;;  %2512 = vrsqrt.f32 %v4996_v21  ;;  %2231 = vmatpush.bf16.xpose.msrb.mxu3 %v2102_v38  ;;  %vm1712_vm10 = vmor %vm1710_vm12, %vm1711_vm7 }
 0x1af   : > { %v1523_v23 = vsel %vm5022_vm13, %v4522_v46, %v1519_v45  ;;  %v1533_v36 = vsel %vm1532_vm11, %v4565_v11, %v1529_v61  ;;  %v1703_v25 = vsel %vm5002_vm14, %v5715_v14, %v5780_v44  ;;  %v1466_v15 = vmul.f32 %v4974_v30, %v1465_v0  ;;  %v5783_v11 = vld [vmem:[#allocation67_spill] sm:$0xff]  ;;  %v5785_v14 = vld [vmem:[#allocation90_spill] sm:$0xff]  ;;  %vm5082_vm12 = vmor %vm1510_vm8, %vm1511_vm5 }
 0x1b0   : > { %v2129_v55 = vsel %vm154_vm0, %v2009_v62, 0  ;;  %v1882_v1 = vmul.f32 %v1523_v23, %v5781_v24  ;;  %v1884_v46 = vmul.f32 %v1533_v36, %v5782_v7  ;;  %v1713_v33 = vsel %vm1712_vm10, %v5718_v49, %v5783_v11  ;;  %v5786_v45 = vld [vmem:[#allocation94_spill] sm:$0xff]  ;;  %v5789_v62 = vld [vmem:[#allocation89_spill] sm:$0xff]  ;;  %v5790_v44 = vld [vmem:[#allocation84_spill] sm:$0xff] }
 0x1b1   : > { %2256 = vmatpush.bf16.xpose.msra.mxu1 %v2129_v55  ;;  %v1918_v29 = vmul.f32 %v1703_v25, %v5784_v51  ;;  %v1883_v17 = vmul.f32 %v1523_v23, %v5785_v14  ;;  %v1885_v22 = vmul.f32 %v1533_v36, %v5786_v45  ;;  %v1638_v56 = vsub.f32 1.5, %v4984_v35  ;;  %v5076_v38 = vpop.eup %2510  ;;  %v5791_v24 = vld [vmem:[#allocation86_spill] sm:$0xff]  ;;  %vm1682_vm7 = vmor %vm1680_vm1, %vm1681_vm4  ;;  %v5801_v7 = vld [vmem:[#allocation105_spill] sm:$0xff] }
 0x1b2   : > { %v1488_v0 = vsub.f32 1.5, %v4994_v57  ;;  %v1456_v18 = vmul.f32 %v4990_v48, %v1455_v37  ;;  %v1988_v61 = vpack.c.bf16 %v1884_v46, %v1882_v1  ;;  %v1920_v23 = vmul.f32 %v1713_v33, %v5789_v62  ;;  %v5813_v49 = vld [vmem:[#allocation99_spill] sm:$0xff]  ;;  %v5824_v35 = vld [vmem:[#allocation12_spill] sm:$0xff] }
 0x1b3   : > { %v1989_v36 = vpack.c.bf16 %v1885_v22, %v1883_v17  ;;  %v1919_v55 = vmul.f32 %v1703_v25, %v5790_v44  ;;  %v1921_v57 = vmul.f32 %v1713_v33, %v5791_v24  ;;  %v5093_v37 = vmul.f32 0.5, %v1646_v47  ;;  %v5808_v17 = vld [vmem:[#allocation102_spill] sm:$0xff] }
 0x1b4   : > { %v1499_v28 = vmul.f32 %v4661_v10, %v1498_v27  ;;  %v1509_v25 = vmul.f32 %v4676_v59, %v1508_v43  ;;  %v5103_v1 = vpop.eup %2512  ;;  %vm5792_vm5 = vweird.f32 %v4661_v10  ;;  %vm5793_vm4 = vweird.f32 %v4578_v60  ;;  %2219 = vmatpush.bf16.xpose.msrb.mxu2 %v1988_v61 }
 0x1b5   : > { %vm1502_vm1 = vmor %vm5793_vm4, %vm5792_vm5  ;;  %v5109_v53 = vmul.f32 0.5, %v1466_v15  ;;  %vm1460_vm13 = vweird.f32 %v4886_v40  ;;  %v2006_v47 = vpack.c.bf16 %v1920_v23, %v1918_v29  ;;  %v2007_v52 = vpack.c.bf16 %v1921_v57, %v1919_v55  ;;  %v5807_v29 = vld [vmem:[#allocation98_spill] sm:$0xff]  ;;  %v5814_v23 = vld [vmem:[#allocation97_spill] sm:$0xff] }
 0x1b6   : > { %v1683_v27 = vsel %vm1682_vm7, %v4613_v63, %v4930_v50  ;;  %vm5794_vm2 = vweird.f32 %v4582_v58  ;;  %vm5795_vm11 = vweird.f32 %v4532_v8  ;;  %vm1640_vm14 = vweird.f32 %v4776_v39 }
 0x1b7   : > { %vm1692_vm10 = vmor %vm5795_vm11, %vm5794_vm2  ;;  %vm1641_vm8 = vweird.f32 %v4871_v16  ;;  %v1615_v60 = vmul.f32 %v5076_v38, %v4977_v34  ;;  %v2099_v9 = vsel %vm154_vm0, %v1989_v36, 0  ;;  %v1503_v43 = vsel %vm1502_vm1, %v4661_v10, %v1499_v28  ;;  %2244 = vmatpush.bf16.xpose.msra.mxu0 %v2006_v47  ;;  %v5800_v10 = vld [vmem:[#allocation101_spill] sm:$0xff] }
 0x1b8   : > { %v1513_v63 = vsel %vm5082_vm12, %v4676_v59, %v1509_v25  ;;  %vm5796_vm7 = vweird.f32 %v4743_v32  ;;  %vm5797_vm5 = vweird.f32 %v4667_v19  ;;  %vm1650_vm2 = vweird.f32 %v4848_v4  ;;  %2232 = vmatpush.bf16.xpose.msrb.mxu3 %v2099_v9  ;;  %v5802_v59 = vld [vmem:[#allocation75_spill] sm:$0xff]  ;;  %v5829_v19 = vld [vmem:[#allocation2_spill] sm:$0xff] }
 0x1b9   : > { %vm5131_vm4 = vmor %vm5797_vm5, %vm5796_vm7  ;;  %vm1651_vm11 = vweird.f32 %v4940_v3  ;;  %v1457_v50 = vmul.f32 0.5, %v1456_v18  ;;  %v1878_v15 = vmul.f32 %v1503_v43, %v5800_v10  ;;  %v1880_v46 = vmul.f32 %v1513_v63, %v5801_v7  ;;  %v5812_v18 = vld [vmem:[#allocation106_spill] sm:$0xff] }
 0x1ba   : > { %v1693_v11 = vsel %vm1692_vm10, %v4582_v58, %v5802_v59  ;;  %vm5803_vm12 = vweird.f32 %v4801_v54  ;;  %vm5804_vm1 = vweird.f32 %v4700_v31  ;;  %v1625_v33 = vmul.f32 %v5103_v1, %v4996_v21  ;;  %vm5158_vm10 = vmor %vm1490_vm15, %vm1491_vm9  ;;  %v5811_v31 = vld [vmem:[#allocation96_spill] sm:$0xff] }
 0x1bb   : > { %vm5145_vm7 = vmor %vm5804_vm1, %vm5803_vm12  ;;  %v2126_v51 = vsel %vm154_vm0, %v2007_v52, 0  ;;  %v1914_v14 = vmul.f32 %v1683_v27, %v5807_v29  ;;  %v1879_v45 = vmul.f32 %v1503_v43, %v5808_v17  ;;  %v1916_v22 = vmul.f32 %v1693_v11, %v5811_v31  ;;  %v5818_v43 = vld [vmem:[#allocation6_spill] sm:$0xff] }
 0x1bc   : > { %2257 = vmatpush.bf16.xpose.msra.mxu1 %v2126_v51  ;;  %v1881_v61 = vmul.f32 %v1513_v63, %v5812_v18  ;;  %v1915_v62 = vmul.f32 %v1683_v27, %v5813_v49  ;;  %v1917_v36 = vmul.f32 %v1693_v11, %v5814_v23  ;;  %vm5170_vm5 = vmor %vm1660_vm6, %vm1661_vm3  ;;  %v1648_v12 = vsub.f32 1.5, %v5093_v37  ;;  %v5830_v51 = vld [vmem:[#allocation4_spill] sm:$0xff]  ;;  %v5831_v49 = vld [vmem:[#allocation27_spill] sm:$0xff] }
 0x1bd   : > { %vm1461_vm9 = vweird.f32 %v4990_v48  ;;  %v1479_v55 = vmul.f32 %v4801_v54, %v1478_v2  ;;  %v1489_v24 = vmul.f32 %v4879_v41, %v1488_v0  ;;  %v1458_v57 = vsub.f32 1.5, %v1457_v50  ;;  %v5825_v50 = vld [vmem:[#allocation18_spill] sm:$0xff]  ;;  %vm5226_vm12 = vmor %vm1640_vm14, %vm1641_vm8 }
 0x1be   : > { %v1616_v28 = vmul.f32 %v5076_v38, %v1615_v60  ;;  %v1986_v25 = vpack.c.bf16 %v1880_v46, %v1878_v15  ;;  %v1987_v47 = vpack.c.bf16 %v1881_v61, %v1879_v45  ;;  %v1468_v42 = vsub.f32 1.5, %v5109_v53  ;;  %v5817_v60 = vld [vmem:[#allocation15_spill] sm:$0xff]  ;;  %v5826_v15 = vld [vmem:[#allocation5_spill] sm:$0xff] }
 0x1bf   : > { %v2005_v52 = vpack.c.bf16 %v1917_v36, %v1915_v62  ;;  %v1483_v37 = vsel %vm5145_vm7, %v4801_v54, %v1479_v55  ;;  %v1493_v20 = vsel %vm5158_vm10, %v4879_v41, %v1489_v24  ;;  %v1626_v2 = vmul.f32 %v5103_v1, %v1625_v33  ;;  %v5833_v36 = vld [vmem:[#allocation21_spill] sm:$0xff]  ;;  %v5835_v55 = vld [vmem:[#allocation7_spill] sm:$0xff] }
 0x1c0   : > { %2220 = vmatpush.bf16.xpose.msrb.mxu2 %v1986_v25  ;;  %v2004_v0 = vpack.c.bf16 %v1916_v22, %v1914_v14  ;;  %v1663_v27 = vsel %vm5170_vm5, %v4759_v5, %v4969_v26  ;;  %v1673_v53 = vsel %vm5131_vm4, %v4743_v32, %v4962_v6  ;;  %v1639_v54 = vmul.f32 %v4871_v16, %v1638_v56  ;;  %v5823_v32 = vld [vmem:[#allocation3_spill] sm:$0xff]  ;;  %vm1462_vm4 = vmor %vm1460_vm13, %vm1461_vm9  ;;  %v5841_v5 = vld [vmem:[#allocation29_spill] sm:$0xff] }
 0x1c1   : > { %v2096_v41 = vsel %vm154_vm0, %v1987_v47, 0  ;;  %v1875_v9 = vmul.f32 %v1483_v37, %v5817_v60  ;;  %v1877_v63 = vmul.f32 %v1493_v20, %v5818_v43  ;;  %vm5819_vm15 = vweird.f32 %v4974_v30  ;;  %vm1652_vm13 = vmor %vm1650_vm2, %vm1651_vm11 }
 0x1c2   : > { %vm5820_vm3 = vweird.f32 %v4875_v13  ;;  %v1617_v26 = vmul.f32 0.5, %v1616_v28  ;;  %2245 = vmatpush.bf16.xpose.msra.mxu0 %v2004_v0  ;;  %2233 = vmatpush.bf16.xpose.msrb.mxu3 %v2096_v41  ;;  %v1874_v6 = vmul.f32 %v1483_v37, %v5823_v32  ;;  %v1876_v56 = vmul.f32 %v1493_v20, %v5824_v35  ;;  %v5838_v37 = vld [vmem:[#allocation19_spill] sm:$0xff]  ;;  %v5843_v35 = vld [vmem:[#allocation17_spill] sm:$0xff] }
 0x1c3   : > { %vm5207_vm6 = vmor %vm5820_vm3, %vm5819_vm15  ;;  %v1459_v8 = vmul.f32 %v4990_v48, %v1458_v57  ;;  %v2123_v13 = vsel %vm154_vm0, %v2005_v52, 0  ;;  %v1911_v10 = vmul.f32 %v1663_v27, %v5825_v50  ;;  %v1913_v7 = vmul.f32 %v1673_v53, %v5826_v15  ;;  %v5836_v57 = vld [vmem:[#allocation24_spill] sm:$0xff]  ;;  %v5842_v32 = vld [vmem:[#allocation11_spill] sm:$0xff] }
 0x1c4   : > { %v1469_v46 = vmul.f32 %v4974_v30, %v1468_v42  ;;  %v1649_v11 = vmul.f32 %v4940_v3, %v1648_v12  ;;  %v1627_v40 = vmul.f32 0.5, %v1626_v2  ;;  %2258 = vmatpush.bf16.xpose.msra.mxu1 %v2123_v13  ;;  %v1910_v33 = vmul.f32 %v1663_v27, %v5829_v19  ;;  %v5834_v12 = vld [vmem:[#allocation30_spill] sm:$0xff] }
 0x1c5   : > { %v1912_v29 = vmul.f32 %v1673_v53, %v5830_v51  ;;  %v1985_v14 = vpack.c.bf16 %v1877_v63, %v1875_v9  ;;  %v1984_v17 = vpack.c.bf16 %v1876_v56, %v1874_v6  ;;  %v1463_v39 = vsel %vm1462_vm4, %v4990_v48, %v1459_v8  ;;  %v5837_v42 = vld [vmem:[#allocation14_spill] sm:$0xff]  ;;  %v5840_v63 = vld [vmem:[#allocation8_spill] sm:$0xff]  ;;  %v5844_v56 = vld [vmem:[#allocation9_spill] sm:$0xff] }
 0x1c6   : > { %v1473_v45 = vsel %vm5207_vm6, %v4974_v30, %v1469_v46  ;;  %v1618_v58 = vsub.f32 1.5, %v1617_v26  ;;  %vm1620_vm14 = vweird.f32 %v4977_v34  ;;  %v2003_v31 = vpack.c.bf16 %v1913_v7, %v1911_v10  ;;  %v5832_v30 = vld [vmem:[#allocation16_spill] sm:$0xff]  ;;  %v5839_v9 = vld [vmem:[#allocation26_spill] sm:$0xff] }
 0x1c7   : > { %v1628_v22 = vsub.f32 1.5, %v1627_v40  ;;  %v2002_v18 = vpack.c.bf16 %v1912_v29, %v1910_v33  ;;  %v1643_v4 = vsel %vm5226_vm12, %v4871_v16, %v1639_v54  ;;  %v1653_v61 = vsel %vm1652_vm13, %v4940_v3, %v1649_v11 }
 0x1c8   : > { %2221 = vmatpush.bf16.xpose.msrb.mxu2 %v1984_v17  ;;  %vm1621_vm8 = vweird.f32 %v5076_v38  ;;  %v2093_v48 = vsel %vm154_vm0, %v1985_v14, 0  ;;  %v1871_v62 = vmul.f32 %v1463_v39, %v5831_v49  ;;  %v1873_v23 = vmul.f32 %v1473_v45, %v5832_v30 }
 0x1c9   : > { %vm1630_vm2 = vweird.f32 %v4996_v21  ;;  %vm1631_vm11 = vweird.f32 %v5103_v1  ;;  %v1870_v44 = vmul.f32 %v1463_v39, %v5833_v36  ;;  %v1872_v16 = vmul.f32 %v1473_v45, %v5834_v12  ;;  %vm1622_vm1 = vmor %vm1620_vm14, %vm1621_vm8 }
 0x1ca   : > { %2246 = vmatpush.bf16.xpose.msra.mxu0 %v2002_v18  ;;  %2234 = vmatpush.bf16.xpose.msrb.mxu3 %v2093_v48  ;;  %v2120_v3 = vsel %vm154_vm0, %v2003_v31, 0  ;;  %v1907_v24 = vmul.f32 %v1643_v4, %v5835_v55  ;;  %v1909_v28 = vmul.f32 %v1653_v61, %v5836_v57  ;;  %v1619_v25 = vmul.f32 %v5076_v38, %v1618_v58  ;;  %vm1632_vm7 = vmor %vm1630_vm2, %vm1631_vm11 }
 0x1cb   : > { %v1629_v47 = vmul.f32 %v5103_v1, %v1628_v22  ;;  %v1906_v52 = vmul.f32 %v1643_v4, %v5837_v42  ;;  %v1908_v20 = vmul.f32 %v1653_v61, %v5838_v37  ;;  %v1983_v2 = vpack.c.bf16 %v1873_v23, %v1871_v62 }
 0x1cc   : > { %2259 = vmatpush.bf16.xpose.msra.mxu1 %v2120_v3  ;;  %v1982_v0 = vpack.c.bf16 %v1872_v16, %v1870_v44  ;;  %v2001_v27 = vpack.c.bf16 %v1909_v28, %v1907_v24  ;;  %v1623_v54 = vsel %vm1622_vm1, %v5076_v38, %v1619_v25 }
 0x1cd   : > { %v2000_v53 = vpack.c.bf16 %v1908_v20, %v1906_v52  ;;  %v1633_v34 = vsel %vm1632_vm7, %v5103_v1, %v1629_v47  ;;  %v2090_v41 = vsel %vm154_vm0, %v1983_v2, 0  ;;  %v1903_v43 = vmul.f32 %v1623_v54, %v5839_v9 }
 0x1ce   : > { %v2117_v60 = vsel %vm154_vm0, %v2001_v27, 0  ;;  %v1905_v21 = vmul.f32 %v1633_v34, %v5840_v63  ;;  %v1902_v26 = vmul.f32 %v1623_v54, %v5841_v5  ;;  %v1904_v6 = vmul.f32 %v1633_v34, %v5842_v32 }
 0x1d0   : > { %2222 = vmatpush.bf16.xpose.msrb.mxu2 %v1982_v0  ;;  %v1999_v38 = vpack.c.bf16 %v1905_v21, %v1903_v43  ;;  %v1998_v1 = vpack.c.bf16 %v1904_v6, %v1902_v26 }
 0x1d2   : > { %2247 = vmatpush.bf16.xpose.msra.mxu0 %v2000_v53  ;;  %2235 = vmatpush.bf16.xpose.msrb.mxu3 %v2090_v41  ;;  %v2114_v8 = vsel %vm154_vm0, %v1999_v38, 0 }
 0x1d4   : > { %2260 = vmatpush.bf16.xpose.msra.mxu1 %v2117_v60 }
 0x1d7   : > { %2223 = vmatmul.bf16.vlgmr.msrb.gmra.mxu2 %v5843_v35 }
 0x1d9   : > { %2339 = vmatmul.msk.bf16.vlgmr.msrb.gmra.mxu3 %vm154_vm0, %v5844_v56 }
 0x1da   : > { %2248 = vmatpush.bf16.xpose.msra.mxu0 %v1998_v1 }
 0x1dc   : > { %2261 = vmatpush.bf16.xpose.msra.mxu1 %v2114_v8 }
 0x1e1   : > { %2249 = vmatmul.bf16.vlgmr.msra.gmra.mxu0 %v5843_v35 }
 0x1e3   : > { %2340 = vmatmul.msk.bf16.vlgmr.msra.gmra.mxu1 %vm154_vm0, %v5844_v56 }
 0x20a   : > { %v2172_v13 = vpop.f32.mrf.mxu2 }
 0x20e   : > { %v2185_v50 = vpop.f32.mrf.mxu3 }
 0x20f   : > { %v2186_v10 = vadd.f32 %v2185_v50, %v2172_v13  ;;  %v2198_v15 = vpop.f32.mrf.mxu0 }
 0x211   : > { %2268 = vst [vmem:[%s5016_s28 + $0x8] sm:$0xff] %v2186_v10 }
 0x212   : > { %v2174_v59 = vpop.f32.mrf.mxu2 }
 0x213   : > { %v2211_v7 = vpop.f32.mrf.mxu1 }
 0x214   : > { %v2212_v46 = vadd.f32 %v2211_v7, %v2198_v15 }
 0x216   : > { %2269 = vst [vmem:[%s5016_s28 + $0x10] sm:$0xff] %v2212_v46  ;;  %v2187_v11 = vpop.f32.mrf.mxu3 }
 0x217   : > { %v2200_v40 = vpop.f32.mrf.mxu0 }
 0x21b   : > { %v2213_v19 = vpop.f32.mrf.mxu1 }
 0x25a   : > { %v2224_v33 = vpop.f32.mrf.mxu2 }
 0x25c   : > { %v2237_v51 = vpop.f32.mrf.mxu3 }
 0x25d   : > { %v2238_v29 = vadd.f32 %v2237_v51, %v2224_v33 }
 0x25e   : > { %v2250_v14 = vpop.f32.mrf.mxu0 }
 0x25f   : > { %2270 = vst [vmem:[%s5016_s28 + $0x18] sm:$0xff] %v2238_v29 }
 0x260   : > { %v2263_v17 = vpop.f32.mrf.mxu1 }
 0x261   : > { %v2264_v39 = vadd.f32 %v2263_v17, %v2250_v14 }
 0x262   : > { %v2226_v45 = vpop.f32.mrf.mxu2 }
 0x263   : > { %2271 = vst [vmem:[%s5016_s28 + $0x20] sm:$0xff] %v2264_v39 }
 0x264   : > { %v2239_v58 = vpop.f32.mrf.mxu3 }
 0x266   : > { %v2252_v31 = vpop.f32.mrf.mxu0 }
 0x268   : > { %v2265_v22 = vpop.f32.mrf.mxu1 }
 0x269 PF: > { %s12_s9 = sadd.s32 1, %s2522_s9  }
 0x26a   : > { %p9_p5 = scmp.ge.s32.totalorder %s12_s9, 4  }
 0x26c   :  { %11 = sbr.rel (!%p9_p5) target bundleno = 1 (0x1), region = 58 }

</bundles_post_ra>
